<compile_context>
chip_gen: v6e
topology: v6e:2x2x1
jax: 0.10.0
libtpu: 0.0.40
codegen_flags: <defaults>
</compile_context>

<pallas_src>
import functools

import jax
import jax.numpy as jnp
from jax.experimental import pallas as pl
from jax.experimental.pallas import tpu as pltpu

BN_EPS = 1e-5

# layer_config / params were not given in the spec -- small, self-consistent choice
# (16^3 input, all MaxPool3d are kernel=2, stride=2, spatial collapses to 1x1x1).
LAYER_CONFIG = {
    "conv1": dict(in_channels=1,  out_channels=8,  kernel_size=3, stride=1, padding=1),
    "conv2": dict(in_channels=8,  out_channels=16, kernel_size=3, stride=1, padding=1),
    "conv3": dict(in_channels=16, out_channels=16, kernel_size=3, stride=1, padding=1),
    "conv4": dict(in_channels=16, out_channels=16, kernel_size=3, stride=1, padding=1),
    "fc1": {"in": 16, "out": 32},
    "fc2": {"in": 32, "out": 4},
}

_PARAMS_PARALLEL_1D = pltpu.CompilerParams(
    dimension_semantics=("parallel",),
    vmem_limit_bytes=32 * 1024 * 1024,
)


# -------------------- Pallas kernels --------------------

def _conv_bn_relu_kernel(p_ref, w_ref, shift_ref, o_ref):
    """o = relu(patches @ w_bnfolded + shift); bf16 MXU operands, f32 accumulate/epilogue."""
    acc = jnp.dot(p_ref[...], w_ref[...], preferred_element_type=jnp.float32)
    o_ref[...] = jnp.maximum(acc + shift_ref[...], 0.0)


def conv_bn_relu(patches, wmat, shift):
    """(M,K)bf16 @ (K,Cout)bf16 + shift, ReLU. Grid tiled over M for pipelining/megacore."""
    M, K = patches.shape
    Kw, Cout = wmat.shape
    assert K == Kw
    tm = 512 if (M % 512 == 0) else M
    assert M % tm == 0 and tm % 8 == 0, "row count must be a multiple of 8"
    grid = (M // tm,)
    return pl.pallas_call(
        _conv_bn_relu_kernel,
        out_shape=jax.ShapeDtypeStruct((M, Cout), jnp.float32),
        grid=grid,
        in_specs=[
            pl.BlockSpec((tm, K), lambda i: (i, 0)),
            pl.BlockSpec((K, Cout), lambda i: (0, 0)),
            pl.BlockSpec((1, Cout), lambda i: (0, 0)),
        ],
        out_specs=pl.BlockSpec((tm, Cout), lambda i: (i, 0)),
        compiler_params=_PARAMS_PARALLEL_1D,
    )(patches, wmat, shift)


def _maxpool_kernel(x_ref, o_ref, *, h2, c):
    """2x2x2 max-pool on a (bd, 2*h2, 2, w2, 2*c) view; only static slices + max."""
    x = x_ref[...]                                       # (bd, 2*h2, 2, w2, 2c)
    m = jnp.maximum(x[:, :h2], x[:, h2:])                # depth pair  -> (bd, h2, 2, w2, 2c)
    m = jnp.maximum(m[:, :, 0], m[:, :, 1])              # height pair -> (bd, h2, w2, 2c)
    o_ref[...] = jnp.maximum(m[..., :c], m[..., c:])     # width pair  -> (bd, h2, w2, c)


def maxpool3d_2x2x2(y2d, n, d, h, w, c):
    """MaxPool3d(kernel=2, stride=2). Input (M=n*d*h*w, c) channels-last rows in
    (n,d,h,w) order; output ((n*d/2*h/2*w/2), c) in the same convention."""
    assert d % 2 == 0 and h % 2 == 0 and w % 2 == 0, "MaxPool3d(2,2) needs even spatial dims"
    d2, h2, w2 = d // 2, h // 2, w // 2
    # Free row-major reshape: (n,d2,ad,h2,ah,w2,aw,c) -> merge (n,d2), (ad,h2), (aw,c).
    xv = y2d.reshape(n * d2, 2 * h2, 2, w2, 2 * c)
    leading = n * d2
    slab_bytes = y2d.size * y2d.dtype.itemsize
    # Small slabs (<=4 MiB): one full block beats per-step overhead. Large slabs: tile
    # per depth-pair group (block leading dim 1) so VMEM stays bounded as batch grows.
    bd = leading if slab_bytes <= (4 << 20) else 1
    grid = (leading // bd,)
    out = pl.pallas_call(
        functools.partial(_maxpool_kernel, h2=h2, c=c),
        out_shape=jax.ShapeDtypeStruct((n * d2, h2, w2, c), jnp.float32),
        grid=grid,
        in_specs=[pl.BlockSpec((bd, 2 * h2, 2, w2, 2 * c), lambda i: (i, 0, 0, 0, 0))],
        out_specs=pl.BlockSpec((bd, h2, w2, c), lambda i: (i, 0, 0, 0)),
        compiler_params=_PARAMS_PARALLEL_1D,
    )(xv)
    return out.reshape(n * d2 * h2 * w2, c), (n, d2, h2, w2, c)


def _fc_head_kernel(x_ref, w1_ref, b1_ref, w2_ref, b2_ref, out_ref, fcc1_ref):
    """fcc1 = relu(x @ w1 + b1); out = logsoftmax(fcc1 @ w2 + b2). Single fused call."""
    hact = jnp.dot(x_ref[...], w1_ref[...], preferred_element_type=jnp.float32) + b1_ref[...]
    hact = jnp.maximum(hact, 0.0)
    fcc1_ref[...] = hact
    # TODO(synk): Dropout on fcc1 is identity in eval mode; train-mode dropout not implemented.
    z = jnp.dot(hact, w2_ref[...], preferred_element_type=jnp.float32) + b2_ref[...]
    m = jnp.max(z, axis=1, keepdims=True)
    out_ref[...] = z - (m + jnp.log(jnp.sum(jnp.exp(z - m), axis=1, keepdims=True)))


def fc_head(flat, fc1, fc2):
    n, k1 = flat.shape
    k1w, h1 = fc1["w"].shape
    h1w, nout = fc2["w"].shape
    assert k1 == k1w and h1 == h1w
    return pl.pallas_call(
        _fc_head_kernel,
        out_shape=(jax.ShapeDtypeStruct((n, nout), jnp.float32),
                   jax.ShapeDtypeStruct((n, h1), jnp.float32)),
        grid=(1,),
        in_specs=[
            pl.BlockSpec((n, k1), lambda i: (0, 0)),
            pl.BlockSpec((k1, h1), lambda i: (0, 0)),
            pl.BlockSpec((1, h1), lambda i: (0, 0)),
            pl.BlockSpec((h1, nout), lambda i: (0, 0)),
            pl.BlockSpec((1, nout), lambda i: (0, 0)),
        ],
        out_specs=(pl.BlockSpec((n, nout), lambda i: (0, 0)),
                   pl.BlockSpec((n, h1), lambda i: (0, 0))),
        compiler_params=pltpu.CompilerParams(
            dimension_semantics=("arbitrary",),
            vmem_limit_bytes=32 * 1024 * 1024),
    )(flat, fc1["w"], fc1["b"], fc2["w"], fc2["b"])


# -------------------- JAX glue (channels-last, transpose-free) --------------------

def im2col_3d_cl(x2d, n, d, h, w, c, k=3, pad=1):
    """Channels-last im2col: (M, C) -> (M, k^3*C) with feature order (kd, kh, kw, ci).
    Pure slice + concatenate -- no transposes. Cast to bf16 for the MXU."""
    x5 = x2d.reshape(n, d, h, w, c).astype(jnp.bfloat16)
    xp = jnp.pad(x5, ((0, 0), (pad, pad), (pad, pad), (pad, pad), (0, 0)))
    slabs = [xp[:, kd:kd + d, kh:kh + h, kw:kw + w, :]
             for kd in range(k) for kh in range(k) for kw in range(k)]
    patches = jnp.concatenate(slabs, axis=-1)        # (n, d, h, w, k^3*c)
    return patches.reshape(n * d * h * w, k * k * k * c)


def conv_bn_relu_pool(x2d, shape, prep):
    """One Conv3d(k=3,s=1,p=1)+BN(eval)+ReLU (fused Pallas matmul) + MaxPool3d(2,2)."""
    n, d, h, w, c = shape
    patches = im2col_3d_cl(x2d, n, d, h, w, c, k=3, pad=1)          # (M, 27*Cin) bf16
    y = conv_bn_relu(patches, prep["wmat"], prep["shift"])          # (M, Cout) f32
    cout = prep["wmat"].shape[1]
    # TODO(synk): Dropout3d is identity in eval mode; train-mode channel dropout not implemented.
    return maxpool3d_2x2x2(y, n, d, h, w, cout)


def cnn_vanilla_forward(x, prep):
    """x: NCDHW float32. Returns (logsoftmax output, fcc1) like the PyTorch module."""
    n, c, d, h, w = x.shape
    # one-time conversion to channels-last 2-D: rows = (n, d, h, w), cols = channels
    x2d = jnp.transpose(x, (0, 2, 3, 4, 1)).reshape(n * d * h * w, c)
    shape = (n, d, h, w, c)
    for name in ("conv1", "conv2", "conv3", "conv4"):
        x2d, shape = conv_bn_relu_pool(x2d, shape, prep[name])
    n_, d_, h_, w_, c_ = shape
    assert d_ == 1 and h_ == 1 and w_ == 1, "fc1 in-features assume spatial dims reduce to 1"
    flat = x2d.reshape(n_, c_ * d_ * h_ * w_)
    output, fcc1 = fc_head(flat, prep["fc1"], prep["fc2"])
    return output, fcc1


# -------------------- parameter init + one-time prep --------------------

def kaiming_uniform(key, shape, fan_in):
    bound = jnp.sqrt(6.0 / fan_in)
    return jax.random.uniform(key, shape, jnp.float32, -bound, bound)


def init_params(key):
    """PyTorch-layout parameters (Conv3d weight (Cout,Cin,kD,kH,kW), Linear weight (out,in))."""
    params = {}
    keys = jax.random.split(key, 6)
    for i, name in enumerate(("conv1", "conv2", "conv3", "conv4")):
        cfg = LAYER_CONFIG[name]
        cin, cout, k = cfg["in_channels"], cfg["out_channels"], cfg["kernel_size"]
        fan_in = cin * k * k * k
        params[name] = dict(
            w=kaiming_uniform(keys[i], (cout, cin, k, k, k), fan_in),
            b=jnp.full((cout,), 0.01, jnp.float32),
            gamma=jnp.ones((cout,), jnp.float32),
            beta=jnp.full((cout,), 0.01, jnp.float32),
            mean=jnp.zeros((cout,), jnp.float32),   # BN running stats (eval mode)
            var=jnp.ones((cout,), jnp.float32),
        )
    for i, name in enumerate(("fc1", "fc2")):
        cfg = LAYER_CONFIG[name]
        params[name] = dict(
            w=kaiming_uniform(keys[4 + i], (cfg["out"], cfg["in"]), cfg["in"]),
            b=jnp.full((cfg["out"],), 0.01, jnp.float32),
        )
    return params


def prepare_params(params):
    """One-time re-layout: fold eval-mode BN into conv weights, reorder to channels-last
    im2col feature order (kd,kh,kw,ci), cast MXU operands to bf16, transpose FC weights."""
    prep = {}
    for name in ("conv1", "conv2", "conv3", "conv4"):
        p = params[name]
        cout, cin, k, _, _ = p["w"].shape
        s = p["gamma"] / jnp.sqrt(p["var"] + BN_EPS)                     # (cout,)
        wmat = jnp.transpose(p["w"], (2, 3, 4, 1, 0)).reshape(k * k * k * cin, cout)
        wmat = (wmat * s[None, :]).astype(jnp.bfloat16)                  # BN scale folded
        shift = ((p["b"] - p["mean"]) * s + p["beta"]).reshape(1, cout).astype(jnp.float32)
        prep[name] = {"wmat": wmat, "shift": shift}
    for name in ("fc1", "fc2"):
        p = params[name]
        prep[name] = {"w": p["w"].T.astype(jnp.float32),
                      "b": p["b"].reshape(1, -1).astype(jnp.float32)}
    return prep


if __name__ == "__main__":
    key = jax.random.PRNGKey(0)
    kx, kp = jax.random.split(key)
    # input: (N=2, C=1, D=16, H=16, W=16), NCDHW like the PyTorch module
    x = jax.random.normal(kx, (2, 1, 16, 16, 16), jnp.float32)
    params = init_params(kp)
    prep = prepare_params(params)

    fwd = jax.jit(cnn_vanilla_forward)
    output, fcc1 = fwd(x, prep)
    jax.block_until_ready((output, fcc1))

    assert output.shape == (2, LAYER_CONFIG["fc2"]["out"])
    assert fcc1.shape == (2, LAYER_CONFIG["fc1"]["out"])
    # log-softmax rows must exponentiate-sum to 1
    assert jnp.allclose(jnp.exp(output).sum(axis=1), 1.0, atol=1e-5)
    print("KERNEL_OK")
</pallas_src>

<mosaic_0001>
module attributes {stable_mosaic.version = 11 : i64} {
  func.func @_conv_bn_relu_kernel(%arg0: i32, %arg1: memref<512x27xbf16, #tpu.memory_space<vmem>>, %arg2: memref<27x8xbf16, #tpu.memory_space<vmem>>, %arg3: memref<1x8xf32, #tpu.memory_space<vmem>>, %arg4: memref<512x8xf32, #tpu.memory_space<vmem>>) attributes {dimension_semantics = [#tpu.dimension_semantics<parallel>], iteration_bounds = array<i64: 16>, scalar_prefetch = 0 : i64, scratch_operands = 0 : i64, tpu.core_type = #tpu.core_type<tc>, window_params = [{transform_indices = @transform_0, window_bounds = array<i64: 512, 27>}, {pipeline_mode = #tpu.pipeline_mode<synchronous>, transform_indices = @transform_1, window_bounds = array<i64: 27, 8>}, {pipeline_mode = #tpu.pipeline_mode<synchronous>, transform_indices = @transform_2, window_bounds = array<i64: 1, 8>}, {transform_indices = @transform_3, window_bounds = array<i64: 512, 8>}]} {
    %c0 = arith.constant 0 : index
    %c0_0 = arith.constant 0 : index
    %0 = vector.load %arg1[%c0, %c0_0] : memref<512x27xbf16, #tpu.memory_space<vmem>>, vector<512x27xbf16>
    %c0_1 = arith.constant 0 : index
    %c0_2 = arith.constant 0 : index
    %1 = vector.load %arg2[%c0_1, %c0_2] : memref<27x8xbf16, #tpu.memory_space<vmem>>, vector<27x8xbf16>
    %cst = arith.constant dense<0.000000e+00> : vector<512x8xf32>
    %2 = tpu.matmul %0, %1, %cst {dimension_numbers = #tpu.dot_dimension_numbers<[1], [0], [0], [1], [0, 0, 1, 1], [], []>} : vector<512x27xbf16>, vector<27x8xbf16>, vector<512x8xf32> -> vector<512x8xf32>
    %c0_3 = arith.constant 0 : index
    %c0_4 = arith.constant 0 : index
    %3 = vector.load %arg3[%c0_3, %c0_4] : memref<1x8xf32, #tpu.memory_space<vmem>>, vector<1x8xf32>
    %4 = vector.broadcast %3 : vector<1x8xf32> to vector<512x8xf32>
    %5 = arith.addf %2, %4 : vector<512x8xf32>
    %cst_5 = arith.constant 0.000000e+00 : f32
    %6 = vector.broadcast %cst_5 : f32 to vector<512x8xf32>
    %7 = arith.maximumf %5, %6 : vector<512x8xf32>
    %c0_6 = arith.constant 0 : index
    %c0_7 = arith.constant 0 : index
    %8 = vector.load %arg4[%c0_6, %c0_7] : memref<512x8xf32, #tpu.memory_space<vmem>>, vector<512x8xf32>
    tpu.vector_store %arg4[%c0_6, %c0_7], %7 {strides = array<i32>} : memref<512x8xf32, #tpu.memory_space<vmem>>, vector<512x8xf32>,
    return
  }
  func.func @transform_0(%arg0: i32) -> (i32, i32) {
    %c0_i32 = arith.constant 0 : i32
    %c0_i32_0 = arith.constant 0 : i32
    return %arg0, %c0_i32 : i32, i32
  }
  func.func @transform_1(%arg0: i32) -> (i32, i32) {
    %c0_i32 = arith.constant 0 : i32
    %c0_i32_0 = arith.constant 0 : i32
    %c0_i32_1 = arith.constant 0 : i32
    return %c0_i32, %c0_i32_0 : i32, i32
  }
  func.func @transform_2(%arg0: i32) -> (i32, i32) {
    %c0_i32 = arith.constant 0 : i32
    %c0_i32_0 = arith.constant 0 : i32
    %c0_i32_1 = arith.constant 0 : i32
    return %c0_i32, %c0_i32_0 : i32, i32
  }
  func.func @transform_3(%arg0: i32) -> (i32, i32) {
    %c0_i32 = arith.constant 0 : i32
    %c0_i32_0 = arith.constant 0 : i32
    return %arg0, %c0_i32 : i32, i32
  }
}

module attributes {stable_mosaic.version = 11 : i64} {
  func.func @_maxpool_kernel(%arg0: i32, %arg1: memref<16x16x2x8x16xf32, #tpu.memory_space<vmem>>, %arg2: memref<16x8x8x8xf32, #tpu.memory_space<vmem>>) attributes {dimension_semantics = [#tpu.dimension_semantics<parallel>], iteration_bounds = array<i64: 1>, scalar_prefetch = 0 : i64, scratch_operands = 0 : i64, tpu.core_type = #tpu.core_type<tc>, window_params = [{transform_indices = @transform_0, window_bounds = array<i64: 16, 16, 2, 8, 16>}, {transform_indices = @transform_1, window_bounds = array<i64: 16, 8, 8, 8>}]} {
    %c0 = arith.constant 0 : index
    %c0_0 = arith.constant 0 : index
    %c0_1 = arith.constant 0 : index
    %c0_2 = arith.constant 0 : index
    %c0_3 = arith.constant 0 : index
    %0 = vector.load %arg1[%c0, %c0_0, %c0_1, %c0_2, %c0_3] : memref<16x16x2x8x16xf32, #tpu.memory_space<vmem>>, vector<16x16x2x8x16xf32>
    %1 = vector.extract_strided_slice %0 {offsets = [0, 0, 0, 0, 0], sizes = [16, 8, 2, 8, 16], strides = [1, 1, 1, 1, 1]} : vector<16x16x2x8x16xf32> to vector<16x8x2x8x16xf32>
    %2 = vector.extract_strided_slice %0 {offsets = [0, 8, 0, 0, 0], sizes = [16, 8, 2, 8, 16], strides = [1, 1, 1, 1, 1]} : vector<16x16x2x8x16xf32> to vector<16x8x2x8x16xf32>
    %3 = arith.maximumf %1, %2 : vector<16x8x2x8x16xf32>
    %4 = vector.extract_strided_slice %3 {offsets = [0, 0, 0, 0, 0], sizes = [16, 8, 1, 8, 16], strides = [1, 1, 1, 1, 1]} : vector<16x8x2x8x16xf32> to vector<16x8x1x8x16xf32>
    %5 = vector.shape_cast %4 : vector<16x8x1x8x16xf32> to vector<16x8x8x16xf32>
    %6 = vector.extract_strided_slice %3 {offsets = [0, 0, 1, 0, 0], sizes = [16, 8, 1, 8, 16], strides = [1, 1, 1, 1, 1]} : vector<16x8x2x8x16xf32> to vector<16x8x1x8x16xf32>
    %7 = vector.shape_cast %6 : vector<16x8x1x8x16xf32> to vector<16x8x8x16xf32>
    %8 = arith.maximumf %5, %7 : vector<16x8x8x16xf32>
    %9 = vector.extract_strided_slice %8 {offsets = [0, 0, 0, 0], sizes = [16, 8, 8, 8], strides = [1, 1, 1, 1]} : vector<16x8x8x16xf32> to vector<16x8x8x8xf32>
    %10 = vector.extract_strided_slice %8 {offsets = [0, 0, 0, 8], sizes = [16, 8, 8, 8], strides = [1, 1, 1, 1]} : vector<16x8x8x16xf32> to vector<16x8x8x8xf32>
    %11 = arith.maximumf %9, %10 : vector<16x8x8x8xf32>
    %c0_4 = arith.constant 0 : index
    %c0_5 = arith.constant 0 : index
    %c0_6 = arith.constant 0 : index
    %c0_7 = arith.constant 0 : index
    %12 = vector.load %arg2[%c0_4, %c0_5, %c0_6, %c0_7] : memref<16x8x8x8xf32, #tpu.memory_space<vmem>>, vector<16x8x8x8xf32>
    tpu.vector_store %arg2[%c0_4, %c0_5, %c0_6, %c0_7], %11 {strides = array<i32>} : memref<16x8x8x8xf32, #tpu.memory_space<vmem>>, vector<16x8x8x8xf32>,
    return
  }
  func.func @transform_0(%arg0: i32) -> (i32, i32, i32, i32, i32) {
    %c0_i32 = arith.constant 0 : i32
    %c0_i32_0 = arith.constant 0 : i32
    %c0_i32_1 = arith.constant 0 : i32
    %c0_i32_2 = arith.constant 0 : i32
    %c0_i32_3 = arith.constant 0 : i32
    return %arg0, %c0_i32, %c0_i32_0, %c0_i32_1, %c0_i32_2 : i32, i32, i32, i32, i32
  }
  func.func @transform_1(%arg0: i32) -> (i32, i32, i32, i32) {
    %c0_i32 = arith.constant 0 : i32
    %c0_i32_0 = arith.constant 0 : i32
    %c0_i32_1 = arith.constant 0 : i32
    %c0_i32_2 = arith.constant 0 : i32
    return %arg0, %c0_i32, %c0_i32_0, %c0_i32_1 : i32, i32, i32, i32
  }
}

module attributes {stable_mosaic.version = 11 : i64} {
  func.func @_conv_bn_relu_kernel(%arg0: i32, %arg1: memref<512x216xbf16, #tpu.memory_space<vmem>>, %arg2: memref<216x16xbf16, #tpu.memory_space<vmem>>, %arg3: memref<1x16xf32, #tpu.memory_space<vmem>>, %arg4: memref<512x16xf32, #tpu.memory_space<vmem>>) attributes {dimension_semantics = [#tpu.dimension_semantics<parallel>], iteration_bounds = array<i64: 2>, scalar_prefetch = 0 : i64, scratch_operands = 0 : i64, tpu.core_type = #tpu.core_type<tc>, window_params = [{transform_indices = @transform_0, window_bounds = array<i64: 512, 216>}, {pipeline_mode = #tpu.pipeline_mode<synchronous>, transform_indices = @transform_1, window_bounds = array<i64: 216, 16>}, {pipeline_mode = #tpu.pipeline_mode<synchronous>, transform_indices = @transform_2, window_bounds = array<i64: 1, 16>}, {transform_indices = @transform_3, window_bounds = array<i64: 512, 16>}]} {
    %c0 = arith.constant 0 : index
    %c0_0 = arith.constant 0 : index
    %0 = vector.load %arg1[%c0, %c0_0] : memref<512x216xbf16, #tpu.memory_space<vmem>>, vector<512x216xbf16>
    %c0_1 = arith.constant 0 : index
    %c0_2 = arith.constant 0 : index
    %1 = vector.load %arg2[%c0_1, %c0_2] : memref<216x16xbf16, #tpu.memory_space<vmem>>, vector<216x16xbf16>
    %cst = arith.constant dense<0.000000e+00> : vector<512x16xf32>
    %2 = tpu.matmul %0, %1, %cst {dimension_numbers = #tpu.dot_dimension_numbers<[1], [0], [0], [1], [0, 0, 1, 1], [], []>} : vector<512x216xbf16>, vector<216x16xbf16>, vector<512x16xf32> -> vector<512x16xf32>
    %c0_3 = arith.constant 0 : index
    %c0_4 = arith.constant 0 : index
    %3 = vector.load %arg3[%c0_3, %c0_4] : memref<1x16xf32, #tpu.memory_space<vmem>>, vector<1x16xf32>
    %4 = vector.broadcast %3 : vector<1x16xf32> to vector<512x16xf32>
    %5 = arith.addf %2, %4 : vector<512x16xf32>
    %cst_5 = arith.constant 0.000000e+00 : f32
    %6 = vector.broadcast %cst_5 : f32 to vector<512x16xf32>
    %7 = arith.maximumf %5, %6 : vector<512x16xf32>
    %c0_6 = arith.constant 0 : index
    %c0_7 = arith.constant 0 : index
    %8 = vector.load %arg4[%c0_6, %c0_7] : memref<512x16xf32, #tpu.memory_space<vmem>>, vector<512x16xf32>
    tpu.vector_store %arg4[%c0_6, %c0_7], %7 {strides = array<i32>} : memref<512x16xf32, #tpu.memory_space<vmem>>, vector<512x16xf32>,
    return
  }
  func.func @transform_0(%arg0: i32) -> (i32, i32) {
    %c0_i32 = arith.constant 0 : i32
    %c0_i32_0 = arith.constant 0 : i32
    return %arg0, %c0_i32 : i32, i32
  }
  func.func @transform_1(%arg0: i32) -> (i32, i32) {
    %c0_i32 = arith.constant 0 : i32
    %c0_i32_0 = arith.constant 0 : i32
    %c0_i32_1 = arith.constant 0 : i32
    return %c0_i32, %c0_i32_0 : i32, i32
  }
  func.func @transform_2(%arg0: i32) -> (i32, i32) {
    %c0_i32 = arith.constant 0 : i32
    %c0_i32_0 = arith.constant 0 : i32
    %c0_i32_1 = arith.constant 0 : i32
    return %c0_i32, %c0_i32_0 : i32, i32
  }
  func.func @transform_3(%arg0: i32) -> (i32, i32) {
    %c0_i32 = arith.constant 0 : i32
    %c0_i32_0 = arith.constant 0 : i32
    return %arg0, %c0_i32 : i32, i32
  }
}

module attributes {stable_mosaic.version = 11 : i64} {
  func.func @_maxpool_kernel(%arg0: i32, %arg1: memref<8x8x2x4x32xf32, #tpu.memory_space<vmem>>, %arg2: memref<8x4x4x16xf32, #tpu.memory_space<vmem>>) attributes {dimension_semantics = [#tpu.dimension_semantics<parallel>], iteration_bounds = array<i64: 1>, scalar_prefetch = 0 : i64, scratch_operands = 0 : i64, tpu.core_type = #tpu.core_type<tc>, window_params = [{transform_indices = @transform_0, window_bounds = array<i64: 8, 8, 2, 4, 32>}, {transform_indices = @transform_1, window_bounds = array<i64: 8, 4, 4, 16>}]} {
    %c0 = arith.constant 0 : index
    %c0_0 = arith.constant 0 : index
    %c0_1 = arith.constant 0 : index
    %c0_2 = arith.constant 0 : index
    %c0_3 = arith.constant 0 : index
    %0 = vector.load %arg1[%c0, %c0_0, %c0_1, %c0_2, %c0_3] : memref<8x8x2x4x32xf32, #tpu.memory_space<vmem>>, vector<8x8x2x4x32xf32>
    %1 = vector.extract_strided_slice %0 {offsets = [0, 0, 0, 0, 0], sizes = [8, 4, 2, 4, 32], strides = [1, 1, 1, 1, 1]} : vector<8x8x2x4x32xf32> to vector<8x4x2x4x32xf32>
    %2 = vector.extract_strided_slice %0 {offsets = [0, 4, 0, 0, 0], sizes = [8, 4, 2, 4, 32], strides = [1, 1, 1, 1, 1]} : vector<8x8x2x4x32xf32> to vector<8x4x2x4x32xf32>
    %3 = arith.maximumf %1, %2 : vector<8x4x2x4x32xf32>
    %4 = vector.extract_strided_slice %3 {offsets = [0, 0, 0, 0, 0], sizes = [8, 4, 1, 4, 32], strides = [1, 1, 1, 1, 1]} : vector<8x4x2x4x32xf32> to vector<8x4x1x4x32xf32>
    %5 = vector.shape_cast %4 : vector<8x4x1x4x32xf32> to vector<8x4x4x32xf32>
    %6 = vector.extract_strided_slice %3 {offsets = [0, 0, 1, 0, 0], sizes = [8, 4, 1, 4, 32], strides = [1, 1, 1, 1, 1]} : vector<8x4x2x4x32xf32> to vector<8x4x1x4x32xf32>
    %7 = vector.shape_cast %6 : vector<8x4x1x4x32xf32> to vector<8x4x4x32xf32>
    %8 = arith.maximumf %5, %7 : vector<8x4x4x32xf32>
    %9 = vector.extract_strided_slice %8 {offsets = [0, 0, 0, 0], sizes = [8, 4, 4, 16], strides = [1, 1, 1, 1]} : vector<8x4x4x32xf32> to vector<8x4x4x16xf32>
    %10 = vector.extract_strided_slice %8 {offsets = [0, 0, 0, 16], sizes = [8, 4, 4, 16], strides = [1, 1, 1, 1]} : vector<8x4x4x32xf32> to vector<8x4x4x16xf32>
    %11 = arith.maximumf %9, %10 : vector<8x4x4x16xf32>
    %c0_4 = arith.constant 0 : index
    %c0_5 = arith.constant 0 : index
    %c0_6 = arith.constant 0 : index
    %c0_7 = arith.constant 0 : index
    %12 = vector.load %arg2[%c0_4, %c0_5, %c0_6, %c0_7] : memref<8x4x4x16xf32, #tpu.memory_space<vmem>>, vector<8x4x4x16xf32>
    tpu.vector_store %arg2[%c0_4, %c0_5, %c0_6, %c0_7], %11 {strides = array<i32>} : memref<8x4x4x16xf32, #tpu.memory_space<vmem>>, vector<8x4x4x16xf32>,
    return
  }
  func.func @transform_0(%arg0: i32) -> (i32, i32, i32, i32, i32) {
    %c0_i32 = arith.constant 0 : i32
    %c0_i32_0 = arith.constant 0 : i32
    %c0_i32_1 = arith.constant 0 : i32
    %c0_i32_2 = arith.constant 0 : i32
    %c0_i32_3 = arith.constant 0 : i32
    return %arg0, %c0_i32, %c0_i32_0, %c0_i32_1, %c0_i32_2 : i32, i32, i32, i32, i32
  }
  func.func @transform_1(%arg0: i32) -> (i32, i32, i32, i32) {
    %c0_i32 = arith.constant 0 : i32
    %c0_i32_0 = arith.constant 0 : i32
    %c0_i32_1 = arith.constant 0 : i32
    %c0_i32_2 = arith.constant 0 : i32
    return %arg0, %c0_i32, %c0_i32_0, %c0_i32_1 : i32, i32, i32, i32
  }
}

module attributes {stable_mosaic.version = 11 : i64} {
  func.func @_conv_bn_relu_kernel(%arg0: i32, %arg1: memref<128x432xbf16, #tpu.memory_space<vmem>>, %arg2: memref<432x16xbf16, #tpu.memory_space<vmem>>, %arg3: memref<1x16xf32, #tpu.memory_space<vmem>>, %arg4: memref<128x16xf32, #tpu.memory_space<vmem>>) attributes {dimension_semantics = [#tpu.dimension_semantics<parallel>], iteration_bounds = array<i64: 1>, scalar_prefetch = 0 : i64, scratch_operands = 0 : i64, tpu.core_type = #tpu.core_type<tc>, window_params = [{transform_indices = @transform_0, window_bounds = array<i64: 128, 432>}, {pipeline_mode = #tpu.pipeline_mode<synchronous>, transform_indices = @transform_1, window_bounds = array<i64: 432, 16>}, {pipeline_mode = #tpu.pipeline_mode<synchronous>, transform_indices = @transform_2, window_bounds = array<i64: 1, 16>}, {transform_indices = @transform_3, window_bounds = array<i64: 128, 16>}]} {
    %c0 = arith.constant 0 : index
    %c0_0 = arith.constant 0 : index
    %0 = vector.load %arg1[%c0, %c0_0] : memref<128x432xbf16, #tpu.memory_space<vmem>>, vector<128x432xbf16>
    %c0_1 = arith.constant 0 : index
    %c0_2 = arith.constant 0 : index
    %1 = vector.load %arg2[%c0_1, %c0_2] : memref<432x16xbf16, #tpu.memory_space<vmem>>, vector<432x16xbf16>
    %cst = arith.constant dense<0.000000e+00> : vector<128x16xf32>
    %2 = tpu.matmul %0, %1, %cst {dimension_numbers = #tpu.dot_dimension_numbers<[1], [0], [0], [1], [0, 0, 1, 1], [], []>} : vector<128x432xbf16>, vector<432x16xbf16>, vector<128x16xf32> -> vector<128x16xf32>
    %c0_3 = arith.constant 0 : index
    %c0_4 = arith.constant 0 : index
    %3 = vector.load %arg3[%c0_3, %c0_4] : memref<1x16xf32, #tpu.memory_space<vmem>>, vector<1x16xf32>
    %4 = vector.broadcast %3 : vector<1x16xf32> to vector<128x16xf32>
    %5 = arith.addf %2, %4 : vector<128x16xf32>
    %cst_5 = arith.constant 0.000000e+00 : f32
    %6 = vector.broadcast %cst_5 : f32 to vector<128x16xf32>
    %7 = arith.maximumf %5, %6 : vector<128x16xf32>
    %c0_6 = arith.constant 0 : index
    %c0_7 = arith.constant 0 : index
    %8 = vector.load %arg4[%c0_6, %c0_7] : memref<128x16xf32, #tpu.memory_space<vmem>>, vector<128x16xf32>
    tpu.vector_store %arg4[%c0_6, %c0_7], %7 {strides = array<i32>} : memref<128x16xf32, #tpu.memory_space<vmem>>, vector<128x16xf32>,
    return
  }
  func.func @transform_0(%arg0: i32) -> (i32, i32) {
    %c0_i32 = arith.constant 0 : i32
    %c0_i32_0 = arith.constant 0 : i32
    return %arg0, %c0_i32 : i32, i32
  }
  func.func @transform_1(%arg0: i32) -> (i32, i32) {
    %c0_i32 = arith.constant 0 : i32
    %c0_i32_0 = arith.constant 0 : i32
    %c0_i32_1 = arith.constant 0 : i32
    return %c0_i32, %c0_i32_0 : i32, i32
  }
  func.func @transform_2(%arg0: i32) -> (i32, i32) {
    %c0_i32 = arith.constant 0 : i32
    %c0_i32_0 = arith.constant 0 : i32
    %c0_i32_1 = arith.constant 0 : i32
    return %c0_i32, %c0_i32_0 : i32, i32
  }
  func.func @transform_3(%arg0: i32) -> (i32, i32) {
    %c0_i32 = arith.constant 0 : i32
    %c0_i32_0 = arith.constant 0 : i32
    return %arg0, %c0_i32 : i32, i32
  }
}

module attributes {stable_mosaic.version = 11 : i64} {
  func.func @_maxpool_kernel(%arg0: i32, %arg1: memref<4x4x2x2x32xf32, #tpu.memory_space<vmem>>, %arg2: memref<4x2x2x16xf32, #tpu.memory_space<vmem>>) attributes {dimension_semantics = [#tpu.dimension_semantics<parallel>], iteration_bounds = array<i64: 1>, scalar_prefetch = 0 : i64, scratch_operands = 0 : i64, tpu.core_type = #tpu.core_type<tc>, window_params = [{transform_indices = @transform_0, window_bounds = array<i64: 4, 4, 2, 2, 32>}, {transform_indices = @transform_1, window_bounds = array<i64: 4, 2, 2, 16>}]} {
    %c0 = arith.constant 0 : index
    %c0_0 = arith.constant 0 : index
    %c0_1 = arith.constant 0 : index
    %c0_2 = arith.constant 0 : index
    %c0_3 = arith.constant 0 : index
    %0 = vector.load %arg1[%c0, %c0_0, %c0_1, %c0_2, %c0_3] : memref<4x4x2x2x32xf32, #tpu.memory_space<vmem>>, vector<4x4x2x2x32xf32>
    %1 = vector.extract_strided_slice %0 {offsets = [0, 0, 0, 0, 0], sizes = [4, 2, 2, 2, 32], strides = [1, 1, 1, 1, 1]} : vector<4x4x2x2x32xf32> to vector<4x2x2x2x32xf32>
    %2 = vector.extract_strided_slice %0 {offsets = [0, 2, 0, 0, 0], sizes = [4, 2, 2, 2, 32], strides = [1, 1, 1, 1, 1]} : vector<4x4x2x2x32xf32> to vector<4x2x2x2x32xf32>
    %3 = arith.maximumf %1, %2 : vector<4x2x2x2x32xf32>
    %4 = vector.extract_strided_slice %3 {offsets = [0, 0, 0, 0, 0], sizes = [4, 2, 1, 2, 32], strides = [1, 1, 1, 1, 1]} : vector<4x2x2x2x32xf32> to vector<4x2x1x2x32xf32>
    %5 = vector.shape_cast %4 : vector<4x2x1x2x32xf32> to vector<4x2x2x32xf32>
    %6 = vector.extract_strided_slice %3 {offsets = [0, 0, 1, 0, 0], sizes = [4, 2, 1, 2, 32], strides = [1, 1, 1, 1, 1]} : vector<4x2x2x2x32xf32> to vector<4x2x1x2x32xf32>
    %7 = vector.shape_cast %6 : vector<4x2x1x2x32xf32> to vector<4x2x2x32xf32>
    %8 = arith.maximumf %5, %7 : vector<4x2x2x32xf32>
    %9 = vector.extract_strided_slice %8 {offsets = [0, 0, 0, 0], sizes = [4, 2, 2, 16], strides = [1, 1, 1, 1]} : vector<4x2x2x32xf32> to vector<4x2x2x16xf32>
    %10 = vector.extract_strided_slice %8 {offsets = [0, 0, 0, 16], sizes = [4, 2, 2, 16], strides = [1, 1, 1, 1]} : vector<4x2x2x32xf32> to vector<4x2x2x16xf32>
    %11 = arith.maximumf %9, %10 : vector<4x2x2x16xf32>
    %c0_4 = arith.constant 0 : index
    %c0_5 = arith.constant 0 : index
    %c0_6 = arith.constant 0 : index
    %c0_7 = arith.constant 0 : index
    %12 = vector.load %arg2[%c0_4, %c0_5, %c0_6, %c0_7] : memref<4x2x2x16xf32, #tpu.memory_space<vmem>>, vector<4x2x2x16xf32>
    tpu.vector_store %arg2[%c0_4, %c0_5, %c0_6, %c0_7], %11 {strides = array<i32>} : memref<4x2x2x16xf32, #tpu.memory_space<vmem>>, vector<4x2x2x16xf32>,
    return
  }
  func.func @transform_0(%arg0: i32) -> (i32, i32, i32, i32, i32) {
    %c0_i32 = arith.constant 0 : i32
    %c0_i32_0 = arith.constant 0 : i32
    %c0_i32_1 = arith.constant 0 : i32
    %c0_i32_2 = arith.constant 0 : i32
    %c0_i32_3 = arith.constant 0 : i32
    return %arg0, %c0_i32, %c0_i32_0, %c0_i32_1, %c0_i32_2 : i32, i32, i32, i32, i32
  }
  func.func @transform_1(%arg0: i32) -> (i32, i32, i32, i32) {
    %c0_i32 = arith.constant 0 : i32
    %c0_i32_0 = arith.constant 0 : i32
    %c0_i32_1 = arith.constant 0 : i32
    %c0_i32_2 = arith.constant 0 : i32
    return %arg0, %c0_i32, %c0_i32_0, %c0_i32_1 : i32, i32, i32, i32
  }
}

module attributes {stable_mosaic.version = 11 : i64} {
  func.func @_conv_bn_relu_kernel(%arg0: i32, %arg1: memref<16x432xbf16, #tpu.memory_space<vmem>>, %arg2: memref<432x16xbf16, #tpu.memory_space<vmem>>, %arg3: memref<1x16xf32, #tpu.memory_space<vmem>>, %arg4: memref<16x16xf32, #tpu.memory_space<vmem>>) attributes {dimension_semantics = [#tpu.dimension_semantics<parallel>], iteration_bounds = array<i64: 1>, scalar_prefetch = 0 : i64, scratch_operands = 0 : i64, tpu.core_type = #tpu.core_type<tc>, window_params = [{transform_indices = @transform_0, window_bounds = array<i64: 16, 432>}, {pipeline_mode = #tpu.pipeline_mode<synchronous>, transform_indices = @transform_1, window_bounds = array<i64: 432, 16>}, {pipeline_mode = #tpu.pipeline_mode<synchronous>, transform_indices = @transform_2, window_bounds = array<i64: 1, 16>}, {transform_indices = @transform_3, window_bounds = array<i64: 16, 16>}]} {
    %c0 = arith.constant 0 : index
    %c0_0 = arith.constant 0 : index
    %0 = vector.load %arg1[%c0, %c0_0] : memref<16x432xbf16, #tpu.memory_space<vmem>>, vector<16x432xbf16>
    %c0_1 = arith.constant 0 : index
    %c0_2 = arith.constant 0 : index
    %1 = vector.load %arg2[%c0_1, %c0_2] : memref<432x16xbf16, #tpu.memory_space<vmem>>, vector<432x16xbf16>
    %cst = arith.constant dense<0.000000e+00> : vector<16x16xf32>
    %2 = tpu.matmul %0, %1, %cst {dimension_numbers = #tpu.dot_dimension_numbers<[1], [0], [0], [1], [0, 0, 1, 1], [], []>} : vector<16x432xbf16>, vector<432x16xbf16>, vector<16x16xf32> -> vector<16x16xf32>
    %c0_3 = arith.constant 0 : index
    %c0_4 = arith.constant 0 : index
    %3 = vector.load %arg3[%c0_3, %c0_4] : memref<1x16xf32, #tpu.memory_space<vmem>>, vector<1x16xf32>
    %4 = vector.broadcast %3 : vector<1x16xf32> to vector<16x16xf32>
    %5 = arith.addf %2, %4 : vector<16x16xf32>
    %cst_5 = arith.constant 0.000000e+00 : f32
    %6 = vector.broadcast %cst_5 : f32 to vector<16x16xf32>
    %7 = arith.maximumf %5, %6 : vector<16x16xf32>
    %c0_6 = arith.constant 0 : index
    %c0_7 = arith.constant 0 : index
    %8 = vector.load %arg4[%c0_6, %c0_7] : memref<16x16xf32, #tpu.memory_space<vmem>>, vector<16x16xf32>
    tpu.vector_store %arg4[%c0_6, %c0_7], %7 {strides = array<i32>} : memref<16x16xf32, #tpu.memory_space<vmem>>, vector<16x16xf32>,
    return
  }
  func.func @transform_0(%arg0: i32) -> (i32, i32) {
    %c0_i32 = arith.constant 0 : i32
    %c0_i32_0 = arith.constant 0 : i32
    return %arg0, %c0_i32 : i32, i32
  }
  func.func @transform_1(%arg0: i32) -> (i32, i32) {
    %c0_i32 = arith.constant 0 : i32
    %c0_i32_0 = arith.constant 0 : i32
    %c0_i32_1 = arith.constant 0 : i32
    return %c0_i32, %c0_i32_0 : i32, i32
  }
  func.func @transform_2(%arg0: i32) -> (i32, i32) {
    %c0_i32 = arith.constant 0 : i32
    %c0_i32_0 = arith.constant 0 : i32
    %c0_i32_1 = arith.constant 0 : i32
    return %c0_i32, %c0_i32_0 : i32, i32
  }
  func.func @transform_3(%arg0: i32) -> (i32, i32) {
    %c0_i32 = arith.constant 0 : i32
    %c0_i32_0 = arith.constant 0 : i32
    return %arg0, %c0_i32 : i32, i32
  }
}

module attributes {stable_mosaic.version = 11 : i64} {
  func.func @_maxpool_kernel(%arg0: i32, %arg1: memref<2x2x2x1x32xf32, #tpu.memory_space<vmem>>, %arg2: memref<2x1x1x16xf32, #tpu.memory_space<vmem>>) attributes {dimension_semantics = [#tpu.dimension_semantics<parallel>], iteration_bounds = array<i64: 1>, scalar_prefetch = 0 : i64, scratch_operands = 0 : i64, tpu.core_type = #tpu.core_type<tc>, window_params = [{transform_indices = @transform_0, window_bounds = array<i64: 2, 2, 2, 1, 32>}, {transform_indices = @transform_1, window_bounds = array<i64: 2, 1, 1, 16>}]} {
    %c0 = arith.constant 0 : index
    %c0_0 = arith.constant 0 : index
    %c0_1 = arith.constant 0 : index
    %c0_2 = arith.constant 0 : index
    %c0_3 = arith.constant 0 : index
    %0 = vector.load %arg1[%c0, %c0_0, %c0_1, %c0_2, %c0_3] : memref<2x2x2x1x32xf32, #tpu.memory_space<vmem>>, vector<2x2x2x1x32xf32>
    %1 = vector.extract_strided_slice %0 {offsets = [0, 0, 0, 0, 0], sizes = [2, 1, 2, 1, 32], strides = [1, 1, 1, 1, 1]} : vector<2x2x2x1x32xf32> to vector<2x1x2x1x32xf32>
    %2 = vector.extract_strided_slice %0 {offsets = [0, 1, 0, 0, 0], sizes = [2, 1, 2, 1, 32], strides = [1, 1, 1, 1, 1]} : vector<2x2x2x1x32xf32> to vector<2x1x2x1x32xf32>
    %3 = arith.maximumf %1, %2 : vector<2x1x2x1x32xf32>
    %4 = vector.extract_strided_slice %3 {offsets = [0, 0, 0, 0, 0], sizes = [2, 1, 1, 1, 32], strides = [1, 1, 1, 1, 1]} : vector<2x1x2x1x32xf32> to vector<2x1x1x1x32xf32>
    %5 = vector.shape_cast %4 : vector<2x1x1x1x32xf32> to vector<2x1x1x32xf32>
    %6 = vector.extract_strided_slice %3 {offsets = [0, 0, 1, 0, 0], sizes = [2, 1, 1, 1, 32], strides = [1, 1, 1, 1, 1]} : vector<2x1x2x1x32xf32> to vector<2x1x1x1x32xf32>
    %7 = vector.shape_cast %6 : vector<2x1x1x1x32xf32> to vector<2x1x1x32xf32>
    %8 = arith.maximumf %5, %7 : vector<2x1x1x32xf32>
    %9 = vector.extract_strided_slice %8 {offsets = [0, 0, 0, 0], sizes = [2, 1, 1, 16], strides = [1, 1, 1, 1]} : vector<2x1x1x32xf32> to vector<2x1x1x16xf32>
    %10 = vector.extract_strided_slice %8 {offsets = [0, 0, 0, 16], sizes = [2, 1, 1, 16], strides = [1, 1, 1, 1]} : vector<2x1x1x32xf32> to vector<2x1x1x16xf32>
    %11 = arith.maximumf %9, %10 : vector<2x1x1x16xf32>
    %c0_4 = arith.constant 0 : index
    %c0_5 = arith.constant 0 : index
    %c0_6 = arith.constant 0 : index
    %c0_7 = arith.constant 0 : index
    %12 = vector.load %arg2[%c0_4, %c0_5, %c0_6, %c0_7] : memref<2x1x1x16xf32, #tpu.memory_space<vmem>>, vector<2x1x1x16xf32>
    tpu.vector_store %arg2[%c0_4, %c0_5, %c0_6, %c0_7], %11 {strides = array<i32>} : memref<2x1x1x16xf32, #tpu.memory_space<vmem>>, vector<2x1x1x16xf32>,
    return
  }
  func.func @transform_0(%arg0: i32) -> (i32, i32, i32, i32, i32) {
    %c0_i32 = arith.constant 0 : i32
    %c0_i32_0 = arith.constant 0 : i32
    %c0_i32_1 = arith.constant 0 : i32
    %c0_i32_2 = arith.constant 0 : i32
    %c0_i32_3 = arith.constant 0 : i32
    return %arg0, %c0_i32, %c0_i32_0, %c0_i32_1, %c0_i32_2 : i32, i32, i32, i32, i32
  }
  func.func @transform_1(%arg0: i32) -> (i32, i32, i32, i32) {
    %c0_i32 = arith.constant 0 : i32
    %c0_i32_0 = arith.constant 0 : i32
    %c0_i32_1 = arith.constant 0 : i32
    %c0_i32_2 = arith.constant 0 : i32
    return %arg0, %c0_i32, %c0_i32_0, %c0_i32_1 : i32, i32, i32, i32
  }
}

module attributes {stable_mosaic.version = 11 : i64} {
  func.func @_fc_head_kernel(%arg0: i32, %arg1: memref<2x16xf32, #tpu.memory_space<vmem>>, %arg2: memref<16x32xf32, #tpu.memory_space<vmem>>, %arg3: memref<1x32xf32, #tpu.memory_space<vmem>>, %arg4: memref<32x4xf32, #tpu.memory_space<vmem>>, %arg5: memref<1x4xf32, #tpu.memory_space<vmem>>, %arg6: memref<2x4xf32, #tpu.memory_space<vmem>>, %arg7: memref<2x32xf32, #tpu.memory_space<vmem>>) attributes {dimension_semantics = [#tpu.dimension_semantics<arbitrary>], iteration_bounds = array<i64: 1>, scalar_prefetch = 0 : i64, scratch_operands = 0 : i64, tpu.core_type = #tpu.core_type<tc>, window_params = [{pipeline_mode = #tpu.pipeline_mode<synchronous>, transform_indices = @transform_0, window_bounds = array<i64: 2, 16>}, {pipeline_mode = #tpu.pipeline_mode<synchronous>, transform_indices = @transform_1, window_bounds = array<i64: 16, 32>}, {pipeline_mode = #tpu.pipeline_mode<synchronous>, transform_indices = @transform_2, window_bounds = array<i64: 1, 32>}, {pipeline_mode = #tpu.pipeline_mode<synchronous>, transform_indices = @transform_3, window_bounds = array<i64: 32, 4>}, {pipeline_mode = #tpu.pipeline_mode<synchronous>, transform_indices = @transform_4, window_bounds = array<i64: 1, 4>}, {pipeline_mode = #tpu.pipeline_mode<synchronous>, transform_indices = @transform_5, window_bounds = array<i64: 2, 4>}, {pipeline_mode = #tpu.pipeline_mode<synchronous>, transform_indices = @transform_6, window_bounds = array<i64: 2, 32>}]} {
    %c0 = arith.constant 0 : index
    %c0_0 = arith.constant 0 : index
    %0 = vector.load %arg1[%c0, %c0_0] : memref<2x16xf32, #tpu.memory_space<vmem>>, vector<2x16xf32>
    %c0_1 = arith.constant 0 : index
    %c0_2 = arith.constant 0 : index
    %1 = vector.load %arg2[%c0_1, %c0_2] : memref<16x32xf32, #tpu.memory_space<vmem>>, vector<16x32xf32>
    %cst = arith.constant dense<0.000000e+00> : vector<2x32xf32>
    %2 = tpu.matmul %0, %1, %cst {dimension_numbers = #tpu.dot_dimension_numbers<[1], [0], [0], [1], [0, 0, 1, 1], [], []>} : vector<2x16xf32>, vector<16x32xf32>, vector<2x32xf32> -> vector<2x32xf32>
    %c0_3 = arith.constant 0 : index
    %c0_4 = arith.constant 0 : index
    %3 = vector.load %arg3[%c0_3, %c0_4] : memref<1x32xf32, #tpu.memory_space<vmem>>, vector<1x32xf32>
    %4 = vector.broadcast %3 : vector<1x32xf32> to vector<2x32xf32>
    %5 = arith.addf %2, %4 : vector<2x32xf32>
    %cst_5 = arith.constant 0.000000e+00 : f32
    %6 = vector.broadcast %cst_5 : f32 to vector<2x32xf32>
    %7 = arith.maximumf %5, %6 : vector<2x32xf32>
    %c0_6 = arith.constant 0 : index
    %c0_7 = arith.constant 0 : index
    %8 = vector.load %arg7[%c0_6, %c0_7] : memref<2x32xf32, #tpu.memory_space<vmem>>, vector<2x32xf32>
    tpu.vector_store %arg7[%c0_6, %c0_7], %7 {strides = array<i32>} : memref<2x32xf32, #tpu.memory_space<vmem>>, vector<2x32xf32>,
    %c0_8 = arith.constant 0 : index
    %c0_9 = arith.constant 0 : index
    %9 = vector.load %arg4[%c0_8, %c0_9] : memref<32x4xf32, #tpu.memory_space<vmem>>, vector<32x4xf32>
    %cst_10 = arith.constant dense<0.000000e+00> : vector<2x4xf32>
    %10 = tpu.matmul %7, %9, %cst_10 {dimension_numbers = #tpu.dot_dimension_numbers<[1], [0], [0], [1], [0, 0, 1, 1], [], []>} : vector<2x32xf32>, vector<32x4xf32>, vector<2x4xf32> -> vector<2x4xf32>
    %c0_11 = arith.constant 0 : index
    %c0_12 = arith.constant 0 : index
    %11 = vector.load %arg5[%c0_11, %c0_12] : memref<1x4xf32, #tpu.memory_space<vmem>>, vector<1x4xf32>
    %12 = vector.broadcast %11 : vector<1x4xf32> to vector<2x4xf32>
    %13 = arith.addf %10, %12 : vector<2x4xf32>
    %cst_13 = arith.constant dense<0xFF800000> : vector<2xf32>
    %14 = vector.multi_reduction <maximumf>, %13, %cst_13 [1] : vector<2x4xf32> to vector<2xf32>
    %15 = vector.shape_cast %14 : vector<2xf32> to vector<2x1xf32>
    %16 = vector.broadcast %15 : vector<2x1xf32> to vector<2x4xf32>
    %17 = arith.subf %13, %16 : vector<2x4xf32>
    %18 = math.exp %17 : vector<2x4xf32>
    %cst_14 = arith.constant dense<0.000000e+00> : vector<2xf32>
    %19 = vector.multi_reduction <add>, %18, %cst_14 [1] : vector<2x4xf32> to vector<2xf32>
    %20 = vector.shape_cast %19 : vector<2xf32> to vector<2x1xf32>
    %21 = math.log %20 : vector<2x1xf32>
    %22 = arith.addf %15, %21 : vector<2x1xf32>
    %23 = vector.broadcast %22 : vector<2x1xf32> to vector<2x4xf32>
    %24 = arith.subf %13, %23 : vector<2x4xf32>
    %c0_15 = arith.constant 0 : index
    %c0_16 = arith.constant 0 : index
    %25 = vector.load %arg6[%c0_15, %c0_16] : memref<2x4xf32, #tpu.memory_space<vmem>>, vector<2x4xf32>
    tpu.vector_store %arg6[%c0_15, %c0_16], %24 {strides = array<i32>} : memref<2x4xf32, #tpu.memory_space<vmem>>, vector<2x4xf32>,
    return
  }
  func.func @transform_0(%arg0: i32) -> (i32, i32) {
    %c0_i32 = arith.constant 0 : i32
    %c0_i32_0 = arith.constant 0 : i32
    %c0_i32_1 = arith.constant 0 : i32
    return %c0_i32, %c0_i32_0 : i32, i32
  }
  func.func @transform_1(%arg0: i32) -> (i32, i32) {
    %c0_i32 = arith.constant 0 : i32
    %c0_i32_0 = arith.constant 0 : i32
    %c0_i32_1 = arith.constant 0 : i32
    return %c0_i32, %c0_i32_0 : i32, i32
  }
  func.func @transform_2(%arg0: i32) -> (i32, i32) {
    %c0_i32 = arith.constant 0 : i32
    %c0_i32_0 = arith.constant 0 : i32
    %c0_i32_1 = arith.constant 0 : i32
    return %c0_i32, %c0_i32_0 : i32, i32
  }
  func.func @transform_3(%arg0: i32) -> (i32, i32) {
    %c0_i32 = arith.constant 0 : i32
    %c0_i32_0 = arith.constant 0 : i32
    %c0_i32_1 = arith.constant 0 : i32
    return %c0_i32, %c0_i32_0 : i32, i32
  }
  func.func @transform_4(%arg0: i32) -> (i32, i32) {
    %c0_i32 = arith.constant 0 : i32
    %c0_i32_0 = arith.constant 0 : i32
    %c0_i32_1 = arith.constant 0 : i32
    return %c0_i32, %c0_i32_0 : i32, i32
  }
  func.func @transform_5(%arg0: i32) -> (i32, i32) {
    %c0_i32 = arith.constant 0 : i32
    %c0_i32_0 = arith.constant 0 : i32
    %c0_i32_1 = arith.constant 0 : i32
    return %c0_i32, %c0_i32_0 : i32, i32
  }
  func.func @transform_6(%arg0: i32) -> (i32, i32) {
    %c0_i32 = arith.constant 0 : i32
    %c0_i32_0 = arith.constant 0 : i32
    %c0_i32_1 = arith.constant 0 : i32
    return %c0_i32, %c0_i32_0 : i32, i32
  }
}

</mosaic_0001>

<bundles_post_ra>
// kernel: cnn_vanilla_forward.9
= control target key start
LH: loop header
LB: loop body
LE: loop exit
PB: predicated region body
PF: predicated region fallthrough
CT: control target
= control target key end

     0   :  { %s1255_s12 = smov 0   ;;  %s1547_s0 = inlined_call_operand.vmem [shape: bf16[8192,27], index: 0, kind: input, shape index: {}]   ;;  %s1548_s1 = inlined_call_operand.vmem [shape: bf16[27,8], index: 1, kind: input, shape index: {}]   ;;  %s1549_s2 = inlined_call_operand.vmem [shape: f32[1,8], index: 2, kind: input, shape index: {}]   ;;  %s1550_s3 = inlined_call_operand.vmem [shape: f32[8192,8], index: 3, kind: output, shape index: {}]  }
   0x1 LB: > { %s999_s13 = sadd.s32 4294967295, %s1232_s12   ;;  %p1003_p0 = scmp.ge.s32.totalorder %s1232_s12, 1  ;;  %s1232_s12 = sphi %s1255_s12, %s13_s12  }
   0x2   : > { %p138_p1 = scmp.lt.s32.totalorder %s1232_s12, 17 }
   0x4   : > { %p139_p2 = pnand %p1003_p0, %p138_p1 }
   0x5   : > { %s1004_s16 = sshll.u32 (!%p139_p2), %s999_s13, 6 }
   0x6   : > { %142 = sbr.rel (%p139_p2) target bundleno = 284 (0x11c), region = 32  ;;  %p163_p3 = scmp.lt.s32.totalorder (!%p139_p2), %s1004_s16, 1023 }
   0xb   : > { %v1192_v0 = vld [vmem:[%s1548_s1 + $0x8] sm:$0x3f]   ;;  %vm518_vm0 = vcmask 1044480   ;;  %vm519_vm1 = vcmask 1045504   ;;  %v1234_v1 = vmov 65535   ;;  %v1193_v5 = vld [vmem:[%s1548_s1] sm:$0xff]  }
   0xc   : > { %v520_v2 = vsel %vm518_vm0, 4294967295, %v1234_v1  ;;  %s1552_s16 = smov (!%p163_p3, %s1004_s16), 1023  ;;  %vm421_vm2 = vcmask 220160   ;;  %v1344_v38 = vld [vmem:[%s1549_s2] ss:$0 sm:$0xff]  ;;  %vm878_vm3 = vcmask 64512  }
   0xd   : > { %v521_v3 = vsel %vm519_vm1, %v520_v2, 0  ;;  %s1005_s19 = sshll.u32 %s1552_s16, 2  ;;  %s1007_s25 = sshll.u32 %s1552_s16, 3 }
   0xe   : > { %v523_v4 = vand.u32 %v1192_v0, %v521_v3  ;;  %s1275_s22 = scalar_lea.vmem %s1547_s0, %s1005_s19  ;;  %s1352_s28 = scalar_lea.vmem %s1550_s3, %s1007_s25 }
   0xf   : > { %v1194_v6 = vld [vmem:[%s1275_s22] sm:$0xff]   ;;  %v1196_v8 = vld [vmem:[%s1275_s22 + $0x8] sm:$0xff]   ;;  %v1198_v10 = vld [vmem:[%s1275_s22 + $0x10] sm:$0xff]  }
  0x10   : > { %1111 = vmatprep.subr.bf16.mxu0 %v523_v4  ;;  %1179 = vmatprep.subr.bf16.mxu1 %v523_v4  ;;  %v1195_v7 = vld [vmem:[%s1275_s22 + $0x80] sm:$0xff]   ;;  %v1197_v9 = vld [vmem:[%s1275_s22 + $0x88] sm:$0xff]   ;;  %v1199_v11 = vld [vmem:[%s1275_s22 + $0x90] sm:$0xff]  }
  0x11   : > { %1112 = vmatpush3.bf16.msra.mxu0 %v523_v4  ;;  %1181 = vmatpush3.bf16.msra.mxu1 %v523_v4  ;;  %v1200_v12 = vld [vmem:[%s1275_s22 + $0x18] sm:$0xff]   ;;  %v1202_v14 = vld [vmem:[%s1275_s22 + $0x20] sm:$0xff]   ;;  %v1204_v16 = vld [vmem:[%s1275_s22 + $0x28] sm:$0xff]  }
  0x12   : > { %1113 = vmatprep.subr.bf16.mxu0 %v1193_v5  ;;  %1180 = vmatprep.subr.bf16.mxu1 %v1193_v5  ;;  %v1201_v13 = vld [vmem:[%s1275_s22 + $0x98] sm:$0xff]   ;;  %v1203_v15 = vld [vmem:[%s1275_s22 + $0xa0] sm:$0xff]   ;;  %v1205_v17 = vld [vmem:[%s1275_s22 + $0xa8] sm:$0xff]  }
  0x13   : > { %1115 = vmatprep.mubr.msk.bf16.mxu0 %vm421_vm2, %v1194_v6  ;;  %1147 = vmatprep.mubr.msk.bf16.mxu1 %vm421_vm2, %v1195_v7  ;;  %v1206_v18 = vld [vmem:[%s1275_s22 + $0x30] sm:$0xff]   ;;  %v1208_v20 = vld [vmem:[%s1275_s22 + $0x38] sm:$0xff]   ;;  %v1210_v22 = vld [vmem:[%s1275_s22 + $0x40] sm:$0xff]  }
  0x14   : > { %v1207_v19 = vld [vmem:[%s1275_s22 + $0xb0] sm:$0xff]   ;;  %v1209_v21 = vld [vmem:[%s1275_s22 + $0xb8] sm:$0xff]   ;;  %v1211_v23 = vld [vmem:[%s1275_s22 + $0xc0] sm:$0xff]  }
  0x15   : > { %1114 = vmatpush3.bf16.msra.mxu0 %v1193_v5  ;;  %1182 = vmatpush3.bf16.msra.mxu1 %v1193_v5  ;;  %v1212_v24 = vld [vmem:[%s1275_s22 + $0x48] sm:$0xff]   ;;  %v1214_v26 = vld [vmem:[%s1275_s22 + $0x50] sm:$0xff]   ;;  %v1216_v28 = vld [vmem:[%s1275_s22 + $0x58] sm:$0xff]  }
  0x16   : > { %v1213_v25 = vld [vmem:[%s1275_s22 + $0xc8] sm:$0xff]   ;;  %v1215_v27 = vld [vmem:[%s1275_s22 + $0xd0] sm:$0xff]   ;;  %v1217_v29 = vld [vmem:[%s1275_s22 + $0xd8] sm:$0xff]  }
  0x17   : > { %v1218_v30 = vld [vmem:[%s1275_s22 + $0x60] sm:$0xff]   ;;  %v1220_v32 = vld [vmem:[%s1275_s22 + $0x68] sm:$0xff]   ;;  %v1222_v34 = vld [vmem:[%s1275_s22 + $0x70] sm:$0xff]  }
  0x18   : > { %1116 = vmatmul.mubr.msk.bf16.vlgmr.msra.gmra.mxu0 %vm421_vm2, %v1196_v8  ;;  %1148 = vmatmul.mubr.msk.bf16.vlgmr.msra.gmra.mxu1 %vm421_vm2, %v1197_v9  ;;  %v1219_v31 = vld [vmem:[%s1275_s22 + $0xe0] sm:$0xff]   ;;  %v1221_v33 = vld [vmem:[%s1275_s22 + $0xe8] sm:$0xff]   ;;  %v1223_v35 = vld [vmem:[%s1275_s22 + $0xf0] sm:$0xff]  }
  0x19   : > { %1119 = vmatprep.mubr.msk.bf16.mxu0 %vm421_vm2, %v1198_v10  ;;  %1151 = vmatprep.mubr.msk.bf16.mxu1 %vm421_vm2, %v1199_v11  ;;  %v1224_v36 = vld [vmem:[%s1275_s22 + $0x78] sm:$0xff]  }
  0x1a   : > { %v1225_v37 = vld [vmem:[%s1275_s22 + $0xf8] sm:$0xff]  }
  0x20   : > { %1120 = vmatmul.mubr.msk.bf16.gmra.mxu0 %vm421_vm2, %v1200_v12  ;;  %1152 = vmatmul.mubr.msk.bf16.gmra.mxu1 %vm421_vm2, %v1201_v13 }
  0x21   : > { %1123 = vmatprep.mubr.msk.bf16.mxu0 %vm421_vm2, %v1202_v14  ;;  %1155 = vmatprep.mubr.msk.bf16.mxu1 %vm421_vm2, %v1203_v15 }
  0x28   : > { %1124 = vmatmul.mubr.msk.bf16.gmra.mxu0 %vm421_vm2, %v1204_v16  ;;  %1156 = vmatmul.mubr.msk.bf16.gmra.mxu1 %vm421_vm2, %v1205_v17 }
  0x29   : > { %1127 = vmatprep.mubr.msk.bf16.mxu0 %vm421_vm2, %v1206_v18  ;;  %1159 = vmatprep.mubr.msk.bf16.mxu1 %vm421_vm2, %v1207_v19 }
  0x30   : > { %1128 = vmatmul.mubr.msk.bf16.gmra.mxu0 %vm421_vm2, %v1208_v20  ;;  %1160 = vmatmul.mubr.msk.bf16.gmra.mxu1 %vm421_vm2, %v1209_v21 }
  0x31   : > { %1131 = vmatprep.mubr.msk.bf16.mxu0 %vm421_vm2, %v1210_v22  ;;  %1163 = vmatprep.mubr.msk.bf16.mxu1 %vm421_vm2, %v1211_v23 }
  0x38   : > { %1132 = vmatmul.mubr.msk.bf16.gmra.mxu0 %vm421_vm2, %v1212_v24  ;;  %1164 = vmatmul.mubr.msk.bf16.gmra.mxu1 %vm421_vm2, %v1213_v25 }
  0x39   : > { %1135 = vmatprep.mubr.msk.bf16.mxu0 %vm421_vm2, %v1214_v26  ;;  %1167 = vmatprep.mubr.msk.bf16.mxu1 %vm421_vm2, %v1215_v27 }
  0x40   : > { %1136 = vmatmul.mubr.msk.bf16.gmra.mxu0 %vm421_vm2, %v1216_v28  ;;  %1168 = vmatmul.mubr.msk.bf16.gmra.mxu1 %vm421_vm2, %v1217_v29 }
  0x41   : > { %1139 = vmatprep.mubr.msk.bf16.mxu0 %vm421_vm2, %v1218_v30  ;;  %1171 = vmatprep.mubr.msk.bf16.mxu1 %vm421_vm2, %v1219_v31 }
  0x48   : > { %1140 = vmatmul.mubr.msk.bf16.gmra.mxu0 %vm421_vm2, %v1220_v32  ;;  %1172 = vmatmul.mubr.msk.bf16.gmra.mxu1 %vm421_vm2, %v1221_v33 }
  0x49   : > { %1143 = vmatprep.mubr.msk.bf16.mxu0 %vm421_vm2, %v1222_v34  ;;  %1175 = vmatprep.mubr.msk.bf16.mxu1 %vm421_vm2, %v1223_v35 }
  0x50   : > { %1144 = vmatmul.mubr.msk.bf16.gmra.mxu0 %vm421_vm2, %v1224_v36  ;;  %1176 = vmatmul.mubr.msk.bf16.gmra.mxu1 %vm421_vm2, %v1225_v37 }
  0xd8   : > { %v1117_v39 = vpop.f32.mrf.mxu0  ;;  %v1149_v40 = vpop.f32.mrf.mxu1 }
  0xd9   : > { %v568_v41 = vadd.f32 %v1117_v39, %v1344_v38  ;;  %v696_v42 = vadd.f32 %v1149_v40, %v1344_v38 }
  0xda   : > { %v559_v43 = vpop.f32.mrf.mxu0  ;;  %v687_v44 = vpop.f32.mrf.mxu1 }
  0xdb   : > { %v816_v45 = vmax.f32 %v568_v41, 0.0  ;;  %v848_v46 = vmax.f32 %v696_v42, 0.0  ;;  %v560_v47 = vadd.f32 %v1344_v38, %v559_v43  ;;  %v688_v48 = vadd.f32 %v1344_v38, %v687_v44 }
  0xdc   : > { %v1118_v49 = vpop.f32.mrf.mxu0  ;;  %v1150_v50 = vpop.f32.mrf.mxu1 }
  0xdd   : > { %881 = vst.msk [vmem:[%s1352_s28 + $0x10] sm:$0xff] %vm878_vm3, %v816_v45  ;;  %913 = vst.msk [vmem:[%s1352_s28 + $0x110] sm:$0xff] %vm878_vm3, %v848_v46  ;;  %v814_v51 = vmax.f32 %v560_v47, 0.0  ;;  %v846_v52 = vmax.f32 %v688_v48, 0.0  ;;  %v571_v53 = vadd.f32 %v1118_v49, %v1344_v38  ;;  %v699_v54 = vadd.f32 %v1150_v50, %v1344_v38 }
  0xde   : > { %v562_v55 = vpop.f32.mrf.mxu0  ;;  %v690_v56 = vpop.f32.mrf.mxu1 }
  0xdf   : > { %879 = vst.msk [vmem:[%s1352_s28] sm:$0xff] %vm878_vm3, %v814_v51  ;;  %911 = vst.msk [vmem:[%s1352_s28 + $0x100] sm:$0xff] %vm878_vm3, %v846_v52  ;;  %v817_v57 = vmax.f32 %v571_v53, 0.0  ;;  %v849_v58 = vmax.f32 %v699_v54, 0.0  ;;  %v563_v59 = vadd.f32 %v1344_v38, %v562_v55  ;;  %v691_v60 = vadd.f32 %v1344_v38, %v690_v56 }
  0xe0   : > { %v1121_v61 = vpop.f32.mrf.mxu0  ;;  %v1153_v62 = vpop.f32.mrf.mxu1 }
  0xe1   : > { %882 = vst.msk [vmem:[%s1352_s28 + $0x18] sm:$0xff] %vm878_vm3, %v817_v57  ;;  %914 = vst.msk [vmem:[%s1352_s28 + $0x118] sm:$0xff] %vm878_vm3, %v849_v58  ;;  %v815_v63 = vmax.f32 %v563_v59, 0.0  ;;  %v847_v0 = vmax.f32 %v691_v60, 0.0  ;;  %v584_v1 = vadd.f32 %v1121_v61, %v1344_v38  ;;  %v712_v2 = vadd.f32 %v1153_v62, %v1344_v38 }
  0xe2   : > { %v575_v3 = vpop.f32.mrf.mxu0  ;;  %v703_v4 = vpop.f32.mrf.mxu1 }
  0xe3   : > { %880 = vst.msk [vmem:[%s1352_s28 + $0x8] sm:$0xff] %vm878_vm3, %v815_v63  ;;  %912 = vst.msk [vmem:[%s1352_s28 + $0x108] sm:$0xff] %vm878_vm3, %v847_v0  ;;  %v820_v5 = vmax.f32 %v584_v1, 0.0  ;;  %v852_v6 = vmax.f32 %v712_v2, 0.0  ;;  %v576_v7 = vadd.f32 %v1344_v38, %v575_v3  ;;  %v704_v8 = vadd.f32 %v1344_v38, %v703_v4 }
  0xe4   : > { %v1122_v9 = vpop.f32.mrf.mxu0  ;;  %v1154_v10 = vpop.f32.mrf.mxu1 }
  0xe5   : > { %885 = vst.msk [vmem:[%s1352_s28 + $0x30] sm:$0xff] %vm878_vm3, %v820_v5  ;;  %917 = vst.msk [vmem:[%s1352_s28 + $0x130] sm:$0xff] %vm878_vm3, %v852_v6  ;;  %v818_v11 = vmax.f32 %v576_v7, 0.0  ;;  %v850_v12 = vmax.f32 %v704_v8, 0.0  ;;  %v587_v13 = vadd.f32 %v1122_v9, %v1344_v38  ;;  %v715_v14 = vadd.f32 %v1154_v10, %v1344_v38 }
  0xe6   : > { %v578_v15 = vpop.f32.mrf.mxu0  ;;  %v706_v16 = vpop.f32.mrf.mxu1 }
  0xe7   : > { %883 = vst.msk [vmem:[%s1352_s28 + $0x20] sm:$0xff] %vm878_vm3, %v818_v11  ;;  %915 = vst.msk [vmem:[%s1352_s28 + $0x120] sm:$0xff] %vm878_vm3, %v850_v12  ;;  %v821_v17 = vmax.f32 %v587_v13, 0.0  ;;  %v853_v18 = vmax.f32 %v715_v14, 0.0  ;;  %v579_v19 = vadd.f32 %v1344_v38, %v578_v15  ;;  %v707_v20 = vadd.f32 %v1344_v38, %v706_v16 }
  0xe8   : > { %v1125_v21 = vpop.f32.mrf.mxu0  ;;  %v1157_v22 = vpop.f32.mrf.mxu1 }
  0xe9   : > { %886 = vst.msk [vmem:[%s1352_s28 + $0x38] sm:$0xff] %vm878_vm3, %v821_v17  ;;  %918 = vst.msk [vmem:[%s1352_s28 + $0x138] sm:$0xff] %vm878_vm3, %v853_v18  ;;  %v819_v23 = vmax.f32 %v579_v19, 0.0  ;;  %v851_v24 = vmax.f32 %v707_v20, 0.0  ;;  %v600_v25 = vadd.f32 %v1125_v21, %v1344_v38  ;;  %v728_v26 = vadd.f32 %v1157_v22, %v1344_v38 }
  0xea   : > { %v591_v27 = vpop.f32.mrf.mxu0  ;;  %v719_v28 = vpop.f32.mrf.mxu1 }
  0xeb   : > { %884 = vst.msk [vmem:[%s1352_s28 + $0x28] sm:$0xff] %vm878_vm3, %v819_v23  ;;  %916 = vst.msk [vmem:[%s1352_s28 + $0x128] sm:$0xff] %vm878_vm3, %v851_v24  ;;  %v824_v29 = vmax.f32 %v600_v25, 0.0  ;;  %v856_v30 = vmax.f32 %v728_v26, 0.0  ;;  %v592_v31 = vadd.f32 %v1344_v38, %v591_v27  ;;  %v720_v32 = vadd.f32 %v1344_v38, %v719_v28 }
  0xec   : > { %v1126_v33 = vpop.f32.mrf.mxu0  ;;  %v1158_v34 = vpop.f32.mrf.mxu1 }
  0xed   : > { %889 = vst.msk [vmem:[%s1352_s28 + $0x50] sm:$0xff] %vm878_vm3, %v824_v29  ;;  %921 = vst.msk [vmem:[%s1352_s28 + $0x150] sm:$0xff] %vm878_vm3, %v856_v30  ;;  %v822_v35 = vmax.f32 %v592_v31, 0.0  ;;  %v854_v36 = vmax.f32 %v720_v32, 0.0  ;;  %v603_v37 = vadd.f32 %v1126_v33, %v1344_v38  ;;  %v731_v39 = vadd.f32 %v1158_v34, %v1344_v38 }
  0xee   : > { %v594_v40 = vpop.f32.mrf.mxu0  ;;  %v722_v41 = vpop.f32.mrf.mxu1 }
  0xef   : > { %887 = vst.msk [vmem:[%s1352_s28 + $0x40] sm:$0xff] %vm878_vm3, %v822_v35  ;;  %919 = vst.msk [vmem:[%s1352_s28 + $0x140] sm:$0xff] %vm878_vm3, %v854_v36  ;;  %v825_v42 = vmax.f32 %v603_v37, 0.0  ;;  %v857_v43 = vmax.f32 %v731_v39, 0.0  ;;  %v595_v44 = vadd.f32 %v1344_v38, %v594_v40  ;;  %v723_v45 = vadd.f32 %v1344_v38, %v722_v41 }
  0xf0   : > { %v1129_v46 = vpop.f32.mrf.mxu0  ;;  %v1161_v47 = vpop.f32.mrf.mxu1 }
  0xf1   : > { %890 = vst.msk [vmem:[%s1352_s28 + $0x58] sm:$0xff] %vm878_vm3, %v825_v42  ;;  %922 = vst.msk [vmem:[%s1352_s28 + $0x158] sm:$0xff] %vm878_vm3, %v857_v43  ;;  %v823_v48 = vmax.f32 %v595_v44, 0.0  ;;  %v855_v49 = vmax.f32 %v723_v45, 0.0  ;;  %v616_v50 = vadd.f32 %v1129_v46, %v1344_v38  ;;  %v744_v51 = vadd.f32 %v1161_v47, %v1344_v38 }
  0xf2   : > { %v607_v52 = vpop.f32.mrf.mxu0  ;;  %v735_v53 = vpop.f32.mrf.mxu1 }
  0xf3   : > { %888 = vst.msk [vmem:[%s1352_s28 + $0x48] sm:$0xff] %vm878_vm3, %v823_v48  ;;  %920 = vst.msk [vmem:[%s1352_s28 + $0x148] sm:$0xff] %vm878_vm3, %v855_v49  ;;  %v828_v54 = vmax.f32 %v616_v50, 0.0  ;;  %v860_v55 = vmax.f32 %v744_v51, 0.0  ;;  %v608_v56 = vadd.f32 %v1344_v38, %v607_v52  ;;  %v736_v57 = vadd.f32 %v1344_v38, %v735_v53 }
  0xf4   : > { %v1130_v58 = vpop.f32.mrf.mxu0  ;;  %v1162_v59 = vpop.f32.mrf.mxu1 }
  0xf5   : > { %893 = vst.msk [vmem:[%s1352_s28 + $0x70] sm:$0xff] %vm878_vm3, %v828_v54  ;;  %925 = vst.msk [vmem:[%s1352_s28 + $0x170] sm:$0xff] %vm878_vm3, %v860_v55  ;;  %v826_v60 = vmax.f32 %v608_v56, 0.0  ;;  %v858_v61 = vmax.f32 %v736_v57, 0.0  ;;  %v619_v62 = vadd.f32 %v1130_v58, %v1344_v38  ;;  %v747_v63 = vadd.f32 %v1162_v59, %v1344_v38 }
  0xf6   : > { %v610_v0 = vpop.f32.mrf.mxu0  ;;  %v738_v1 = vpop.f32.mrf.mxu1 }
  0xf7   : > { %891 = vst.msk [vmem:[%s1352_s28 + $0x60] sm:$0xff] %vm878_vm3, %v826_v60  ;;  %923 = vst.msk [vmem:[%s1352_s28 + $0x160] sm:$0xff] %vm878_vm3, %v858_v61  ;;  %v829_v2 = vmax.f32 %v619_v62, 0.0  ;;  %v861_v3 = vmax.f32 %v747_v63, 0.0  ;;  %v611_v4 = vadd.f32 %v1344_v38, %v610_v0  ;;  %v739_v5 = vadd.f32 %v1344_v38, %v738_v1 }
  0xf8   : > { %v1133_v6 = vpop.f32.mrf.mxu0  ;;  %v1165_v7 = vpop.f32.mrf.mxu1 }
  0xf9   : > { %894 = vst.msk [vmem:[%s1352_s28 + $0x78] sm:$0xff] %vm878_vm3, %v829_v2  ;;  %926 = vst.msk [vmem:[%s1352_s28 + $0x178] sm:$0xff] %vm878_vm3, %v861_v3  ;;  %v827_v8 = vmax.f32 %v611_v4, 0.0  ;;  %v859_v9 = vmax.f32 %v739_v5, 0.0  ;;  %v632_v10 = vadd.f32 %v1133_v6, %v1344_v38  ;;  %v760_v11 = vadd.f32 %v1165_v7, %v1344_v38 }
  0xfa   : > { %v623_v12 = vpop.f32.mrf.mxu0  ;;  %v751_v13 = vpop.f32.mrf.mxu1 }
  0xfb   : > { %892 = vst.msk [vmem:[%s1352_s28 + $0x68] sm:$0xff] %vm878_vm3, %v827_v8  ;;  %924 = vst.msk [vmem:[%s1352_s28 + $0x168] sm:$0xff] %vm878_vm3, %v859_v9  ;;  %v832_v14 = vmax.f32 %v632_v10, 0.0  ;;  %v864_v15 = vmax.f32 %v760_v11, 0.0  ;;  %v624_v16 = vadd.f32 %v1344_v38, %v623_v12  ;;  %v752_v17 = vadd.f32 %v1344_v38, %v751_v13 }
  0xfc   : > { %v1134_v18 = vpop.f32.mrf.mxu0  ;;  %v1166_v19 = vpop.f32.mrf.mxu1 }
  0xfd   : > { %897 = vst.msk [vmem:[%s1352_s28 + $0x90] sm:$0xff] %vm878_vm3, %v832_v14  ;;  %929 = vst.msk [vmem:[%s1352_s28 + $0x190] sm:$0xff] %vm878_vm3, %v864_v15  ;;  %v830_v20 = vmax.f32 %v624_v16, 0.0  ;;  %v862_v21 = vmax.f32 %v752_v17, 0.0  ;;  %v635_v22 = vadd.f32 %v1134_v18, %v1344_v38  ;;  %v763_v23 = vadd.f32 %v1166_v19, %v1344_v38 }
  0xfe   : > { %v626_v24 = vpop.f32.mrf.mxu0  ;;  %v754_v25 = vpop.f32.mrf.mxu1 }
  0xff   : > { %895 = vst.msk [vmem:[%s1352_s28 + $0x80] sm:$0xff] %vm878_vm3, %v830_v20  ;;  %927 = vst.msk [vmem:[%s1352_s28 + $0x180] sm:$0xff] %vm878_vm3, %v862_v21  ;;  %v833_v26 = vmax.f32 %v635_v22, 0.0  ;;  %v865_v27 = vmax.f32 %v763_v23, 0.0  ;;  %v627_v28 = vadd.f32 %v1344_v38, %v626_v24  ;;  %v755_v29 = vadd.f32 %v1344_v38, %v754_v25 }
 0x100   : > { %v1137_v30 = vpop.f32.mrf.mxu0  ;;  %v1169_v31 = vpop.f32.mrf.mxu1 }
 0x101   : > { %898 = vst.msk [vmem:[%s1352_s28 + $0x98] sm:$0xff] %vm878_vm3, %v833_v26  ;;  %930 = vst.msk [vmem:[%s1352_s28 + $0x198] sm:$0xff] %vm878_vm3, %v865_v27  ;;  %v831_v32 = vmax.f32 %v627_v28, 0.0  ;;  %v863_v33 = vmax.f32 %v755_v29, 0.0  ;;  %v648_v34 = vadd.f32 %v1137_v30, %v1344_v38  ;;  %v776_v35 = vadd.f32 %v1169_v31, %v1344_v38 }
 0x102   : > { %v639_v36 = vpop.f32.mrf.mxu0  ;;  %v767_v37 = vpop.f32.mrf.mxu1 }
 0x103   : > { %896 = vst.msk [vmem:[%s1352_s28 + $0x88] sm:$0xff] %vm878_vm3, %v831_v32  ;;  %928 = vst.msk [vmem:[%s1352_s28 + $0x188] sm:$0xff] %vm878_vm3, %v863_v33  ;;  %v836_v39 = vmax.f32 %v648_v34, 0.0  ;;  %v868_v40 = vmax.f32 %v776_v35, 0.0  ;;  %v640_v41 = vadd.f32 %v1344_v38, %v639_v36  ;;  %v768_v42 = vadd.f32 %v1344_v38, %v767_v37 }
 0x104   : > { %v1138_v43 = vpop.f32.mrf.mxu0  ;;  %v1170_v44 = vpop.f32.mrf.mxu1 }
 0x105   : > { %901 = vst.msk [vmem:[%s1352_s28 + $0xb0] sm:$0xff] %vm878_vm3, %v836_v39  ;;  %933 = vst.msk [vmem:[%s1352_s28 + $0x1b0] sm:$0xff] %vm878_vm3, %v868_v40  ;;  %v834_v45 = vmax.f32 %v640_v41, 0.0  ;;  %v866_v46 = vmax.f32 %v768_v42, 0.0  ;;  %v651_v47 = vadd.f32 %v1138_v43, %v1344_v38  ;;  %v779_v48 = vadd.f32 %v1170_v44, %v1344_v38 }
 0x106   : > { %v642_v49 = vpop.f32.mrf.mxu0  ;;  %v770_v50 = vpop.f32.mrf.mxu1 }
 0x107   : > { %899 = vst.msk [vmem:[%s1352_s28 + $0xa0] sm:$0xff] %vm878_vm3, %v834_v45  ;;  %931 = vst.msk [vmem:[%s1352_s28 + $0x1a0] sm:$0xff] %vm878_vm3, %v866_v46  ;;  %v837_v51 = vmax.f32 %v651_v47, 0.0  ;;  %v869_v52 = vmax.f32 %v779_v48, 0.0  ;;  %v643_v53 = vadd.f32 %v1344_v38, %v642_v49  ;;  %v771_v54 = vadd.f32 %v1344_v38, %v770_v50 }
 0x108   : > { %v1141_v55 = vpop.f32.mrf.mxu0  ;;  %v1173_v56 = vpop.f32.mrf.mxu1 }
 0x109   : > { %902 = vst.msk [vmem:[%s1352_s28 + $0xb8] sm:$0xff] %vm878_vm3, %v837_v51  ;;  %934 = vst.msk [vmem:[%s1352_s28 + $0x1b8] sm:$0xff] %vm878_vm3, %v869_v52  ;;  %v835_v57 = vmax.f32 %v643_v53, 0.0  ;;  %v867_v58 = vmax.f32 %v771_v54, 0.0  ;;  %v664_v59 = vadd.f32 %v1141_v55, %v1344_v38  ;;  %v792_v60 = vadd.f32 %v1173_v56, %v1344_v38 }
 0x10a   : > { %v655_v61 = vpop.f32.mrf.mxu0  ;;  %v783_v62 = vpop.f32.mrf.mxu1 }
 0x10b   : > { %900 = vst.msk [vmem:[%s1352_s28 + $0xa8] sm:$0xff] %vm878_vm3, %v835_v57  ;;  %932 = vst.msk [vmem:[%s1352_s28 + $0x1a8] sm:$0xff] %vm878_vm3, %v867_v58  ;;  %v840_v63 = vmax.f32 %v664_v59, 0.0  ;;  %v872_v0 = vmax.f32 %v792_v60, 0.0  ;;  %v656_v1 = vadd.f32 %v1344_v38, %v655_v61  ;;  %v784_v2 = vadd.f32 %v1344_v38, %v783_v62 }
 0x10c   : > { %v1142_v3 = vpop.f32.mrf.mxu0  ;;  %v1174_v4 = vpop.f32.mrf.mxu1 }
 0x10d   : > { %905 = vst.msk [vmem:[%s1352_s28 + $0xd0] sm:$0xff] %vm878_vm3, %v840_v63  ;;  %937 = vst.msk [vmem:[%s1352_s28 + $0x1d0] sm:$0xff] %vm878_vm3, %v872_v0  ;;  %v838_v5 = vmax.f32 %v656_v1, 0.0  ;;  %v870_v6 = vmax.f32 %v784_v2, 0.0  ;;  %v667_v7 = vadd.f32 %v1142_v3, %v1344_v38  ;;  %v795_v8 = vadd.f32 %v1174_v4, %v1344_v38 }
 0x10e   : > { %v658_v9 = vpop.f32.mrf.mxu0  ;;  %v786_v10 = vpop.f32.mrf.mxu1 }
 0x10f   : > { %903 = vst.msk [vmem:[%s1352_s28 + $0xc0] sm:$0xff] %vm878_vm3, %v838_v5  ;;  %935 = vst.msk [vmem:[%s1352_s28 + $0x1c0] sm:$0xff] %vm878_vm3, %v870_v6  ;;  %v841_v11 = vmax.f32 %v667_v7, 0.0  ;;  %v873_v12 = vmax.f32 %v795_v8, 0.0  ;;  %v659_v13 = vadd.f32 %v1344_v38, %v658_v9  ;;  %v787_v14 = vadd.f32 %v1344_v38, %v786_v10 }
 0x110   : > { %v1145_v15 = vpop.f32.mrf.mxu0  ;;  %v1177_v16 = vpop.f32.mrf.mxu1 }
 0x111   : > { %906 = vst.msk [vmem:[%s1352_s28 + $0xd8] sm:$0xff] %vm878_vm3, %v841_v11  ;;  %938 = vst.msk [vmem:[%s1352_s28 + $0x1d8] sm:$0xff] %vm878_vm3, %v873_v12  ;;  %v839_v17 = vmax.f32 %v659_v13, 0.0  ;;  %v871_v18 = vmax.f32 %v787_v14, 0.0  ;;  %v680_v19 = vadd.f32 %v1145_v15, %v1344_v38  ;;  %v808_v20 = vadd.f32 %v1177_v16, %v1344_v38 }
 0x112   : > { %v671_v21 = vpop.f32.mrf.mxu0  ;;  %v799_v22 = vpop.f32.mrf.mxu1 }
 0x113   : > { %904 = vst.msk [vmem:[%s1352_s28 + $0xc8] sm:$0xff] %vm878_vm3, %v839_v17  ;;  %936 = vst.msk [vmem:[%s1352_s28 + $0x1c8] sm:$0xff] %vm878_vm3, %v871_v18  ;;  %v844_v23 = vmax.f32 %v680_v19, 0.0  ;;  %v876_v24 = vmax.f32 %v808_v20, 0.0  ;;  %v672_v25 = vadd.f32 %v1344_v38, %v671_v21  ;;  %v800_v26 = vadd.f32 %v1344_v38, %v799_v22 }
 0x114   : > { %v1146_v27 = vpop.f32.mrf.mxu0  ;;  %v1178_v28 = vpop.f32.mrf.mxu1 }
 0x115   : > { %909 = vst.msk [vmem:[%s1352_s28 + $0xf0] sm:$0xff] %vm878_vm3, %v844_v23  ;;  %941 = vst.msk [vmem:[%s1352_s28 + $0x1f0] sm:$0xff] %vm878_vm3, %v876_v24  ;;  %v842_v29 = vmax.f32 %v672_v25, 0.0  ;;  %v874_v30 = vmax.f32 %v800_v26, 0.0  ;;  %v683_v31 = vadd.f32 %v1146_v27, %v1344_v38  ;;  %v811_v32 = vadd.f32 %v1178_v28, %v1344_v38 }
 0x116   : > { %v674_v33 = vpop.f32.mrf.mxu0  ;;  %v802_v34 = vpop.f32.mrf.mxu1 }
 0x117   : > { %907 = vst.msk [vmem:[%s1352_s28 + $0xe0] sm:$0xff] %vm878_vm3, %v842_v29  ;;  %939 = vst.msk [vmem:[%s1352_s28 + $0x1e0] sm:$0xff] %vm878_vm3, %v874_v30  ;;  %v845_v35 = vmax.f32 %v683_v31, 0.0  ;;  %v877_v36 = vmax.f32 %v811_v32, 0.0  ;;  %v675_v37 = vadd.f32 %v1344_v38, %v674_v33  ;;  %v803_v39 = vadd.f32 %v1344_v38, %v802_v34 }
 0x119   : > { %910 = vst.msk [vmem:[%s1352_s28 + $0xf8] sm:$0xff] %vm878_vm3, %v845_v35  ;;  %942 = vst.msk [vmem:[%s1352_s28 + $0x1f8] sm:$0xff] %vm878_vm3, %v877_v36  ;;  %v843_v40 = vmax.f32 %v675_v37, 0.0  ;;  %v875_v41 = vmax.f32 %v803_v39, 0.0 }
 0x11b   : > { %908 = vst.msk [vmem:[%s1352_s28 + $0xe8] sm:$0xff] %vm878_vm3, %v843_v40  ;;  %940 = vst.msk [vmem:[%s1352_s28 + $0x1e8] sm:$0xff] %vm878_vm3, %v875_v41 }
 0x11c PF: > { %s13_s12 = sadd.s32 1, %s1232_s12  }
 0x11d   : > { %p10_p4 = scmp.ge.s32.totalorder %s13_s12, 18  }
 0x11f   :  { %12 = sbr.rel (!%p10_p4) target bundleno = 1 (0x1), region = 62 }

// kernel: cnn_vanilla_forward.10
= control target key start
LH: loop header
LB: loop body
LE: loop exit
PB: predicated region body
PF: predicated region fallthrough
CT: control target
= control target key end

     0   :  { %s1678_s13 = smov 120   ;;  %vm1544_vm0 = vcmask 64512   ;;  %s4377_s0 = inlined_call_operand.vmem [shape: f32[16,16,2,8,16], index: 0, kind: input, shape index: {}]   ;;  %s4378_s1 = inlined_call_operand.vmem [shape: f32[16,8,8,8], index: 1, kind: output, shape index: {}]  }
   0x1   :  { %v12_v0 = vld [vmem:[%s4377_s0 + $0x20] sm:$0xff]  ;;  %v13_v1 = vld [vmem:[%s4377_s0 + $0x28] sm:$0xff]  ;;  %v14_v10 = vld [vmem:[%s4377_s0 + $0x30] sm:$0xff] }
   0x2   :  { %v28_v2 = vld [vmem:[%s4377_s0 + $0xa0] sm:$0xff]  ;;  %v29_v3 = vld [vmem:[%s4377_s0 + $0xa8] sm:$0xff]  ;;  %v15_v13 = vld [vmem:[%s4377_s0 + $0x38] sm:$0xff] }
   0x3   :  { %v524_v4 = vmax.f32 %v12_v0, %v28_v2  ;;  %v8_v5 = vld [vmem:[%s4377_s0] sm:$0xff]  ;;  %v9_v6 = vld [vmem:[%s4377_s0 + $0x8] sm:$0xff]  ;;  %v525_v7 = vmax.f32 %v13_v1, %v29_v3  ;;  %v30_v14 = vld [vmem:[%s4377_s0 + $0xb0] sm:$0xff] }
   0x4   :  { %v24_v8 = vld [vmem:[%s4377_s0 + $0x80] sm:$0xff]  ;;  %v25_v9 = vld [vmem:[%s4377_s0 + $0x88] sm:$0xff]  ;;  %v31_v15 = vld [vmem:[%s4377_s0 + $0xb8] sm:$0xff]  ;;  %v526_v17 = vmax.f32 %v14_v10, %v30_v14 }
   0x5   :  { %v520_v11 = vmax.f32 %v8_v5, %v24_v8  ;;  %v521_v12 = vmax.f32 %v9_v6, %v25_v9  ;;  %v1725_v16 = vmax.f32 %v524_v4, %v525_v7  ;;  %v527_v18 = vmax.f32 %v15_v13, %v31_v15  ;;  %v10_v19 = vld [vmem:[%s4377_s0 + $0x10] sm:$0xff]  ;;  %v11_v20 = vld [vmem:[%s4377_s0 + $0x18] sm:$0xff]  ;;  %v16_v31 = vld [vmem:[%s4377_s0 + $0x40] sm:$0xff] }
   0x6   :  { %v26_v21 = vld [vmem:[%s4377_s0 + $0x90] sm:$0xff]  ;;  %v27_v23 = vld [vmem:[%s4377_s0 + $0x98] sm:$0xff]  ;;  %v17_v34 = vld [vmem:[%s4377_s0 + $0x48] sm:$0xff] }
   0x7   :  { %v1736_v22 = vmax.f32 %v520_v11, %v521_v12  ;;  %v522_v24 = vmax.f32 %v10_v19, %v26_v21  ;;  %v18_v25 = vld [vmem:[%s4377_s0 + $0x50] sm:$0xff]  ;;  %v19_v26 = vld [vmem:[%s4377_s0 + $0x58] sm:$0xff]  ;;  %1036 = vrot.lane.b32.xlu1 %v1725_v16, %s1678_s13  ;;  %v1749_v27 = vmax.f32 %v526_v17, %v527_v18  ;;  %v523_v28 = vmax.f32 %v11_v20, %v27_v23  ;;  %v32_v35 = vld [vmem:[%s4377_s0 + $0xc0] sm:$0xff] }
   0x8   :  { %v34_v29 = vld [vmem:[%s4377_s0 + $0xd0] sm:$0xff]  ;;  %v35_v30 = vld [vmem:[%s4377_s0 + $0xd8] sm:$0xff]  ;;  %v33_v36 = vld [vmem:[%s4377_s0 + $0xc8] sm:$0xff]  ;;  %v528_v38 = vmax.f32 %v16_v31, %v32_v35 }
   0x9   :  { %1032 = vrot.lane.b32.xlu0 %v1736_v22, %s1678_s13  ;;  %v530_v32 = vmax.f32 %v18_v25, %v34_v29  ;;  %v531_v33 = vmax.f32 %v19_v26, %v35_v30  ;;  %v1771_v37 = vmax.f32 %v522_v24, %v523_v28  ;;  %v529_v39 = vmax.f32 %v17_v34, %v33_v36  ;;  %v22_v40 = vld [vmem:[%s4377_s0 + $0x70] sm:$0xff]  ;;  %v23_v41 = vld [vmem:[%s4377_s0 + $0x78] sm:$0xff]  ;;  %v20_v44 = vld [vmem:[%s4377_s0 + $0x60] sm:$0xff] }
   0xa   :  { %v38_v42 = vld [vmem:[%s4377_s0 + $0xf0] sm:$0xff]  ;;  %v39_v43 = vld [vmem:[%s4377_s0 + $0xf8] sm:$0xff]  ;;  %v21_v45 = vld [vmem:[%s4377_s0 + $0x68] sm:$0xff] }
   0xb   :  { %1038 = vrot.lane.b32.xlu1 %v1749_v27, %s1678_s13  ;;  %v1793_v46 = vmax.f32 %v530_v32, %v531_v33  ;;  %v534_v47 = vmax.f32 %v22_v40, %v38_v42  ;;  %v535_v48 = vmax.f32 %v23_v41, %v39_v43  ;;  %v36_v49 = vld [vmem:[%s4377_s0 + $0xe0] sm:$0xff]  ;;  %v37_v50 = vld [vmem:[%s4377_s0 + $0xe8] sm:$0xff]  ;;  %v42_v51 = vld [vmem:[%s4377_s0 + $0x110] sm:$0xff]  ;;  %v1806_v52 = vmax.f32 %v528_v38, %v529_v39 }
   0xc   :  { %v532_v53 = vmax.f32 %v20_v44, %v36_v49  ;;  %v533_v54 = vmax.f32 %v21_v45, %v37_v50  ;;  %v43_v55 = vld [vmem:[%s4377_s0 + $0x118] sm:$0xff]  ;;  %v58_v56 = vld [vmem:[%s4377_s0 + $0x190] sm:$0xff]  ;;  %v40_v58 = vld [vmem:[%s4377_s0 + $0x100] sm:$0xff] }
   0xd   :  { %1034 = vrot.lane.b32.xlu0 %v1771_v37, %s1678_s13  ;;  %v59_v57 = vld [vmem:[%s4377_s0 + $0x198] sm:$0xff]  ;;  %v41_v59 = vld [vmem:[%s4377_s0 + $0x108] sm:$0xff]  ;;  %v56_v60 = vld [vmem:[%s4377_s0 + $0x180] sm:$0xff]  ;;  %v1831_v62 = vmax.f32 %v534_v47, %v535_v48  ;;  %v538_v63 = vmax.f32 %v42_v51, %v58_v56 }
   0xe   :  { %v57_v61 = vld [vmem:[%s4377_s0 + $0x188] sm:$0xff]  ;;  %v539_v0 = vmax.f32 %v43_v55, %v59_v57  ;;  %v46_v1 = vld [vmem:[%s4377_s0 + $0x130] sm:$0xff]  ;;  %v47_v2 = vld [vmem:[%s4377_s0 + $0x138] sm:$0xff]  ;;  %v1841_v3 = vmax.f32 %v532_v53, %v533_v54  ;;  %v536_v4 = vmax.f32 %v40_v58, %v56_v60 }
   0xf   :  { %1042 = vrot.lane.b32.xlu1 %v1793_v46, %s1678_s13  ;;  %v537_v5 = vmax.f32 %v41_v59, %v57_v61  ;;  %v62_v6 = vld [vmem:[%s4377_s0 + $0x1b0] sm:$0xff]  ;;  %v63_v7 = vld [vmem:[%s4377_s0 + $0x1b8] sm:$0xff]  ;;  %v44_v8 = vld [vmem:[%s4377_s0 + $0x120] sm:$0xff] }
  0x10   :  { %v45_v9 = vld [vmem:[%s4377_s0 + $0x128] sm:$0xff]  ;;  %v60_v10 = vld [vmem:[%s4377_s0 + $0x1a0] sm:$0xff]  ;;  %v1863_v12 = vmax.f32 %v538_v63, %v539_v0  ;;  %v542_v13 = vmax.f32 %v46_v1, %v62_v6  ;;  %v543_v14 = vmax.f32 %v47_v2, %v63_v7  ;;  %v50_v15 = vld [vmem:[%s4377_s0 + $0x150] sm:$0xff] }
  0x11   :  { %1040 = vrot.lane.b32.xlu0 %v1806_v52, %s1678_s13  ;;  %v61_v11 = vld [vmem:[%s4377_s0 + $0x1a8] sm:$0xff]  ;;  %v51_v17 = vld [vmem:[%s4377_s0 + $0x158] sm:$0xff]  ;;  %v1873_v18 = vmax.f32 %v536_v4, %v537_v5  ;;  %v540_v19 = vmax.f32 %v44_v8, %v60_v10  ;;  %v66_v21 = vld [vmem:[%s4377_s0 + $0x1d0] sm:$0xff] }
  0x12   :  { %v541_v20 = vmax.f32 %v45_v9, %v61_v11  ;;  %v67_v23 = vld [vmem:[%s4377_s0 + $0x1d8] sm:$0xff]  ;;  %v48_v24 = vld [vmem:[%s4377_s0 + $0x140] sm:$0xff]  ;;  %v49_v25 = vld [vmem:[%s4377_s0 + $0x148] sm:$0xff]  ;;  %v1895_v29 = vmax.f32 %v542_v13, %v543_v14  ;;  %v546_v30 = vmax.f32 %v50_v15, %v66_v21 }
  0x13   :  { %1046 = vrot.lane.b32.xlu1 %v1831_v62, %s1678_s13  ;;  %v64_v26 = vld [vmem:[%s4377_s0 + $0x1c0] sm:$0xff]  ;;  %v65_v28 = vld [vmem:[%s4377_s0 + $0x1c8] sm:$0xff]  ;;  %v547_v31 = vmax.f32 %v51_v17, %v67_v23  ;;  %v54_v32 = vld [vmem:[%s4377_s0 + $0x170] sm:$0xff] }
  0x14   :  { %v55_v33 = vld [vmem:[%s4377_s0 + $0x178] sm:$0xff]  ;;  %v1905_v34 = vmax.f32 %v540_v19, %v541_v20  ;;  %v544_v35 = vmax.f32 %v48_v24, %v64_v26  ;;  %v545_v36 = vmax.f32 %v49_v25, %v65_v28  ;;  %v70_v38 = vld [vmem:[%s4377_s0 + $0x1f0] sm:$0xff]  ;;  %v52_v40 = vld [vmem:[%s4377_s0 + $0x160] sm:$0xff] }
  0x15   :  { %1044 = vrot.lane.b32.xlu0 %v1841_v3, %s1678_s13  ;;  %v71_v39 = vld [vmem:[%s4377_s0 + $0x1f8] sm:$0xff]  ;;  %v53_v41 = vld [vmem:[%s4377_s0 + $0x168] sm:$0xff]  ;;  %v68_v42 = vld [vmem:[%s4377_s0 + $0x1e0] sm:$0xff]  ;;  %v1927_v44 = vmax.f32 %v546_v30, %v547_v31  ;;  %v550_v45 = vmax.f32 %v54_v32, %v70_v38 }
  0x16   :  { %v69_v43 = vld [vmem:[%s4377_s0 + $0x1e8] sm:$0xff]  ;;  %v551_v47 = vmax.f32 %v55_v33, %v71_v39  ;;  %v74_v48 = vld [vmem:[%s4377_s0 + $0x210] sm:$0xff]  ;;  %v75_v49 = vld [vmem:[%s4377_s0 + $0x218] sm:$0xff]  ;;  %v1937_v50 = vmax.f32 %v544_v35, %v545_v36  ;;  %v548_v51 = vmax.f32 %v52_v40, %v68_v42 }
  0x17   :  { %1050 = vrot.lane.b32.xlu1 %v1863_v12, %s1678_s13  ;;  %v549_v53 = vmax.f32 %v53_v41, %v69_v43  ;;  %v90_v54 = vld [vmem:[%s4377_s0 + $0x290] sm:$0xff]  ;;  %v91_v55 = vld [vmem:[%s4377_s0 + $0x298] sm:$0xff]  ;;  %v72_v56 = vld [vmem:[%s4377_s0 + $0x200] sm:$0xff] }
  0x18   :  { %v73_v57 = vld [vmem:[%s4377_s0 + $0x208] sm:$0xff]  ;;  %v88_v58 = vld [vmem:[%s4377_s0 + $0x280] sm:$0xff]  ;;  %v1959_v60 = vmax.f32 %v550_v45, %v551_v47  ;;  %v554_v61 = vmax.f32 %v74_v48, %v90_v54  ;;  %v555_v63 = vmax.f32 %v75_v49, %v91_v55  ;;  %v78_v0 = vld [vmem:[%s4377_s0 + $0x230] sm:$0xff] }
  0x19   :  { %1048 = vrot.lane.b32.xlu0 %v1873_v18, %s1678_s13  ;;  %v89_v59 = vld [vmem:[%s4377_s0 + $0x288] sm:$0xff]  ;;  %v79_v1 = vld [vmem:[%s4377_s0 + $0x238] sm:$0xff]  ;;  %v1969_v2 = vmax.f32 %v548_v51, %v549_v53  ;;  %v552_v4 = vmax.f32 %v72_v56, %v88_v58  ;;  %v94_v6 = vld [vmem:[%s4377_s0 + $0x2b0] sm:$0xff] }
  0x1a   :  { %v553_v5 = vmax.f32 %v73_v57, %v89_v59  ;;  %v95_v7 = vld [vmem:[%s4377_s0 + $0x2b8] sm:$0xff]  ;;  %v76_v8 = vld [vmem:[%s4377_s0 + $0x220] sm:$0xff]  ;;  %v77_v9 = vld [vmem:[%s4377_s0 + $0x228] sm:$0xff]  ;;  %v1991_v13 = vmax.f32 %v554_v61, %v555_v63  ;;  %v558_v14 = vmax.f32 %v78_v0, %v94_v6 }
  0x1b   :  { %1054 = vrot.lane.b32.xlu1 %v1895_v29, %s1678_s13  ;;  %v92_v10 = vld [vmem:[%s4377_s0 + $0x2a0] sm:$0xff]  ;;  %v93_v11 = vld [vmem:[%s4377_s0 + $0x2a8] sm:$0xff]  ;;  %v559_v15 = vmax.f32 %v79_v1, %v95_v7  ;;  %v82_v17 = vld [vmem:[%s4377_s0 + $0x250] sm:$0xff] }
  0x1c   :  { %v83_v19 = vld [vmem:[%s4377_s0 + $0x258] sm:$0xff]  ;;  %v2001_v20 = vmax.f32 %v552_v4, %v553_v5  ;;  %v556_v21 = vmax.f32 %v76_v8, %v92_v10  ;;  %v557_v23 = vmax.f32 %v77_v9, %v93_v11  ;;  %v98_v24 = vld [vmem:[%s4377_s0 + $0x2d0] sm:$0xff]  ;;  %v80_v26 = vld [vmem:[%s4377_s0 + $0x240] sm:$0xff] }
  0x1d   :  { %1052 = vrot.lane.b32.xlu0 %v1905_v34, %s1678_s13  ;;  %v99_v25 = vld [vmem:[%s4377_s0 + $0x2d8] sm:$0xff]  ;;  %v81_v28 = vld [vmem:[%s4377_s0 + $0x248] sm:$0xff]  ;;  %v96_v30 = vld [vmem:[%s4377_s0 + $0x2c0] sm:$0xff]  ;;  %v2023_v32 = vmax.f32 %v558_v14, %v559_v15  ;;  %v562_v33 = vmax.f32 %v82_v17, %v98_v24 }
  0x1e   :  { %v97_v31 = vld [vmem:[%s4377_s0 + $0x2c8] sm:$0xff]  ;;  %v563_v35 = vmax.f32 %v83_v19, %v99_v25  ;;  %v86_v36 = vld [vmem:[%s4377_s0 + $0x270] sm:$0xff]  ;;  %v87_v38 = vld [vmem:[%s4377_s0 + $0x278] sm:$0xff]  ;;  %v2033_v39 = vmax.f32 %v556_v21, %v557_v23  ;;  %v560_v40 = vmax.f32 %v80_v26, %v96_v30 }
  0x1f   :  { %1058 = vrot.lane.b32.xlu1 %v1927_v44, %s1678_s13  ;;  %v561_v41 = vmax.f32 %v81_v28, %v97_v31  ;;  %v102_v42 = vld [vmem:[%s4377_s0 + $0x2f0] sm:$0xff]  ;;  %v103_v43 = vld [vmem:[%s4377_s0 + $0x2f8] sm:$0xff]  ;;  %v84_v45 = vld [vmem:[%s4377_s0 + $0x260] sm:$0xff] }
  0x20   :  { %v85_v47 = vld [vmem:[%s4377_s0 + $0x268] sm:$0xff]  ;;  %v100_v48 = vld [vmem:[%s4377_s0 + $0x2e0] sm:$0xff]  ;;  %v2055_v51 = vmax.f32 %v562_v33, %v563_v35  ;;  %v566_v53 = vmax.f32 %v86_v36, %v102_v42  ;;  %v567_v54 = vmax.f32 %v87_v38, %v103_v43  ;;  %v106_v55 = vld [vmem:[%s4377_s0 + $0x310] sm:$0xff] }
  0x21   :  { %1056 = vrot.lane.b32.xlu0 %v1937_v50, %s1678_s13  ;;  %v101_v49 = vld [vmem:[%s4377_s0 + $0x2e8] sm:$0xff]  ;;  %v107_v56 = vld [vmem:[%s4377_s0 + $0x318] sm:$0xff]  ;;  %v2065_v57 = vmax.f32 %v560_v40, %v561_v41  ;;  %v564_v58 = vmax.f32 %v84_v45, %v100_v48  ;;  %v122_v61 = vld [vmem:[%s4377_s0 + $0x390] sm:$0xff] }
  0x22   :  { %v565_v59 = vmax.f32 %v85_v47, %v101_v49  ;;  %v123_v63 = vld [vmem:[%s4377_s0 + $0x398] sm:$0xff]  ;;  %v104_v0 = vld [vmem:[%s4377_s0 + $0x300] sm:$0xff]  ;;  %v105_v1 = vld [vmem:[%s4377_s0 + $0x308] sm:$0xff]  ;;  %v2087_v6 = vmax.f32 %v566_v53, %v567_v54  ;;  %v570_v7 = vmax.f32 %v106_v55, %v122_v61 }
  0x23   :  { %1062 = vrot.lane.b32.xlu1 %v1959_v60, %s1678_s13  ;;  %v120_v4 = vld [vmem:[%s4377_s0 + $0x380] sm:$0xff]  ;;  %v121_v5 = vld [vmem:[%s4377_s0 + $0x388] sm:$0xff]  ;;  %v571_v8 = vmax.f32 %v107_v56, %v123_v63  ;;  %v110_v9 = vld [vmem:[%s4377_s0 + $0x330] sm:$0xff] }
  0x24   :  { %v111_v10 = vld [vmem:[%s4377_s0 + $0x338] sm:$0xff]  ;;  %v2097_v11 = vmax.f32 %v564_v58, %v565_v59  ;;  %v568_v14 = vmax.f32 %v104_v0, %v120_v4  ;;  %v569_v15 = vmax.f32 %v105_v1, %v121_v5  ;;  %v126_v17 = vld [vmem:[%s4377_s0 + $0x3b0] sm:$0xff]  ;;  %v108_v21 = vld [vmem:[%s4377_s0 + $0x320] sm:$0xff] }
  0x25   :  { %1060 = vrot.lane.b32.xlu0 %v1969_v2, %s1678_s13  ;;  %v127_v19 = vld [vmem:[%s4377_s0 + $0x3b8] sm:$0xff]  ;;  %v109_v23 = vld [vmem:[%s4377_s0 + $0x328] sm:$0xff]  ;;  %v124_v24 = vld [vmem:[%s4377_s0 + $0x3a0] sm:$0xff]  ;;  %v2119_v26 = vmax.f32 %v570_v7, %v571_v8  ;;  %v574_v28 = vmax.f32 %v110_v9, %v126_v17 }
  0x26   :  { %v125_v25 = vld [vmem:[%s4377_s0 + $0x3a8] sm:$0xff]  ;;  %v575_v30 = vmax.f32 %v111_v10, %v127_v19  ;;  %v114_v31 = vld [vmem:[%s4377_s0 + $0x350] sm:$0xff]  ;;  %v115_v33 = vld [vmem:[%s4377_s0 + $0x358] sm:$0xff]  ;;  %v2129_v35 = vmax.f32 %v568_v14, %v569_v15  ;;  %v572_v36 = vmax.f32 %v108_v21, %v124_v24 }
  0x27   :  { %1066 = vrot.lane.b32.xlu1 %v1991_v13, %s1678_s13  ;;  %v573_v38 = vmax.f32 %v109_v23, %v125_v25  ;;  %v130_v40 = vld [vmem:[%s4377_s0 + $0x3d0] sm:$0xff]  ;;  %v131_v41 = vld [vmem:[%s4377_s0 + $0x3d8] sm:$0xff]  ;;  %v112_v42 = vld [vmem:[%s4377_s0 + $0x340] sm:$0xff] }
  0x28   :  { %v113_v43 = vld [vmem:[%s4377_s0 + $0x348] sm:$0xff]  ;;  %v128_v45 = vld [vmem:[%s4377_s0 + $0x3c0] sm:$0xff]  ;;  %v2151_v48 = vmax.f32 %v574_v28, %v575_v30  ;;  %v578_v49 = vmax.f32 %v114_v31, %v130_v40  ;;  %v579_v53 = vmax.f32 %v115_v33, %v131_v41  ;;  %v118_v54 = vld [vmem:[%s4377_s0 + $0x370] sm:$0xff] }
  0x29   :  { %1064 = vrot.lane.b32.xlu0 %v2001_v20, %s1678_s13  ;;  %v129_v47 = vld [vmem:[%s4377_s0 + $0x3c8] sm:$0xff]  ;;  %v119_v55 = vld [vmem:[%s4377_s0 + $0x378] sm:$0xff]  ;;  %v2161_v56 = vmax.f32 %v572_v36, %v573_v38  ;;  %v576_v58 = vmax.f32 %v112_v42, %v128_v45  ;;  %v134_v61 = vld [vmem:[%s4377_s0 + $0x3f0] sm:$0xff] }
  0x2a   :  { %v577_v59 = vmax.f32 %v113_v43, %v129_v47  ;;  %v135_v63 = vld [vmem:[%s4377_s0 + $0x3f8] sm:$0xff]  ;;  %v116_v0 = vld [vmem:[%s4377_s0 + $0x360] sm:$0xff]  ;;  %v117_v1 = vld [vmem:[%s4377_s0 + $0x368] sm:$0xff]  ;;  %v2183_v7 = vmax.f32 %v578_v49, %v579_v53  ;;  %v582_v8 = vmax.f32 %v118_v54, %v134_v61 }
  0x2b   :  { %1070 = vrot.lane.b32.xlu1 %v2023_v32, %s1678_s13  ;;  %v132_v4 = vld [vmem:[%s4377_s0 + $0x3e0] sm:$0xff]  ;;  %v133_v5 = vld [vmem:[%s4377_s0 + $0x3e8] sm:$0xff]  ;;  %v583_v9 = vmax.f32 %v119_v55, %v135_v63  ;;  %v138_v10 = vld [vmem:[%s4377_s0 + $0x410] sm:$0xff] }
  0x2c   :  { %v139_v14 = vld [vmem:[%s4377_s0 + $0x418] sm:$0xff]  ;;  %v2193_v15 = vmax.f32 %v576_v58, %v577_v59  ;;  %v580_v17 = vmax.f32 %v116_v0, %v132_v4  ;;  %v581_v19 = vmax.f32 %v117_v1, %v133_v5  ;;  %v154_v21 = vld [vmem:[%s4377_s0 + $0x490] sm:$0xff]  ;;  %v136_v24 = vld [vmem:[%s4377_s0 + $0x400] sm:$0xff] }
  0x2d   :  { %1068 = vrot.lane.b32.xlu0 %v2033_v39, %s1678_s13  ;;  %v155_v23 = vld [vmem:[%s4377_s0 + $0x498] sm:$0xff]  ;;  %v137_v25 = vld [vmem:[%s4377_s0 + $0x408] sm:$0xff]  ;;  %v152_v28 = vld [vmem:[%s4377_s0 + $0x480] sm:$0xff]  ;;  %v2215_v31 = vmax.f32 %v582_v8, %v583_v9  ;;  %v586_v33 = vmax.f32 %v138_v10, %v154_v21 }
  0x2e   :  { %v153_v30 = vld [vmem:[%s4377_s0 + $0x488] sm:$0xff]  ;;  %v587_v36 = vmax.f32 %v139_v14, %v155_v23  ;;  %v142_v38 = vld [vmem:[%s4377_s0 + $0x430] sm:$0xff]  ;;  %v143_v40 = vld [vmem:[%s4377_s0 + $0x438] sm:$0xff]  ;;  %v2225_v41 = vmax.f32 %v580_v17, %v581_v19  ;;  %v584_v42 = vmax.f32 %v136_v24, %v152_v28 }
  0x2f   :  { %1074 = vrot.lane.b32.xlu1 %v2055_v51, %s1678_s13  ;;  %v585_v43 = vmax.f32 %v137_v25, %v153_v30  ;;  %v158_v45 = vld [vmem:[%s4377_s0 + $0x4b0] sm:$0xff]  ;;  %v159_v47 = vld [vmem:[%s4377_s0 + $0x4b8] sm:$0xff]  ;;  %v140_v49 = vld [vmem:[%s4377_s0 + $0x420] sm:$0xff] }
  0x30   :  { %v141_v53 = vld [vmem:[%s4377_s0 + $0x428] sm:$0xff]  ;;  %v156_v54 = vld [vmem:[%s4377_s0 + $0x4a0] sm:$0xff]  ;;  %v2247_v58 = vmax.f32 %v586_v33, %v587_v36  ;;  %v590_v59 = vmax.f32 %v142_v38, %v158_v45  ;;  %v591_v61 = vmax.f32 %v143_v40, %v159_v47  ;;  %v146_v63 = vld [vmem:[%s4377_s0 + $0x450] sm:$0xff] }
  0x31   :  { %1072 = vrot.lane.b32.xlu0 %v2065_v57, %s1678_s13  ;;  %v157_v55 = vld [vmem:[%s4377_s0 + $0x4a8] sm:$0xff]  ;;  %v147_v0 = vld [vmem:[%s4377_s0 + $0x458] sm:$0xff]  ;;  %v2257_v1 = vmax.f32 %v584_v42, %v585_v43  ;;  %v588_v4 = vmax.f32 %v140_v49, %v156_v54  ;;  %v162_v8 = vld [vmem:[%s4377_s0 + $0x4d0] sm:$0xff] }
  0x32   :  { %v589_v5 = vmax.f32 %v141_v53, %v157_v55  ;;  %v163_v9 = vld [vmem:[%s4377_s0 + $0x4d8] sm:$0xff]  ;;  %v144_v10 = vld [vmem:[%s4377_s0 + $0x440] sm:$0xff]  ;;  %v145_v14 = vld [vmem:[%s4377_s0 + $0x448] sm:$0xff]  ;;  %v2279_v21 = vmax.f32 %v590_v59, %v591_v61  ;;  %v594_v23 = vmax.f32 %v146_v63, %v162_v8 }
  0x33   :  { %1078 = vrot.lane.b32.xlu1 %v2087_v6, %s1678_s13  ;;  %v160_v17 = vld [vmem:[%s4377_s0 + $0x4c0] sm:$0xff]  ;;  %v161_v19 = vld [vmem:[%s4377_s0 + $0x4c8] sm:$0xff]  ;;  %v595_v24 = vmax.f32 %v147_v0, %v163_v9  ;;  %v150_v25 = vld [vmem:[%s4377_s0 + $0x470] sm:$0xff] }
  0x34   :  { %v151_v28 = vld [vmem:[%s4377_s0 + $0x478] sm:$0xff]  ;;  %v2289_v30 = vmax.f32 %v588_v4, %v589_v5  ;;  %v592_v33 = vmax.f32 %v144_v10, %v160_v17  ;;  %v593_v36 = vmax.f32 %v145_v14, %v161_v19  ;;  %v166_v38 = vld [vmem:[%s4377_s0 + $0x4f0] sm:$0xff]  ;;  %v148_v42 = vld [vmem:[%s4377_s0 + $0x460] sm:$0xff] }
  0x35   :  { %1076 = vrot.lane.b32.xlu0 %v2097_v11, %s1678_s13  ;;  %v167_v40 = vld [vmem:[%s4377_s0 + $0x4f8] sm:$0xff]  ;;  %v149_v43 = vld [vmem:[%s4377_s0 + $0x468] sm:$0xff]  ;;  %v164_v45 = vld [vmem:[%s4377_s0 + $0x4e0] sm:$0xff]  ;;  %v2311_v49 = vmax.f32 %v594_v23, %v595_v24  ;;  %v598_v53 = vmax.f32 %v150_v25, %v166_v38 }
  0x36   :  { %v165_v47 = vld [vmem:[%s4377_s0 + $0x4e8] sm:$0xff]  ;;  %v599_v54 = vmax.f32 %v151_v28, %v167_v40  ;;  %v170_v55 = vld [vmem:[%s4377_s0 + $0x510] sm:$0xff]  ;;  %v171_v59 = vld [vmem:[%s4377_s0 + $0x518] sm:$0xff]  ;;  %v2321_v61 = vmax.f32 %v592_v33, %v593_v36  ;;  %v596_v63 = vmax.f32 %v148_v42, %v164_v45 }
  0x37   :  { %1082 = vrot.lane.b32.xlu1 %v2119_v26, %s1678_s13  ;;  %v597_v0 = vmax.f32 %v149_v43, %v165_v47  ;;  %v186_v4 = vld [vmem:[%s4377_s0 + $0x590] sm:$0xff]  ;;  %v187_v5 = vld [vmem:[%s4377_s0 + $0x598] sm:$0xff]  ;;  %v168_v8 = vld [vmem:[%s4377_s0 + $0x500] sm:$0xff] }
  0x38   :  { %v169_v9 = vld [vmem:[%s4377_s0 + $0x508] sm:$0xff]  ;;  %v184_v10 = vld [vmem:[%s4377_s0 + $0x580] sm:$0xff]  ;;  %v2343_v17 = vmax.f32 %v598_v53, %v599_v54  ;;  %v602_v19 = vmax.f32 %v170_v55, %v186_v4  ;;  %v603_v23 = vmax.f32 %v171_v59, %v187_v5  ;;  %v174_v24 = vld [vmem:[%s4377_s0 + $0x530] sm:$0xff] }
  0x39   :  { %1080 = vrot.lane.b32.xlu0 %v2129_v35, %s1678_s13  ;;  %v185_v14 = vld [vmem:[%s4377_s0 + $0x588] sm:$0xff]  ;;  %v175_v25 = vld [vmem:[%s4377_s0 + $0x538] sm:$0xff]  ;;  %v2353_v28 = vmax.f32 %v596_v63, %v597_v0  ;;  %v600_v33 = vmax.f32 %v168_v8, %v184_v10  ;;  %v190_v38 = vld [vmem:[%s4377_s0 + $0x5b0] sm:$0xff] }
  0x3a   :  { %v601_v36 = vmax.f32 %v169_v9, %v185_v14  ;;  %v191_v40 = vld [vmem:[%s4377_s0 + $0x5b8] sm:$0xff]  ;;  %v172_v42 = vld [vmem:[%s4377_s0 + $0x520] sm:$0xff]  ;;  %v173_v43 = vld [vmem:[%s4377_s0 + $0x528] sm:$0xff]  ;;  %v2375_v53 = vmax.f32 %v602_v19, %v603_v23  ;;  %v606_v54 = vmax.f32 %v174_v24, %v190_v38 }
  0x3b   :  { %1086 = vrot.lane.b32.xlu1 %v2151_v48, %s1678_s13  ;;  %v188_v45 = vld [vmem:[%s4377_s0 + $0x5a0] sm:$0xff]  ;;  %v189_v47 = vld [vmem:[%s4377_s0 + $0x5a8] sm:$0xff]  ;;  %v607_v55 = vmax.f32 %v175_v25, %v191_v40  ;;  %v178_v59 = vld [vmem:[%s4377_s0 + $0x550] sm:$0xff] }
  0x3c   :  { %v179_v63 = vld [vmem:[%s4377_s0 + $0x558] sm:$0xff]  ;;  %v2385_v0 = vmax.f32 %v600_v33, %v601_v36  ;;  %v604_v4 = vmax.f32 %v172_v42, %v188_v45  ;;  %v605_v5 = vmax.f32 %v173_v43, %v189_v47  ;;  %v194_v8 = vld [vmem:[%s4377_s0 + $0x5d0] sm:$0xff]  ;;  %v176_v10 = vld [vmem:[%s4377_s0 + $0x540] sm:$0xff] }
  0x3d   :  { %1084 = vrot.lane.b32.xlu0 %v2161_v56, %s1678_s13  ;;  %v195_v9 = vld [vmem:[%s4377_s0 + $0x5d8] sm:$0xff]  ;;  %v177_v14 = vld [vmem:[%s4377_s0 + $0x548] sm:$0xff]  ;;  %v192_v19 = vld [vmem:[%s4377_s0 + $0x5c0] sm:$0xff]  ;;  %v2407_v24 = vmax.f32 %v606_v54, %v607_v55  ;;  %v610_v25 = vmax.f32 %v178_v59, %v194_v8 }
  0x3e   :  { %4413 = vst [vmem:[#allocation2_spill] sm:$0xff] %v2385_v0  ;;  %v193_v23 = vld [vmem:[%s4377_s0 + $0x5c8] sm:$0xff]  ;;  %v611_v33 = vmax.f32 %v179_v63, %v195_v9  ;;  %v182_v36 = vld [vmem:[%s4377_s0 + $0x570] sm:$0xff]  ;;  %v183_v38 = vld [vmem:[%s4377_s0 + $0x578] sm:$0xff]  ;;  %v2417_v40 = vmax.f32 %v604_v4, %v605_v5  ;;  %v608_v42 = vmax.f32 %v176_v10, %v192_v19 }
  0x3f   :  { %1090 = vrot.lane.b32.xlu1 %v2183_v7, %s1678_s13  ;;  %4414 = vst [vmem:[#allocation3_spill] sm:$0xff] %v2407_v24  ;;  %v609_v43 = vmax.f32 %v177_v14, %v193_v23  ;;  %v198_v45 = vld [vmem:[%s4377_s0 + $0x5f0] sm:$0xff]  ;;  %v199_v47 = vld [vmem:[%s4377_s0 + $0x5f8] sm:$0xff]  ;;  %v180_v54 = vld [vmem:[%s4377_s0 + $0x560] sm:$0xff] }
  0x40   :  { %4415 = vst [vmem:[#allocation4_spill] sm:$0xff] %v2417_v40  ;;  %v181_v55 = vld [vmem:[%s4377_s0 + $0x568] sm:$0xff]  ;;  %v196_v59 = vld [vmem:[%s4377_s0 + $0x5e0] sm:$0xff]  ;;  %v2439_v4 = vmax.f32 %v610_v25, %v611_v33  ;;  %v614_v5 = vmax.f32 %v182_v36, %v198_v45  ;;  %v615_v8 = vmax.f32 %v183_v38, %v199_v47  ;;  %v202_v9 = vld [vmem:[%s4377_s0 + $0x610] sm:$0xff] }
  0x41   :  { %1088 = vrot.lane.b32.xlu0 %v2193_v15, %s1678_s13  ;;  %v197_v63 = vld [vmem:[%s4377_s0 + $0x5e8] sm:$0xff]  ;;  %v203_v10 = vld [vmem:[%s4377_s0 + $0x618] sm:$0xff]  ;;  %v2449_v14 = vmax.f32 %v608_v42, %v609_v43  ;;  %v612_v19 = vmax.f32 %v180_v54, %v196_v59  ;;  %v218_v25 = vld [vmem:[%s4377_s0 + $0x690] sm:$0xff] }
  0x42   :  { %4416 = vst [vmem:[#allocation5_spill] sm:$0xff] %v2439_v4  ;;  %v613_v23 = vmax.f32 %v181_v55, %v197_v63  ;;  %v219_v33 = vld [vmem:[%s4377_s0 + $0x698] sm:$0xff]  ;;  %v200_v36 = vld [vmem:[%s4377_s0 + $0x600] sm:$0xff]  ;;  %v201_v38 = vld [vmem:[%s4377_s0 + $0x608] sm:$0xff]  ;;  %v2471_v45 = vmax.f32 %v614_v5, %v615_v8  ;;  %v618_v47 = vmax.f32 %v202_v9, %v218_v25 }
  0x43   :  { %1094 = vrot.lane.b32.xlu1 %v2215_v31, %s1678_s13  ;;  %4417 = vst [vmem:[#allocation6_spill] sm:$0xff] %v2449_v14  ;;  %v216_v42 = vld [vmem:[%s4377_s0 + $0x680] sm:$0xff]  ;;  %v217_v43 = vld [vmem:[%s4377_s0 + $0x688] sm:$0xff]  ;;  %v619_v54 = vmax.f32 %v203_v10, %v219_v33  ;;  %v206_v55 = vld [vmem:[%s4377_s0 + $0x630] sm:$0xff] }
  0x44   :  { %4418 = vst [vmem:[#allocation7_spill] sm:$0xff] %v2471_v45  ;;  %v207_v59 = vld [vmem:[%s4377_s0 + $0x638] sm:$0xff]  ;;  %v2481_v63 = vmax.f32 %v612_v19, %v613_v23  ;;  %v222_v5 = vld [vmem:[%s4377_s0 + $0x6b0] sm:$0xff]  ;;  %v204_v9 = vld [vmem:[%s4377_s0 + $0x620] sm:$0xff] }
  0x45   :  { %1092 = vrot.lane.b32.xlu0 %v2225_v41, %s1678_s13  ;;  %v223_v8 = vld [vmem:[%s4377_s0 + $0x6b8] sm:$0xff]  ;;  %v205_v10 = vld [vmem:[%s4377_s0 + $0x628] sm:$0xff]  ;;  %v220_v19 = vld [vmem:[%s4377_s0 + $0x6a0] sm:$0xff]  ;;  %v2503_v25 = vmax.f32 %v618_v47, %v619_v54  ;;  %v622_v33 = vmax.f32 %v206_v55, %v222_v5 }
  0x46   :  { %4419 = vst [vmem:[#allocation8_spill] sm:$0xff] %v2481_v63  ;;  %v221_v23 = vld [vmem:[%s4377_s0 + $0x6a8] sm:$0xff]  ;;  %v226_v47 = vld [vmem:[%s4377_s0 + $0x6d0] sm:$0xff]  ;;  %v227_v54 = vld [vmem:[%s4377_s0 + $0x6d8] sm:$0xff] }
  0x47   :  { %1098 = vrot.lane.b32.xlu1 %v2247_v58, %s1678_s13  ;;  %4420 = vst [vmem:[#allocation9_spill] sm:$0xff] %v2503_v25  ;;  %v208_v55 = vld [vmem:[%s4377_s0 + $0x640] sm:$0xff] }
  0x49   :  { %1096 = vrot.lane.b32.xlu0 %v2257_v1, %s1678_s13 }
  0x4b   :  { %1102 = vrot.lane.b32.xlu1 %v2279_v21, %s1678_s13 }
  0x4d   :  { %1100 = vrot.lane.b32.xlu0 %v2289_v30, %s1678_s13 }
  0x4f   :  { %1106 = vrot.lane.b32.xlu1 %v2311_v49, %s1678_s13 }
  0x51   :  { %1104 = vrot.lane.b32.xlu0 %v2321_v61, %s1678_s13 }
  0x53   :  { %1110 = vrot.lane.b32.xlu1 %v2343_v17, %s1678_s13 }
  0x55   :  { %1108 = vrot.lane.b32.xlu0 %v2353_v28, %s1678_s13 }
  0x57   :  { %1114 = vrot.lane.b32.xlu1 %v2375_v53, %s1678_s13 }
  0x59   :  { %1112 = vrot.lane.b32.xlu0 %v2385_v0, %s1678_s13  ;;  %v267_v0 = vld [vmem:[%s4377_s0 + $0x818] sm:$0xff] }
  0x5b   :  { %1118 = vrot.lane.b32.xlu1 %v2407_v24, %s1678_s13  ;;  %v617_v24 = vmax.f32 %v201_v38, %v217_v43  ;;  %v210_v38 = vld [vmem:[%s4377_s0 + $0x650] sm:$0xff] }
  0x5d   :  { %1116 = vrot.lane.b32.xlu0 %v2417_v40, %s1678_s13  ;;  %v616_v40 = vmax.f32 %v200_v36, %v216_v42  ;;  %v623_v36 = vmax.f32 %v207_v59, %v223_v8  ;;  %v211_v42 = vld [vmem:[%s4377_s0 + $0x658] sm:$0xff]  ;;  %v209_v59 = vld [vmem:[%s4377_s0 + $0x648] sm:$0xff]  ;;  %v626_v8 = vmax.f32 %v210_v38, %v226_v47  ;;  %v212_v38 = vld [vmem:[%s4377_s0 + $0x660] sm:$0xff] }
  0x5f   :  { %1122 = vrot.lane.b32.xlu1 %v2439_v4, %s1678_s13  ;;  %v2513_v43 = vmax.f32 %v616_v40, %v617_v24  ;;  %v621_v4 = vmax.f32 %v205_v10, %v221_v23  ;;  %v224_v24 = vld [vmem:[%s4377_s0 + $0x6c0] sm:$0xff]  ;;  %v225_v40 = vld [vmem:[%s4377_s0 + $0x6c8] sm:$0xff]  ;;  %v2535_v5 = vmax.f32 %v622_v33, %v623_v36  ;;  %v214_v10 = vld [vmem:[%s4377_s0 + $0x670] sm:$0xff] }
  0x60   :  { %v230_v33 = vld [vmem:[%s4377_s0 + $0x6f0] sm:$0xff]  ;;  %v231_v36 = vld [vmem:[%s4377_s0 + $0x6f8] sm:$0xff] }
  0x61   :  { %1120 = vrot.lane.b32.xlu0 %v2449_v14, %s1678_s13  ;;  %4421 = vst [vmem:[#allocation10_spill] sm:$0xff] %v2513_v43  ;;  %v620_v14 = vmax.f32 %v204_v9, %v220_v19  ;;  %4422 = vst [vmem:[#allocation11_spill] sm:$0xff] %v2535_v5  ;;  %v627_v9 = vmax.f32 %v211_v42, %v227_v54  ;;  %v215_v19 = vld [vmem:[%s4377_s0 + $0x678] sm:$0xff]  ;;  %v213_v42 = vld [vmem:[%s4377_s0 + $0x668] sm:$0xff]  ;;  %v630_v54 = vmax.f32 %v214_v10, %v230_v33 }
  0x62   :  { %v232_v10 = vld [vmem:[%s4377_s0 + $0x700] sm:$0xff] }
  0x63   :  { %1126 = vrot.lane.b32.xlu1 %v2471_v45, %s1678_s13  ;;  %v2545_v23 = vmax.f32 %v620_v14, %v621_v4  ;;  %v625_v45 = vmax.f32 %v209_v59, %v225_v40  ;;  %v228_v4 = vld [vmem:[%s4377_s0 + $0x6e0] sm:$0xff]  ;;  %v229_v14 = vld [vmem:[%s4377_s0 + $0x6e8] sm:$0xff]  ;;  %v2567_v47 = vmax.f32 %v626_v8, %v627_v9  ;;  %v234_v59 = vld [vmem:[%s4377_s0 + $0x710] sm:$0xff] }
  0x64   :  { %v250_v8 = vld [vmem:[%s4377_s0 + $0x790] sm:$0xff]  ;;  %v251_v9 = vld [vmem:[%s4377_s0 + $0x798] sm:$0xff] }
  0x65   :  { %1124 = vrot.lane.b32.xlu0 %v2481_v63, %s1678_s13  ;;  %4423 = vst [vmem:[#allocation12_spill] sm:$0xff] %v2545_v23  ;;  %v624_v63 = vmax.f32 %v208_v55, %v224_v24  ;;  %4424 = vst [vmem:[#allocation13_spill] sm:$0xff] %v2567_v47  ;;  %v631_v55 = vmax.f32 %v215_v19, %v231_v36  ;;  %v235_v24 = vld [vmem:[%s4377_s0 + $0x718] sm:$0xff]  ;;  %v233_v19 = vld [vmem:[%s4377_s0 + $0x708] sm:$0xff]  ;;  %v634_v36 = vmax.f32 %v234_v59, %v250_v8 }
  0x66   :  { %v236_v59 = vld [vmem:[%s4377_s0 + $0x720] sm:$0xff] }
  0x67   :  { %1130 = vrot.lane.b32.xlu1 %v2503_v25, %s1678_s13  ;;  %v2577_v40 = vmax.f32 %v624_v63, %v625_v45  ;;  %v629_v25 = vmax.f32 %v213_v42, %v229_v14  ;;  %v248_v45 = vld [vmem:[%s4377_s0 + $0x780] sm:$0xff]  ;;  %v249_v63 = vld [vmem:[%s4377_s0 + $0x788] sm:$0xff]  ;;  %v2599_v33 = vmax.f32 %v630_v54, %v631_v55  ;;  %v238_v42 = vld [vmem:[%s4377_s0 + $0x730] sm:$0xff] }
  0x68   :  { %v254_v54 = vld [vmem:[%s4377_s0 + $0x7b0] sm:$0xff]  ;;  %v255_v55 = vld [vmem:[%s4377_s0 + $0x7b8] sm:$0xff] }
  0x69   :  { %1128 = vrot.lane.b32.xlu0 %v2513_v43, %s1678_s13  ;;  %4425 = vst [vmem:[#allocation14_spill] sm:$0xff] %v2577_v40  ;;  %v628_v43 = vmax.f32 %v212_v38, %v228_v4  ;;  %4426 = vst [vmem:[#allocation15_spill] sm:$0xff] %v2599_v33  ;;  %v635_v38 = vmax.f32 %v235_v24, %v251_v9  ;;  %v239_v4 = vld [vmem:[%s4377_s0 + $0x738] sm:$0xff]  ;;  %v237_v24 = vld [vmem:[%s4377_s0 + $0x728] sm:$0xff]  ;;  %v638_v9 = vmax.f32 %v238_v42, %v254_v54 }
  0x6a   :  { %v240_v42 = vld [vmem:[%s4377_s0 + $0x740] sm:$0xff] }
  0x6b   :  { %1134 = vrot.lane.b32.xlu1 %v2535_v5, %s1678_s13  ;;  %v2609_v14 = vmax.f32 %v628_v43, %v629_v25  ;;  %v633_v5 = vmax.f32 %v233_v19, %v249_v63  ;;  %v252_v25 = vld [vmem:[%s4377_s0 + $0x7a0] sm:$0xff]  ;;  %v253_v43 = vld [vmem:[%s4377_s0 + $0x7a8] sm:$0xff]  ;;  %v2631_v8 = vmax.f32 %v634_v36, %v635_v38  ;;  %v242_v19 = vld [vmem:[%s4377_s0 + $0x750] sm:$0xff] }
  0x6c   :  { %v258_v36 = vld [vmem:[%s4377_s0 + $0x7d0] sm:$0xff]  ;;  %v259_v38 = vld [vmem:[%s4377_s0 + $0x7d8] sm:$0xff] }
  0x6d   :  { %1132 = vrot.lane.b32.xlu0 %v2545_v23, %s1678_s13  ;;  %4427 = vst [vmem:[#allocation16_spill] sm:$0xff] %v2609_v14  ;;  %v632_v23 = vmax.f32 %v232_v10, %v248_v45  ;;  %4428 = vst [vmem:[#allocation17_spill] sm:$0xff] %v2631_v8  ;;  %v639_v10 = vmax.f32 %v239_v4, %v255_v55  ;;  %v243_v45 = vld [vmem:[%s4377_s0 + $0x758] sm:$0xff]  ;;  %v241_v4 = vld [vmem:[%s4377_s0 + $0x748] sm:$0xff]  ;;  %v642_v55 = vmax.f32 %v242_v19, %v258_v36 }
  0x6e   :  { %v244_v19 = vld [vmem:[%s4377_s0 + $0x760] sm:$0xff]  ;;  %v261_v36 = vld [vmem:[%s4377_s0 + $0x7e8] sm:$0xff] }
  0x6f   :  { %1138 = vrot.lane.b32.xlu1 %v2567_v47, %s1678_s13  ;;  %v2641_v63 = vmax.f32 %v632_v23, %v633_v5  ;;  %v637_v47 = vmax.f32 %v237_v24, %v253_v43  ;;  %v256_v5 = vld [vmem:[%s4377_s0 + $0x7c0] sm:$0xff]  ;;  %v257_v23 = vld [vmem:[%s4377_s0 + $0x7c8] sm:$0xff]  ;;  %v2663_v54 = vmax.f32 %v638_v9, %v639_v10  ;;  %v246_v24 = vld [vmem:[%s4377_s0 + $0x770] sm:$0xff] }
  0x70   :  { %v262_v9 = vld [vmem:[%s4377_s0 + $0x7f0] sm:$0xff]  ;;  %v263_v10 = vld [vmem:[%s4377_s0 + $0x7f8] sm:$0xff] }
  0x71   :  { %1136 = vrot.lane.b32.xlu0 %v2577_v40, %s1678_s13  ;;  %4429 = vst [vmem:[#allocation18_spill] sm:$0xff] %v2641_v63  ;;  %v636_v40 = vmax.f32 %v236_v59, %v252_v25  ;;  %v643_v59 = vmax.f32 %v243_v45, %v259_v38  ;;  %v247_v25 = vld [vmem:[%s4377_s0 + $0x778] sm:$0xff] }
  0x73   :  { %1142 = vrot.lane.b32.xlu1 %v2599_v33, %s1678_s13  ;;  %v2673_v43 = vmax.f32 %v636_v40, %v637_v47  ;;  %v641_v33 = vmax.f32 %v241_v4, %v257_v23  ;;  %v245_v47 = vld [vmem:[%s4377_s0 + $0x768] sm:$0xff]  ;;  %v260_v40 = vld [vmem:[%s4377_s0 + $0x7e0] sm:$0xff]  ;;  %v646_v23 = vmax.f32 %v246_v24, %v262_v9  ;;  %v283_v24 = vld [vmem:[%s4377_s0 + $0x898] sm:$0xff] }
  0x74   :  { %v280_v9 = vld [vmem:[%s4377_s0 + $0x880] sm:$0xff] }
  0x75   :  { %1140 = vrot.lane.b32.xlu0 %v2609_v14, %s1678_s13  ;;  %v640_v14 = vmax.f32 %v240_v42, %v256_v5  ;;  %v2697_v5 = vmax.f32 %v642_v55, %v643_v59  ;;  %v645_v55 = vmax.f32 %v245_v47, %v261_v36  ;;  %v282_v59 = vld [vmem:[%s4377_s0 + $0x890] sm:$0xff] }
  0x77   :  { %1146 = vrot.lane.b32.xlu1 %v2631_v8, %s1678_s13  ;;  %v266_v8 = vld [vmem:[%s4377_s0 + $0x810] sm:$0xff] }
  0x78   :  { %v650_v36 = vmax.f32 %v266_v8, %v282_v59  ;;  %v286_v8 = vld [vmem:[%s4377_s0 + $0x8b0] sm:$0xff]  ;;  %v284_v59 = vld [vmem:[%s4377_s0 + $0x8a0] sm:$0xff] }
  0x79   :  { %1144 = vrot.lane.b32.xlu0 %v2641_v63, %s1678_s13  ;;  %v1037_v45 = vpop.permute.xlu1 %1036  ;;  %v647_v63 = vmax.f32 %v247_v25, %v263_v10  ;;  %v264_v25 = vld [vmem:[%s4377_s0 + $0x800] sm:$0xff]  ;;  %v281_v10 = vld [vmem:[%s4377_s0 + $0x888] sm:$0xff] }
  0x7a   :  { %v1418_v38 = vmax.f32 %v1725_v16, %v1037_v45  ;;  %v2711_v16 = vmax.f32 %v640_v14, %v641_v33  ;;  %v265_v14 = vld [vmem:[%s4377_s0 + $0x808] sm:$0xff] }
  0x7b   :  { %v1033_v42 = vpop.permute.xlu0 %1032  ;;  %1150 = vrot.lane.b32.xlu1 %v2663_v54, %s1678_s13 }
  0x7c   :  { %v1416_v4 = vmax.f32 %v1736_v22, %v1033_v42  ;;  %1547 = vst.msk [vmem:[%s4378_s1 + $0x10] sm:$0xff] %vm1544_vm0, %v1418_v38  ;;  %v644_v22 = vmax.f32 %v244_v19, %v260_v40  ;;  %v2739_v40 = vmax.f32 %v646_v23, %v647_v63  ;;  %v651_v38 = vmax.f32 %v267_v0, %v283_v24  ;;  %v270_v42 = vld [vmem:[%s4377_s0 + $0x830] sm:$0xff]  ;;  %v287_v63 = vld [vmem:[%s4377_s0 + $0x8b8] sm:$0xff]  ;;  %v268_v23 = vld [vmem:[%s4377_s0 + $0x820] sm:$0xff] }
  0x7d   :  { %1148 = vrot.lane.b32.xlu0 %v2673_v43, %s1678_s13  ;;  %v1039_v33 = vpop.permute.xlu1 %1038  ;;  %v649_v0 = vmax.f32 %v265_v14, %v281_v10  ;;  %v285_v24 = vld [vmem:[%s4377_s0 + $0x8a8] sm:$0xff]  ;;  %v654_v10 = vmax.f32 %v270_v42, %v286_v8  ;;  %v291_v42 = vld [vmem:[%s4377_s0 + $0x8d8] sm:$0xff]  ;;  %v288_v8 = vld [vmem:[%s4377_s0 + $0x8c0] sm:$0xff] }
  0x7e   :  { %1545 = vst.msk [vmem:[%s4378_s1] sm:$0xff] %vm1544_vm0, %v1416_v4  ;;  %v1419_v19 = vmax.f32 %v1749_v27, %v1039_v33  ;;  %v271_v4 = vld [vmem:[%s4377_s0 + $0x838] sm:$0xff]  ;;  %v2753_v27 = vmax.f32 %v644_v22, %v645_v55  ;;  %v269_v55 = vld [vmem:[%s4377_s0 + $0x828] sm:$0xff] }
  0x7f   :  { %v1035_v45 = vpop.permute.xlu0 %1034  ;;  %1154 = vrot.lane.b32.xlu1 %v2697_v5, %s1678_s13 }
  0x80   :  { %v1417_v47 = vmax.f32 %v1771_v37, %v1035_v45  ;;  %1548 = vst.msk [vmem:[%s4378_s1 + $0x18] sm:$0xff] %vm1544_vm0, %v1419_v19  ;;  %v648_v37 = vmax.f32 %v264_v25, %v280_v9  ;;  %v2781_v9 = vmax.f32 %v650_v36, %v651_v38  ;;  %v655_v19 = vmax.f32 %v271_v4, %v287_v63  ;;  %v274_v45 = vld [vmem:[%s4377_s0 + $0x850] sm:$0xff]  ;;  %v272_v4 = vld [vmem:[%s4377_s0 + $0x840] sm:$0xff]  ;;  %v289_v63 = vld [vmem:[%s4377_s0 + $0x8c8] sm:$0xff] }
  0x81   :  { %1152 = vrot.lane.b32.xlu0 %v2711_v16, %s1678_s13  ;;  %v1043_v22 = vpop.permute.xlu1 %1042  ;;  %v653_v36 = vmax.f32 %v269_v55, %v285_v24  ;;  %v290_v38 = vld [vmem:[%s4377_s0 + $0x8d0] sm:$0xff] }
  0x82   :  { %1546 = vst.msk [vmem:[%s4378_s1 + $0x8] sm:$0xff] %vm1544_vm0, %v1417_v47  ;;  %v1421_v25 = vmax.f32 %v1793_v46, %v1043_v22  ;;  %v275_v47 = vld [vmem:[%s4377_s0 + $0x858] sm:$0xff]  ;;  %v2795_v46 = vmax.f32 %v648_v37, %v649_v0  ;;  %v273_v0 = vld [vmem:[%s4377_s0 + $0x848] sm:$0xff]  ;;  %v658_v24 = vmax.f32 %v274_v45, %v290_v38  ;;  %v292_v38 = vld [vmem:[%s4377_s0 + $0x8e0] sm:$0xff] }
  0x83   :  { %v1041_v33 = vpop.permute.xlu0 %1040  ;;  %1158 = vrot.lane.b32.xlu1 %v2739_v40, %s1678_s13  ;;  %v295_v45 = vld [vmem:[%s4377_s0 + $0x8f8] sm:$0xff] }
  0x84   :  { %v1420_v14 = vmax.f32 %v1806_v52, %v1041_v33  ;;  %1550 = vst.msk [vmem:[%s4378_s1 + $0x28] sm:$0xff] %vm1544_vm0, %v1421_v25  ;;  %v652_v52 = vmax.f32 %v268_v23, %v284_v59  ;;  %v2823_v59 = vmax.f32 %v654_v10, %v655_v19  ;;  %v659_v25 = vmax.f32 %v275_v47, %v291_v42  ;;  %v278_v33 = vld [vmem:[%s4377_s0 + $0x870] sm:$0xff]  ;;  %v276_v47 = vld [vmem:[%s4377_s0 + $0x860] sm:$0xff]  ;;  %v293_v42 = vld [vmem:[%s4377_s0 + $0x8e8] sm:$0xff] }
  0x85   :  { %1156 = vrot.lane.b32.xlu0 %v2753_v27, %s1678_s13  ;;  %v1047_v37 = vpop.permute.xlu1 %1046  ;;  %v657_v10 = vmax.f32 %v273_v0, %v289_v63  ;;  %v294_v19 = vld [vmem:[%s4377_s0 + $0x8f0] sm:$0xff] }
  0x86   :  { %1549 = vst.msk [vmem:[%s4378_s1 + $0x20] sm:$0xff] %vm1544_vm0, %v1420_v14  ;;  %v1423_v23 = vmax.f32 %v1831_v62, %v1047_v37  ;;  %v279_v14 = vld [vmem:[%s4377_s0 + $0x878] sm:$0xff]  ;;  %v2837_v62 = vmax.f32 %v652_v52, %v653_v36  ;;  %v277_v36 = vld [vmem:[%s4377_s0 + $0x868] sm:$0xff]  ;;  %v662_v63 = vmax.f32 %v278_v33, %v294_v19  ;;  %v312_v19 = vld [vmem:[%s4377_s0 + $0x980] sm:$0xff] }
  0x87   :  { %v1045_v22 = vpop.permute.xlu0 %1044  ;;  %1162 = vrot.lane.b32.xlu1 %v2781_v9, %s1678_s13  ;;  %v315_v33 = vld [vmem:[%s4377_s0 + $0x998] sm:$0xff] }
  0x88   :  { %v1422_v55 = vmax.f32 %v1841_v3, %v1045_v22  ;;  %1552 = vst.msk [vmem:[%s4378_s1 + $0x38] sm:$0xff] %vm1544_vm0, %v1423_v23  ;;  %v656_v3 = vmax.f32 %v272_v4, %v288_v8  ;;  %v2865_v8 = vmax.f32 %v658_v24, %v659_v25  ;;  %v663_v23 = vmax.f32 %v279_v14, %v295_v45  ;;  %v298_v22 = vld [vmem:[%s4377_s0 + $0x910] sm:$0xff]  ;;  %v296_v14 = vld [vmem:[%s4377_s0 + $0x900] sm:$0xff]  ;;  %v313_v45 = vld [vmem:[%s4377_s0 + $0x988] sm:$0xff] }
  0x89   :  { %1160 = vrot.lane.b32.xlu0 %v2795_v46, %s1678_s13  ;;  %v1051_v52 = vpop.permute.xlu1 %1050  ;;  %v661_v24 = vmax.f32 %v277_v36, %v293_v42  ;;  %v314_v25 = vld [vmem:[%s4377_s0 + $0x990] sm:$0xff] }
  0x8a   :  { %1551 = vst.msk [vmem:[%s4378_s1 + $0x30] sm:$0xff] %vm1544_vm0, %v1422_v55  ;;  %v1425_v4 = vmax.f32 %v1863_v12, %v1051_v52  ;;  %v299_v55 = vld [vmem:[%s4377_s0 + $0x918] sm:$0xff]  ;;  %v2879_v12 = vmax.f32 %v656_v3, %v657_v10  ;;  %v297_v10 = vld [vmem:[%s4377_s0 + $0x908] sm:$0xff]  ;;  %v666_v42 = vmax.f32 %v298_v22, %v314_v25  ;;  %v316_v25 = vld [vmem:[%s4377_s0 + $0x9a0] sm:$0xff] }
  0x8b   :  { %v1049_v37 = vpop.permute.xlu0 %1048  ;;  %1166 = vrot.lane.b32.xlu1 %v2823_v59, %s1678_s13  ;;  %v319_v22 = vld [vmem:[%s4377_s0 + $0x9b8] sm:$0xff] }
  0x8c   :  { %v1424_v0 = vmax.f32 %v1873_v18, %v1049_v37  ;;  %1554 = vst.msk [vmem:[%s4378_s1 + $0x48] sm:$0xff] %vm1544_vm0, %v1425_v4  ;;  %v660_v18 = vmax.f32 %v276_v47, %v292_v38  ;;  %v2907_v38 = vmax.f32 %v662_v63, %v663_v23  ;;  %v667_v4 = vmax.f32 %v299_v55, %v315_v33  ;;  %v302_v37 = vld [vmem:[%s4377_s0 + $0x930] sm:$0xff]  ;;  %v300_v55 = vld [vmem:[%s4377_s0 + $0x920] sm:$0xff]  ;;  %v317_v33 = vld [vmem:[%s4377_s0 + $0x9a8] sm:$0xff] }
  0x8d   :  { %1164 = vrot.lane.b32.xlu0 %v2837_v62, %s1678_s13  ;;  %v1055_v3 = vpop.permute.xlu1 %1054  ;;  %v665_v63 = vmax.f32 %v297_v10, %v313_v45  ;;  %v318_v23 = vld [vmem:[%s4377_s0 + $0x9b0] sm:$0xff] }
  0x8e   :  { %1553 = vst.msk [vmem:[%s4378_s1 + $0x40] sm:$0xff] %vm1544_vm0, %v1424_v0  ;;  %v1427_v47 = vmax.f32 %v1895_v29, %v1055_v3  ;;  %v303_v0 = vld [vmem:[%s4377_s0 + $0x938] sm:$0xff]  ;;  %v2921_v29 = vmax.f32 %v660_v18, %v661_v24  ;;  %v301_v24 = vld [vmem:[%s4377_s0 + $0x928] sm:$0xff]  ;;  %v670_v45 = vmax.f32 %v302_v37, %v318_v23  ;;  %v320_v23 = vld [vmem:[%s4377_s0 + $0x9c0] sm:$0xff] }
  0x8f   :  { %v1053_v52 = vpop.permute.xlu0 %1052  ;;  %1170 = vrot.lane.b32.xlu1 %v2865_v8, %s1678_s13  ;;  %v323_v37 = vld [vmem:[%s4377_s0 + $0x9d8] sm:$0xff] }
  0x90   :  { %v1426_v36 = vmax.f32 %v1905_v34, %v1053_v52  ;;  %1556 = vst.msk [vmem:[%s4378_s1 + $0x58] sm:$0xff] %vm1544_vm0, %v1427_v47  ;;  %v664_v34 = vmax.f32 %v296_v14, %v312_v19  ;;  %v2949_v19 = vmax.f32 %v666_v42, %v667_v4  ;;  %v671_v47 = vmax.f32 %v303_v0, %v319_v22  ;;  %v306_v52 = vld [vmem:[%s4377_s0 + $0x950] sm:$0xff]  ;;  %v304_v0 = vld [vmem:[%s4377_s0 + $0x940] sm:$0xff]  ;;  %v321_v22 = vld [vmem:[%s4377_s0 + $0x9c8] sm:$0xff] }
  0x91   :  { %1168 = vrot.lane.b32.xlu0 %v2879_v12, %s1678_s13  ;;  %v1059_v18 = vpop.permute.xlu1 %1058  ;;  %v669_v42 = vmax.f32 %v301_v24, %v317_v33  ;;  %v322_v4 = vld [vmem:[%s4377_s0 + $0x9d0] sm:$0xff] }
  0x92   :  { %1555 = vst.msk [vmem:[%s4378_s1 + $0x50] sm:$0xff] %vm1544_vm0, %v1426_v36  ;;  %v1429_v14 = vmax.f32 %v1927_v44, %v1059_v18  ;;  %v307_v36 = vld [vmem:[%s4377_s0 + $0x958] sm:$0xff]  ;;  %v2963_v44 = vmax.f32 %v664_v34, %v665_v63  ;;  %v305_v63 = vld [vmem:[%s4377_s0 + $0x948] sm:$0xff]  ;;  %v674_v33 = vmax.f32 %v306_v52, %v322_v4  ;;  %v324_v4 = vld [vmem:[%s4377_s0 + $0x9e0] sm:$0xff] }
  0x93   :  { %v1057_v3 = vpop.permute.xlu0 %1056  ;;  %1174 = vrot.lane.b32.xlu1 %v2907_v38, %s1678_s13  ;;  %v327_v52 = vld [vmem:[%s4377_s0 + $0x9f8] sm:$0xff] }
  0x94   :  { %v1428_v10 = vmax.f32 %v1937_v50, %v1057_v3  ;;  %1558 = vst.msk [vmem:[%s4378_s1 + $0x68] sm:$0xff] %vm1544_vm0, %v1429_v14  ;;  %v668_v50 = vmax.f32 %v300_v55, %v316_v25  ;;  %v2991_v25 = vmax.f32 %v670_v45, %v671_v47  ;;  %v675_v14 = vmax.f32 %v307_v36, %v323_v37  ;;  %v310_v3 = vld [vmem:[%s4377_s0 + $0x970] sm:$0xff]  ;;  %v308_v36 = vld [vmem:[%s4377_s0 + $0x960] sm:$0xff]  ;;  %v325_v37 = vld [vmem:[%s4377_s0 + $0x9e8] sm:$0xff] }
  0x95   :  { %1172 = vrot.lane.b32.xlu0 %v2921_v29, %s1678_s13  ;;  %v1063_v34 = vpop.permute.xlu1 %1062  ;;  %v673_v45 = vmax.f32 %v305_v63, %v321_v22  ;;  %v326_v47 = vld [vmem:[%s4377_s0 + $0x9f0] sm:$0xff] }
  0x96   :  { %1557 = vst.msk [vmem:[%s4378_s1 + $0x60] sm:$0xff] %vm1544_vm0, %v1428_v10  ;;  %v1431_v55 = vmax.f32 %v1959_v60, %v1063_v34  ;;  %v311_v10 = vld [vmem:[%s4377_s0 + $0x978] sm:$0xff]  ;;  %v3005_v60 = vmax.f32 %v668_v50, %v669_v42  ;;  %v309_v42 = vld [vmem:[%s4377_s0 + $0x968] sm:$0xff]  ;;  %v678_v22 = vmax.f32 %v310_v3, %v326_v47  ;;  %v344_v47 = vld [vmem:[%s4377_s0 + $0xa80] sm:$0xff] }
  0x97   :  { %v1061_v18 = vpop.permute.xlu0 %1060  ;;  %1178 = vrot.lane.b32.xlu1 %v2949_v19, %s1678_s13  ;;  %v347_v3 = vld [vmem:[%s4377_s0 + $0xa98] sm:$0xff] }
  0x98   :  { %v1430_v24 = vmax.f32 %v1969_v2, %v1061_v18  ;;  %1560 = vst.msk [vmem:[%s4378_s1 + $0x78] sm:$0xff] %vm1544_vm0, %v1431_v55  ;;  %v672_v2 = vmax.f32 %v304_v0, %v320_v23  ;;  %v3033_v23 = vmax.f32 %v674_v33, %v675_v14  ;;  %v679_v55 = vmax.f32 %v311_v10, %v327_v52  ;;  %v330_v18 = vld [vmem:[%s4377_s0 + $0xa10] sm:$0xff]  ;;  %v328_v10 = vld [vmem:[%s4377_s0 + $0xa00] sm:$0xff]  ;;  %v345_v52 = vld [vmem:[%s4377_s0 + $0xa88] sm:$0xff] }
  0x99   :  { %1176 = vrot.lane.b32.xlu0 %v2963_v44, %s1678_s13  ;;  %v1067_v50 = vpop.permute.xlu1 %1066  ;;  %v677_v33 = vmax.f32 %v309_v42, %v325_v37  ;;  %v346_v14 = vld [vmem:[%s4377_s0 + $0xa90] sm:$0xff] }
  0x9a   :  { %1559 = vst.msk [vmem:[%s4378_s1 + $0x70] sm:$0xff] %vm1544_vm0, %v1430_v24  ;;  %v1433_v0 = vmax.f32 %v1991_v13, %v1067_v50  ;;  %v331_v24 = vld [vmem:[%s4377_s0 + $0xa18] sm:$0xff]  ;;  %v3047_v13 = vmax.f32 %v672_v2, %v673_v45  ;;  %v329_v45 = vld [vmem:[%s4377_s0 + $0xa08] sm:$0xff]  ;;  %v682_v37 = vmax.f32 %v330_v18, %v346_v14  ;;  %v348_v14 = vld [vmem:[%s4377_s0 + $0xaa0] sm:$0xff] }
  0x9b   :  { %v1065_v34 = vpop.permute.xlu0 %1064  ;;  %1182 = vrot.lane.b32.xlu1 %v2991_v25, %s1678_s13  ;;  %v351_v18 = vld [vmem:[%s4377_s0 + $0xab8] sm:$0xff] }
  0x9c   :  { %v1432_v63 = vmax.f32 %v2001_v20, %v1065_v34  ;;  %1562 = vst.msk [vmem:[%s4378_s1 + $0x88] sm:$0xff] %vm1544_vm0, %v1433_v0  ;;  %v676_v20 = vmax.f32 %v308_v36, %v324_v4  ;;  %v3075_v4 = vmax.f32 %v678_v22, %v679_v55  ;;  %v683_v0 = vmax.f32 %v331_v24, %v347_v3  ;;  %v334_v34 = vld [vmem:[%s4377_s0 + $0xa30] sm:$0xff]  ;;  %v332_v24 = vld [vmem:[%s4377_s0 + $0xa20] sm:$0xff]  ;;  %v349_v3 = vld [vmem:[%s4377_s0 + $0xaa8] sm:$0xff] }
  0x9d   :  { %1180 = vrot.lane.b32.xlu0 %v3005_v60, %s1678_s13  ;;  %v1071_v2 = vpop.permute.xlu1 %1070  ;;  %v681_v22 = vmax.f32 %v329_v45, %v345_v52  ;;  %v350_v55 = vld [vmem:[%s4377_s0 + $0xab0] sm:$0xff] }
  0x9e   :  { %1561 = vst.msk [vmem:[%s4378_s1 + $0x80] sm:$0xff] %vm1544_vm0, %v1432_v63  ;;  %v1435_v36 = vmax.f32 %v2023_v32, %v1071_v2  ;;  %v335_v63 = vld [vmem:[%s4377_s0 + $0xa38] sm:$0xff]  ;;  %v3089_v32 = vmax.f32 %v676_v20, %v677_v33  ;;  %v333_v33 = vld [vmem:[%s4377_s0 + $0xa28] sm:$0xff]  ;;  %v686_v52 = vmax.f32 %v334_v34, %v350_v55  ;;  %v352_v55 = vld [vmem:[%s4377_s0 + $0xac0] sm:$0xff] }
  0x9f   :  { %v1069_v50 = vpop.permute.xlu0 %1068  ;;  %1186 = vrot.lane.b32.xlu1 %v3033_v23, %s1678_s13  ;;  %v355_v34 = vld [vmem:[%s4377_s0 + $0xad8] sm:$0xff] }
  0xa0   :  { %v1434_v42 = vmax.f32 %v2033_v39, %v1069_v50  ;;  %1564 = vst.msk [vmem:[%s4378_s1 + $0x98] sm:$0xff] %vm1544_vm0, %v1435_v36  ;;  %v680_v39 = vmax.f32 %v328_v10, %v344_v47  ;;  %v3117_v47 = vmax.f32 %v682_v37, %v683_v0  ;;  %v687_v36 = vmax.f32 %v335_v63, %v351_v18  ;;  %v338_v50 = vld [vmem:[%s4377_s0 + $0xa50] sm:$0xff]  ;;  %v336_v63 = vld [vmem:[%s4377_s0 + $0xa40] sm:$0xff]  ;;  %v353_v18 = vld [vmem:[%s4377_s0 + $0xac8] sm:$0xff] }
  0xa1   :  { %1184 = vrot.lane.b32.xlu0 %v3047_v13, %s1678_s13  ;;  %v1075_v20 = vpop.permute.xlu1 %1074  ;;  %v685_v37 = vmax.f32 %v333_v33, %v349_v3  ;;  %v354_v0 = vld [vmem:[%s4377_s0 + $0xad0] sm:$0xff] }
  0xa2   :  { %1563 = vst.msk [vmem:[%s4378_s1 + $0x90] sm:$0xff] %vm1544_vm0, %v1434_v42  ;;  %v1437_v10 = vmax.f32 %v2055_v51, %v1075_v20  ;;  %v339_v42 = vld [vmem:[%s4377_s0 + $0xa58] sm:$0xff]  ;;  %v3131_v51 = vmax.f32 %v680_v39, %v681_v22  ;;  %v337_v22 = vld [vmem:[%s4377_s0 + $0xa48] sm:$0xff]  ;;  %v690_v3 = vmax.f32 %v338_v50, %v354_v0  ;;  %v356_v0 = vld [vmem:[%s4377_s0 + $0xae0] sm:$0xff] }
  0xa3   :  { %v1073_v2 = vpop.permute.xlu0 %1072  ;;  %1190 = vrot.lane.b32.xlu1 %v3075_v4, %s1678_s13  ;;  %v359_v50 = vld [vmem:[%s4377_s0 + $0xaf8] sm:$0xff] }
  0xa4   :  { %v1436_v45 = vmax.f32 %v2065_v57, %v1073_v2  ;;  %1566 = vst.msk [vmem:[%s4378_s1 + $0xa8] sm:$0xff] %vm1544_vm0, %v1437_v10  ;;  %v684_v57 = vmax.f32 %v332_v24, %v348_v14  ;;  %v3159_v14 = vmax.f32 %v686_v52, %v687_v36  ;;  %v691_v10 = vmax.f32 %v339_v42, %v355_v34  ;;  %v342_v2 = vld [vmem:[%s4377_s0 + $0xa70] sm:$0xff]  ;;  %v340_v42 = vld [vmem:[%s4377_s0 + $0xa60] sm:$0xff]  ;;  %v357_v34 = vld [vmem:[%s4377_s0 + $0xae8] sm:$0xff] }
  0xa5   :  { %1188 = vrot.lane.b32.xlu0 %v3089_v32, %s1678_s13  ;;  %v1079_v39 = vpop.permute.xlu1 %1078  ;;  %v689_v52 = vmax.f32 %v337_v22, %v353_v18  ;;  %v358_v36 = vld [vmem:[%s4377_s0 + $0xaf0] sm:$0xff] }
  0xa6   :  { %1565 = vst.msk [vmem:[%s4378_s1 + $0xa0] sm:$0xff] %vm1544_vm0, %v1436_v45  ;;  %v1439_v24 = vmax.f32 %v2087_v6, %v1079_v39  ;;  %v343_v45 = vld [vmem:[%s4377_s0 + $0xa78] sm:$0xff]  ;;  %v3173_v6 = vmax.f32 %v684_v57, %v685_v37  ;;  %v341_v37 = vld [vmem:[%s4377_s0 + $0xa68] sm:$0xff]  ;;  %v694_v18 = vmax.f32 %v342_v2, %v358_v36  ;;  %v376_v36 = vld [vmem:[%s4377_s0 + $0xb80] sm:$0xff] }
  0xa7   :  { %v1077_v20 = vpop.permute.xlu0 %1076  ;;  %1194 = vrot.lane.b32.xlu1 %v3117_v47, %s1678_s13  ;;  %v379_v2 = vld [vmem:[%s4377_s0 + $0xb98] sm:$0xff] }
  0xa8   :  { %v1438_v33 = vmax.f32 %v2097_v11, %v1077_v20  ;;  %1568 = vst.msk [vmem:[%s4378_s1 + $0xb8] sm:$0xff] %vm1544_vm0, %v1439_v24  ;;  %v688_v11 = vmax.f32 %v336_v63, %v352_v55  ;;  %v3201_v55 = vmax.f32 %v690_v3, %v691_v10  ;;  %v695_v24 = vmax.f32 %v343_v45, %v359_v50  ;;  %v362_v20 = vld [vmem:[%s4377_s0 + $0xb10] sm:$0xff]  ;;  %v360_v45 = vld [vmem:[%s4377_s0 + $0xb00] sm:$0xff]  ;;  %v377_v50 = vld [vmem:[%s4377_s0 + $0xb88] sm:$0xff] }
  0xa9   :  { %1192 = vrot.lane.b32.xlu0 %v3131_v51, %s1678_s13  ;;  %v1083_v57 = vpop.permute.xlu1 %1082  ;;  %v693_v3 = vmax.f32 %v341_v37, %v357_v34  ;;  %v378_v10 = vld [vmem:[%s4377_s0 + $0xb90] sm:$0xff] }
  0xaa   :  { %1567 = vst.msk [vmem:[%s4378_s1 + $0xb0] sm:$0xff] %vm1544_vm0, %v1438_v33  ;;  %v1441_v63 = vmax.f32 %v2119_v26, %v1083_v57  ;;  %v363_v33 = vld [vmem:[%s4377_s0 + $0xb18] sm:$0xff]  ;;  %v3215_v26 = vmax.f32 %v688_v11, %v689_v52  ;;  %v361_v52 = vld [vmem:[%s4377_s0 + $0xb08] sm:$0xff]  ;;  %v698_v34 = vmax.f32 %v362_v20, %v378_v10  ;;  %v380_v10 = vld [vmem:[%s4377_s0 + $0xba0] sm:$0xff] }
  0xab   :  { %v1081_v39 = vpop.permute.xlu0 %1080  ;;  %1198 = vrot.lane.b32.xlu1 %v3159_v14, %s1678_s13  ;;  %v383_v20 = vld [vmem:[%s4377_s0 + $0xbb8] sm:$0xff] }
  0xac   :  { %v1440_v22 = vmax.f32 %v2129_v35, %v1081_v39  ;;  %1570 = vst.msk [vmem:[%s4378_s1 + $0xc8] sm:$0xff] %vm1544_vm0, %v1441_v63  ;;  %v692_v35 = vmax.f32 %v340_v42, %v356_v0  ;;  %v3243_v0 = vmax.f32 %v694_v18, %v695_v24  ;;  %v699_v63 = vmax.f32 %v363_v33, %v379_v2  ;;  %v366_v39 = vld [vmem:[%s4377_s0 + $0xb30] sm:$0xff]  ;;  %v364_v33 = vld [vmem:[%s4377_s0 + $0xb20] sm:$0xff]  ;;  %v381_v2 = vld [vmem:[%s4377_s0 + $0xba8] sm:$0xff] }
  0xad   :  { %1196 = vrot.lane.b32.xlu0 %v3173_v6, %s1678_s13  ;;  %v1087_v11 = vpop.permute.xlu1 %1086  ;;  %v697_v18 = vmax.f32 %v361_v52, %v377_v50  ;;  %v382_v24 = vld [vmem:[%s4377_s0 + $0xbb0] sm:$0xff] }
  0xae   :  { %1569 = vst.msk [vmem:[%s4378_s1 + $0xc0] sm:$0xff] %vm1544_vm0, %v1440_v22  ;;  %v1443_v42 = vmax.f32 %v2151_v48, %v1087_v11  ;;  %v367_v22 = vld [vmem:[%s4377_s0 + $0xb38] sm:$0xff]  ;;  %v3257_v48 = vmax.f32 %v692_v35, %v693_v3  ;;  %v365_v3 = vld [vmem:[%s4377_s0 + $0xb28] sm:$0xff]  ;;  %v702_v50 = vmax.f32 %v366_v39, %v382_v24  ;;  %v384_v24 = vld [vmem:[%s4377_s0 + $0xbc0] sm:$0xff] }
  0xaf   :  { %v1085_v57 = vpop.permute.xlu0 %1084  ;;  %1202 = vrot.lane.b32.xlu1 %v3201_v55, %s1678_s13  ;;  %v387_v39 = vld [vmem:[%s4377_s0 + $0xbd8] sm:$0xff] }
  0xb0   :  { %v1442_v37 = vmax.f32 %v2161_v56, %v1085_v57  ;;  %1572 = vst.msk [vmem:[%s4378_s1 + $0xd8] sm:$0xff] %vm1544_vm0, %v1443_v42  ;;  %v696_v56 = vmax.f32 %v360_v45, %v376_v36  ;;  %v3285_v36 = vmax.f32 %v698_v34, %v699_v63  ;;  %v703_v42 = vmax.f32 %v367_v22, %v383_v20  ;;  %v370_v57 = vld [vmem:[%s4377_s0 + $0xb50] sm:$0xff]  ;;  %v368_v22 = vld [vmem:[%s4377_s0 + $0xb40] sm:$0xff]  ;;  %v385_v20 = vld [vmem:[%s4377_s0 + $0xbc8] sm:$0xff] }
  0xb1   :  { %1200 = vrot.lane.b32.xlu0 %v3215_v26, %s1678_s13  ;;  %v1091_v35 = vpop.permute.xlu1 %1090  ;;  %v701_v34 = vmax.f32 %v365_v3, %v381_v2  ;;  %v386_v63 = vld [vmem:[%s4377_s0 + $0xbd0] sm:$0xff] }
  0xb2   :  { %1571 = vst.msk [vmem:[%s4378_s1 + $0xd0] sm:$0xff] %vm1544_vm0, %v1442_v37  ;;  %v1445_v45 = vmax.f32 %v2183_v7, %v1091_v35  ;;  %v371_v37 = vld [vmem:[%s4377_s0 + $0xb58] sm:$0xff]  ;;  %v3299_v7 = vmax.f32 %v696_v56, %v697_v18  ;;  %v369_v18 = vld [vmem:[%s4377_s0 + $0xb48] sm:$0xff]  ;;  %v706_v2 = vmax.f32 %v370_v57, %v386_v63  ;;  %v388_v63 = vld [vmem:[%s4377_s0 + $0xbe0] sm:$0xff] }
  0xb3   :  { %v1089_v11 = vpop.permute.xlu0 %1088  ;;  %1206 = vrot.lane.b32.xlu1 %v3243_v0, %s1678_s13  ;;  %v391_v57 = vld [vmem:[%s4377_s0 + $0xbf8] sm:$0xff] }
  0xb4   :  { %v1444_v52 = vmax.f32 %v2193_v15, %v1089_v11  ;;  %1574 = vst.msk [vmem:[%s4378_s1 + $0xe8] sm:$0xff] %vm1544_vm0, %v1445_v45  ;;  %v700_v15 = vmax.f32 %v364_v33, %v380_v10  ;;  %v3327_v10 = vmax.f32 %v702_v50, %v703_v42  ;;  %v707_v45 = vmax.f32 %v371_v37, %v387_v39  ;;  %v374_v11 = vld [vmem:[%s4377_s0 + $0xb70] sm:$0xff]  ;;  %v372_v37 = vld [vmem:[%s4377_s0 + $0xb60] sm:$0xff]  ;;  %v389_v39 = vld [vmem:[%s4377_s0 + $0xbe8] sm:$0xff] }
  0xb5   :  { %1204 = vrot.lane.b32.xlu0 %v3257_v48, %s1678_s13  ;;  %v1095_v56 = vpop.permute.xlu1 %1094  ;;  %v705_v50 = vmax.f32 %v369_v18, %v385_v20  ;;  %v390_v42 = vld [vmem:[%s4377_s0 + $0xbf0] sm:$0xff] }
  0xb6   :  { %1573 = vst.msk [vmem:[%s4378_s1 + $0xe0] sm:$0xff] %vm1544_vm0, %v1444_v52  ;;  %v1447_v33 = vmax.f32 %v2215_v31, %v1095_v56  ;;  %v375_v52 = vld [vmem:[%s4377_s0 + $0xb78] sm:$0xff]  ;;  %v3341_v31 = vmax.f32 %v700_v15, %v701_v34  ;;  %v373_v34 = vld [vmem:[%s4377_s0 + $0xb68] sm:$0xff]  ;;  %v710_v20 = vmax.f32 %v374_v11, %v390_v42  ;;  %v408_v42 = vld [vmem:[%s4377_s0 + $0xc80] sm:$0xff] }
  0xb7   :  { %v1093_v35 = vpop.permute.xlu0 %1092  ;;  %1210 = vrot.lane.b32.xlu1 %v3285_v36, %s1678_s13  ;;  %v411_v11 = vld [vmem:[%s4377_s0 + $0xc98] sm:$0xff] }
  0xb8   :  { %v1446_v3 = vmax.f32 %v2225_v41, %v1093_v35  ;;  %1576 = vst.msk [vmem:[%s4378_s1 + $0xf8] sm:$0xff] %vm1544_vm0, %v1447_v33  ;;  %v704_v41 = vmax.f32 %v368_v22, %v384_v24  ;;  %v3369_v24 = vmax.f32 %v706_v2, %v707_v45  ;;  %v711_v33 = vmax.f32 %v375_v52, %v391_v57  ;;  %v394_v35 = vld [vmem:[%s4377_s0 + $0xc10] sm:$0xff]  ;;  %v392_v52 = vld [vmem:[%s4377_s0 + $0xc00] sm:$0xff]  ;;  %v409_v57 = vld [vmem:[%s4377_s0 + $0xc88] sm:$0xff] }
  0xb9   :  { %1208 = vrot.lane.b32.xlu0 %v3299_v7, %s1678_s13  ;;  %v1099_v15 = vpop.permute.xlu1 %1098  ;;  %v709_v2 = vmax.f32 %v373_v34, %v389_v39  ;;  %v410_v45 = vld [vmem:[%s4377_s0 + $0xc90] sm:$0xff] }
  0xba   :  { %1575 = vst.msk [vmem:[%s4378_s1 + $0xf0] sm:$0xff] %vm1544_vm0, %v1446_v3  ;;  %v1449_v22 = vmax.f32 %v2247_v58, %v1099_v15  ;;  %v395_v3 = vld [vmem:[%s4377_s0 + $0xc18] sm:$0xff]  ;;  %v3383_v58 = vmax.f32 %v704_v41, %v705_v50  ;;  %v393_v50 = vld [vmem:[%s4377_s0 + $0xc08] sm:$0xff]  ;;  %v714_v39 = vmax.f32 %v394_v35, %v410_v45  ;;  %v412_v45 = vld [vmem:[%s4377_s0 + $0xca0] sm:$0xff] }
  0xbb   :  { %v1097_v56 = vpop.permute.xlu0 %1096  ;;  %1214 = vrot.lane.b32.xlu1 %v3327_v10, %s1678_s13  ;;  %v415_v35 = vld [vmem:[%s4377_s0 + $0xcb8] sm:$0xff] }
  0xbc   :  { %v1448_v18 = vmax.f32 %v2257_v1, %v1097_v56  ;;  %1578 = vst.msk [vmem:[%s4378_s1 + $0x108] sm:$0xff] %vm1544_vm0, %v1449_v22  ;;  %v708_v1 = vmax.f32 %v372_v37, %v388_v63  ;;  %v3411_v63 = vmax.f32 %v710_v20, %v711_v33  ;;  %v715_v22 = vmax.f32 %v395_v3, %v411_v11  ;;  %v398_v56 = vld [vmem:[%s4377_s0 + $0xc30] sm:$0xff]  ;;  %v396_v3 = vld [vmem:[%s4377_s0 + $0xc20] sm:$0xff]  ;;  %v413_v11 = vld [vmem:[%s4377_s0 + $0xca8] sm:$0xff] }
  0xbd   :  { %1212 = vrot.lane.b32.xlu0 %v3341_v31, %s1678_s13  ;;  %v1103_v41 = vpop.permute.xlu1 %1102  ;;  %v713_v20 = vmax.f32 %v393_v50, %v409_v57  ;;  %v414_v33 = vld [vmem:[%s4377_s0 + $0xcb0] sm:$0xff] }
  0xbe   :  { %1577 = vst.msk [vmem:[%s4378_s1 + $0x100] sm:$0xff] %vm1544_vm0, %v1448_v18  ;;  %v1451_v37 = vmax.f32 %v2279_v21, %v1103_v41  ;;  %v399_v18 = vld [vmem:[%s4377_s0 + $0xc38] sm:$0xff]  ;;  %v3425_v21 = vmax.f32 %v708_v1, %v709_v2  ;;  %v397_v2 = vld [vmem:[%s4377_s0 + $0xc28] sm:$0xff]  ;;  %v718_v57 = vmax.f32 %v398_v56, %v414_v33  ;;  %v416_v33 = vld [vmem:[%s4377_s0 + $0xcc0] sm:$0xff] }
  0xbf   :  { %v1101_v15 = vpop.permute.xlu0 %1100  ;;  %1218 = vrot.lane.b32.xlu1 %v3369_v24, %s1678_s13  ;;  %v419_v56 = vld [vmem:[%s4377_s0 + $0xcd8] sm:$0xff] }
  0xc0   :  { %v1450_v34 = vmax.f32 %v2289_v30, %v1101_v15  ;;  %1580 = vst.msk [vmem:[%s4378_s1 + $0x118] sm:$0xff] %vm1544_vm0, %v1451_v37  ;;  %v712_v30 = vmax.f32 %v392_v52, %v408_v42  ;;  %v3453_v42 = vmax.f32 %v714_v39, %v715_v22  ;;  %v719_v37 = vmax.f32 %v399_v18, %v415_v35  ;;  %v402_v15 = vld [vmem:[%s4377_s0 + $0xc50] sm:$0xff]  ;;  %v400_v18 = vld [vmem:[%s4377_s0 + $0xc40] sm:$0xff]  ;;  %v417_v35 = vld [vmem:[%s4377_s0 + $0xcc8] sm:$0xff] }
  0xc1   :  { %1216 = vrot.lane.b32.xlu0 %v3383_v58, %s1678_s13  ;;  %v1107_v1 = vpop.permute.xlu1 %1106  ;;  %v717_v39 = vmax.f32 %v397_v2, %v413_v11  ;;  %v418_v22 = vld [vmem:[%s4377_s0 + $0xcd0] sm:$0xff] }
  0xc2   :  { %1579 = vst.msk [vmem:[%s4378_s1 + $0x110] sm:$0xff] %vm1544_vm0, %v1450_v34  ;;  %v1453_v52 = vmax.f32 %v2311_v49, %v1107_v1  ;;  %v403_v34 = vld [vmem:[%s4377_s0 + $0xc58] sm:$0xff]  ;;  %v3467_v49 = vmax.f32 %v712_v30, %v713_v20  ;;  %v401_v20 = vld [vmem:[%s4377_s0 + $0xc48] sm:$0xff]  ;;  %v722_v11 = vmax.f32 %v402_v15, %v418_v22  ;;  %v420_v22 = vld [vmem:[%s4377_s0 + $0xce0] sm:$0xff] }
  0xc3   :  { %v1105_v41 = vpop.permute.xlu0 %1104  ;;  %1222 = vrot.lane.b32.xlu1 %v3411_v63, %s1678_s13  ;;  %v423_v15 = vld [vmem:[%s4377_s0 + $0xcf8] sm:$0xff] }
  0xc4   :  { %v1452_v50 = vmax.f32 %v2321_v61, %v1105_v41  ;;  %1582 = vst.msk [vmem:[%s4378_s1 + $0x128] sm:$0xff] %vm1544_vm0, %v1453_v52  ;;  %4430 = vst [vmem:[#allocation19_spill] sm:$0xff] %v3467_v49  ;;  %v716_v61 = vmax.f32 %v396_v3, %v412_v45  ;;  %v3495_v45 = vmax.f32 %v718_v57, %v719_v37  ;;  %v406_v41 = vld [vmem:[%s4377_s0 + $0xc70] sm:$0xff] }
  0xc5   :  { %1220 = vrot.lane.b32.xlu0 %v3425_v21, %s1678_s13  ;;  %v1111_v30 = vpop.permute.xlu1 %1110  ;;  %v723_v52 = vmax.f32 %v403_v34, %v419_v56  ;;  %v721_v57 = vmax.f32 %v401_v20, %v417_v35  ;;  %v422_v37 = vld [vmem:[%s4377_s0 + $0xcf0] sm:$0xff]  ;;  %v404_v34 = vld [vmem:[%s4377_s0 + $0xc60] sm:$0xff]  ;;  %v421_v56 = vld [vmem:[%s4377_s0 + $0xce8] sm:$0xff] }
  0xc6   :  { %1581 = vst.msk [vmem:[%s4378_s1 + $0x120] sm:$0xff] %vm1544_vm0, %v1452_v50  ;;  %v1455_v3 = vmax.f32 %v2343_v17, %v1111_v30  ;;  %4431 = vst [vmem:[#allocation20_spill] sm:$0xff] %v3495_v45  ;;  %v407_v50 = vld [vmem:[%s4377_s0 + $0xc78] sm:$0xff]  ;;  %v3509_v17 = vmax.f32 %v716_v61, %v717_v39  ;;  %v405_v39 = vld [vmem:[%s4377_s0 + $0xc68] sm:$0xff] }
  0xc7   :  { %v1109_v1 = vpop.permute.xlu0 %1108  ;;  %1226 = vrot.lane.b32.xlu1 %v3453_v42, %s1678_s13  ;;  %v4433_v20 = vld [vmem:[#allocation2_spill] sm:$0xff]  ;;  %v3537_v35 = vmax.f32 %v722_v11, %v723_v52  ;;  %v724_v11 = vmax.f32 %v404_v34, %v420_v22  ;;  %v725_v52 = vmax.f32 %v405_v39, %v421_v56  ;;  %v441_v34 = vld [vmem:[%s4377_s0 + $0xd88] sm:$0xff]  ;;  %v4437_v56 = vld [vmem:[#allocation4_spill] sm:$0xff] }
  0xc8   :  { %v1454_v2 = vmax.f32 %v2353_v28, %v1109_v1  ;;  %1584 = vst.msk [vmem:[%s4378_s1 + $0x138] sm:$0xff] %vm1544_vm0, %v1455_v3  ;;  %4432 = vst [vmem:[#allocation21_spill] sm:$0xff] %v3509_v17  ;;  %v720_v28 = vmax.f32 %v400_v18, %v416_v33  ;;  %v726_v3 = vmax.f32 %v406_v41, %v422_v37  ;;  %v442_v41 = vld [vmem:[%s4377_s0 + $0xd90] sm:$0xff]  ;;  %v424_v37 = vld [vmem:[%s4377_s0 + $0xd00] sm:$0xff] }
  0xc9   :  { %1224 = vrot.lane.b32.xlu0 %v3467_v49, %s1678_s13  ;;  %v1115_v61 = vpop.permute.xlu1 %1114  ;;  %4434 = vst [vmem:[#allocation2_spill] sm:$0xff] %v3537_v35  ;;  %v727_v1 = vmax.f32 %v407_v50, %v423_v15  ;;  %v427_v49 = vld [vmem:[%s4377_s0 + $0xd18] sm:$0xff]  ;;  %v440_v15 = vld [vmem:[%s4377_s0 + $0xd80] sm:$0xff] }
  0xca   :  { %1583 = vst.msk [vmem:[%s4378_s1 + $0x130] sm:$0xff] %vm1544_vm0, %v1454_v2  ;;  %v1457_v18 = vmax.f32 %v2375_v53, %v1115_v61  ;;  %v426_v2 = vld [vmem:[%s4377_s0 + $0xd10] sm:$0xff]  ;;  %v3551_v53 = vmax.f32 %v720_v28, %v721_v57  ;;  %v443_v50 = vld [vmem:[%s4377_s0 + $0xd98] sm:$0xff]  ;;  %v425_v57 = vld [vmem:[%s4377_s0 + $0xd08] sm:$0xff] }
  0xcb   :  { %v1113_v30 = vpop.permute.xlu0 %1112  ;;  %1230 = vrot.lane.b32.xlu1 %v3495_v45, %s1678_s13  ;;  %v4436_v61 = vld [vmem:[#allocation3_spill] sm:$0xff]  ;;  %v431_v45 = vld [vmem:[%s4377_s0 + $0xd38] sm:$0xff] }
  0xcc   :  { %v1456_v33 = vmax.f32 %v4433_v20, %v1113_v30  ;;  %1586 = vst.msk [vmem:[%s4378_s1 + $0x148] sm:$0xff] %vm1544_vm0, %v1457_v18  ;;  %4435 = vst [vmem:[#allocation22_spill] sm:$0xff] %v3551_v53  ;;  %v3579_v30 = vmax.f32 %v726_v3, %v727_v1  ;;  %v730_v20 = vmax.f32 %v426_v2, %v442_v41  ;;  %v446_v2 = vld [vmem:[%s4377_s0 + $0xdb0] sm:$0xff]  ;;  %v447_v41 = vld [vmem:[%s4377_s0 + $0xdb8] sm:$0xff] }
  0xcd   :  { %1228 = vrot.lane.b32.xlu0 %v3509_v17, %s1678_s13  ;;  %v1119_v28 = vpop.permute.xlu1 %1118  ;;  %v430_v17 = vld [vmem:[%s4377_s0 + $0xd30] sm:$0xff]  ;;  %v3593_v3 = vmax.f32 %v724_v11, %v725_v52  ;;  %v728_v1 = vmax.f32 %v424_v37, %v440_v15  ;;  %v429_v52 = vld [vmem:[%s4377_s0 + $0xd28] sm:$0xff]  ;;  %v444_v37 = vld [vmem:[%s4377_s0 + $0xda0] sm:$0xff] }
  0xce   :  { %1585 = vst.msk [vmem:[%s4378_s1 + $0x140] sm:$0xff] %vm1544_vm0, %v1456_v33  ;;  %v1459_v39 = vmax.f32 %v4436_v61, %v1119_v28  ;;  %4438 = vst [vmem:[#allocation3_spill] sm:$0xff] %v3579_v30  ;;  %v731_v33 = vmax.f32 %v427_v49, %v443_v50  ;;  %v729_v49 = vmax.f32 %v425_v57, %v441_v34  ;;  %v428_v50 = vld [vmem:[%s4377_s0 + $0xd20] sm:$0xff]  ;;  %v445_v28 = vld [vmem:[%s4377_s0 + $0xda8] sm:$0xff] }
  0xcf   :  { %v1117_v22 = vpop.permute.xlu0 %1116  ;;  %1234 = vrot.lane.b32.xlu1 %v3537_v35, %s1678_s13  ;;  %4439 = vst [vmem:[#allocation4_spill] sm:$0xff] %v3593_v3  ;;  %v4440_v57 = vld [vmem:[#allocation5_spill] sm:$0xff]  ;;  %v4441_v61 = vld [vmem:[#allocation6_spill] sm:$0xff] }
  0xd0   :  { %v1458_v18 = vmax.f32 %v4437_v56, %v1117_v22  ;;  %1588 = vst.msk [vmem:[%s4378_s1 + $0x158] sm:$0xff] %vm1544_vm0, %v1459_v39  ;;  %v3621_v22 = vmax.f32 %v730_v20, %v731_v33  ;;  %v734_v56 = vmax.f32 %v430_v17, %v446_v2  ;;  %v435_v35 = vld [vmem:[%s4377_s0 + $0xd58] sm:$0xff]  ;;  %v3635_v20 = vmax.f32 %v728_v1, %v729_v49  ;;  %v450_v33 = vld [vmem:[%s4377_s0 + $0xdd0] sm:$0xff]  ;;  %v433_v49 = vld [vmem:[%s4377_s0 + $0xd48] sm:$0xff] }
  0xd1   :  { %1232 = vrot.lane.b32.xlu0 %v3551_v53, %s1678_s13  ;;  %v1123_v11 = vpop.permute.xlu1 %1122  ;;  %v434_v53 = vld [vmem:[%s4377_s0 + $0xd50] sm:$0xff]  ;;  %v732_v17 = vmax.f32 %v428_v50, %v444_v37  ;;  %v451_v2 = vld [vmem:[%s4377_s0 + $0xdd8] sm:$0xff]  ;;  %v448_v50 = vld [vmem:[%s4377_s0 + $0xdc0] sm:$0xff] }
  0xd2   :  { %1587 = vst.msk [vmem:[%s4378_s1 + $0x150] sm:$0xff] %vm1544_vm0, %v1458_v18  ;;  %v1461_v15 = vmax.f32 %v4440_v57, %v1123_v11  ;;  %4442 = vst [vmem:[#allocation5_spill] sm:$0xff] %v3621_v22  ;;  %v735_v18 = vmax.f32 %v431_v45, %v447_v41  ;;  %v733_v45 = vmax.f32 %v429_v52, %v445_v28  ;;  %v432_v41 = vld [vmem:[%s4377_s0 + $0xd40] sm:$0xff]  ;;  %v449_v11 = vld [vmem:[%s4377_s0 + $0xdc8] sm:$0xff] }
  0xd3   :  { %v1121_v34 = vpop.permute.xlu0 %1120  ;;  %1238 = vrot.lane.b32.xlu1 %v3579_v30, %s1678_s13  ;;  %4443 = vst [vmem:[#allocation6_spill] sm:$0xff] %v3635_v20  ;;  %v4444_v52 = vld [vmem:[#allocation7_spill] sm:$0xff]  ;;  %v4445_v57 = vld [vmem:[#allocation8_spill] sm:$0xff]  ;;  %v439_v30 = vld [vmem:[%s4377_s0 + $0xd78] sm:$0xff] }
  0xd4   :  { %v1460_v39 = vmax.f32 %v4441_v61, %v1121_v34  ;;  %1590 = vst.msk [vmem:[%s4378_s1 + $0x168] sm:$0xff] %vm1544_vm0, %v1461_v15  ;;  %v3663_v34 = vmax.f32 %v734_v56, %v735_v18  ;;  %v738_v61 = vmax.f32 %v434_v53, %v450_v33  ;;  %v3677_v56 = vmax.f32 %v732_v17, %v733_v45  ;;  %v454_v18 = vld [vmem:[%s4377_s0 + $0xdf0] sm:$0xff]  ;;  %v455_v33 = vld [vmem:[%s4377_s0 + $0xdf8] sm:$0xff]  ;;  %v437_v45 = vld [vmem:[%s4377_s0 + $0xd68] sm:$0xff] }
  0xd5   :  { %1236 = vrot.lane.b32.xlu0 %v3593_v3, %s1678_s13  ;;  %v1127_v1 = vpop.permute.xlu1 %1126  ;;  %v438_v3 = vld [vmem:[%s4377_s0 + $0xd70] sm:$0xff]  ;;  %v736_v53 = vmax.f32 %v432_v41, %v448_v50  ;;  %v452_v41 = vld [vmem:[%s4377_s0 + $0xde0] sm:$0xff] }
  0xd6   :  { %1589 = vst.msk [vmem:[%s4378_s1 + $0x160] sm:$0xff] %vm1544_vm0, %v1460_v39  ;;  %v1463_v37 = vmax.f32 %v4444_v52, %v1127_v1  ;;  %4446 = vst [vmem:[#allocation7_spill] sm:$0xff] %v3663_v34  ;;  %v739_v39 = vmax.f32 %v435_v35, %v451_v2  ;;  %v737_v35 = vmax.f32 %v433_v49, %v449_v11  ;;  %v436_v2 = vld [vmem:[%s4377_s0 + $0xd60] sm:$0xff]  ;;  %v453_v1 = vld [vmem:[%s4377_s0 + $0xde8] sm:$0xff] }
  0xd7   :  { %v1125_v28 = vpop.permute.xlu0 %1124  ;;  %1242 = vrot.lane.b32.xlu1 %v3621_v22, %s1678_s13  ;;  %4447 = vst [vmem:[#allocation8_spill] sm:$0xff] %v3677_v56  ;;  %v4448_v49 = vld [vmem:[#allocation9_spill] sm:$0xff]  ;;  %v4449_v52 = vld [vmem:[#allocation10_spill] sm:$0xff] }
  0xd8   :  { %v1462_v15 = vmax.f32 %v4445_v57, %v1125_v28  ;;  %1592 = vst.msk [vmem:[%s4378_s1 + $0x178] sm:$0xff] %vm1544_vm0, %v1463_v37  ;;  %v3705_v28 = vmax.f32 %v738_v61, %v739_v39  ;;  %v742_v57 = vmax.f32 %v438_v3, %v454_v18  ;;  %v459_v22 = vld [vmem:[%s4377_s0 + $0xe18] sm:$0xff]  ;;  %v3719_v61 = vmax.f32 %v736_v53, %v737_v35  ;;  %v474_v39 = vld [vmem:[%s4377_s0 + $0xe90] sm:$0xff]  ;;  %v457_v35 = vld [vmem:[%s4377_s0 + $0xe08] sm:$0xff] }
  0xd9   :  { %1240 = vrot.lane.b32.xlu0 %v3635_v20, %s1678_s13  ;;  %v1131_v17 = vpop.permute.xlu1 %1130  ;;  %v458_v20 = vld [vmem:[%s4377_s0 + $0xe10] sm:$0xff]  ;;  %v740_v3 = vmax.f32 %v436_v2, %v452_v41  ;;  %v475_v18 = vld [vmem:[%s4377_s0 + $0xe98] sm:$0xff]  ;;  %v472_v2 = vld [vmem:[%s4377_s0 + $0xe80] sm:$0xff] }
  0xda   :  { %1591 = vst.msk [vmem:[%s4378_s1 + $0x170] sm:$0xff] %vm1544_vm0, %v1462_v15  ;;  %v1465_v50 = vmax.f32 %v4448_v49, %v1131_v17  ;;  %4450 = vst [vmem:[#allocation9_spill] sm:$0xff] %v3705_v28  ;;  %v743_v15 = vmax.f32 %v439_v30, %v455_v33  ;;  %v741_v30 = vmax.f32 %v437_v45, %v453_v1  ;;  %v456_v33 = vld [vmem:[%s4377_s0 + $0xe00] sm:$0xff]  ;;  %v473_v17 = vld [vmem:[%s4377_s0 + $0xe88] sm:$0xff] }
  0xdb   :  { %v1129_v11 = vpop.permute.xlu0 %1128  ;;  %1246 = vrot.lane.b32.xlu1 %v3663_v34, %s1678_s13  ;;  %4451 = vst [vmem:[#allocation10_spill] sm:$0xff] %v3719_v61  ;;  %v4452_v45 = vld [vmem:[#allocation11_spill] sm:$0xff]  ;;  %v4453_v49 = vld [vmem:[#allocation12_spill] sm:$0xff]  ;;  %v463_v34 = vld [vmem:[%s4377_s0 + $0xe38] sm:$0xff] }
  0xdc   :  { %v1464_v37 = vmax.f32 %v4449_v52, %v1129_v11  ;;  %1594 = vst.msk [vmem:[%s4378_s1 + $0x188] sm:$0xff] %vm1544_vm0, %v1465_v50  ;;  %v3747_v11 = vmax.f32 %v742_v57, %v743_v15  ;;  %v746_v52 = vmax.f32 %v458_v20, %v474_v39  ;;  %v3761_v57 = vmax.f32 %v740_v3, %v741_v30  ;;  %v478_v15 = vld [vmem:[%s4377_s0 + $0xeb0] sm:$0xff]  ;;  %v479_v39 = vld [vmem:[%s4377_s0 + $0xeb8] sm:$0xff]  ;;  %v461_v30 = vld [vmem:[%s4377_s0 + $0xe28] sm:$0xff] }
  0xdd   :  { %1244 = vrot.lane.b32.xlu0 %v3677_v56, %s1678_s13  ;;  %v1135_v53 = vpop.permute.xlu1 %1134  ;;  %v462_v56 = vld [vmem:[%s4377_s0 + $0xe30] sm:$0xff]  ;;  %v744_v20 = vmax.f32 %v456_v33, %v472_v2  ;;  %v476_v33 = vld [vmem:[%s4377_s0 + $0xea0] sm:$0xff] }
  0xde   :  { %1593 = vst.msk [vmem:[%s4378_s1 + $0x180] sm:$0xff] %vm1544_vm0, %v1464_v37  ;;  %v1467_v41 = vmax.f32 %v4452_v45, %v1135_v53  ;;  %4454 = vst [vmem:[#allocation11_spill] sm:$0xff] %v3747_v11  ;;  %v747_v37 = vmax.f32 %v459_v22, %v475_v18  ;;  %v745_v22 = vmax.f32 %v457_v35, %v473_v17  ;;  %v460_v18 = vld [vmem:[%s4377_s0 + $0xe20] sm:$0xff]  ;;  %v477_v53 = vld [vmem:[%s4377_s0 + $0xea8] sm:$0xff] }
  0xdf   :  { %v1133_v1 = vpop.permute.xlu0 %1132  ;;  %1250 = vrot.lane.b32.xlu1 %v3705_v28, %s1678_s13  ;;  %4455 = vst [vmem:[#allocation12_spill] sm:$0xff] %v3761_v57  ;;  %v4456_v35 = vld [vmem:[#allocation13_spill] sm:$0xff]  ;;  %v4457_v45 = vld [vmem:[#allocation14_spill] sm:$0xff] }
  0xe0   :  { %v1466_v50 = vmax.f32 %v4453_v49, %v1133_v1  ;;  %1596 = vst.msk [vmem:[%s4378_s1 + $0x198] sm:$0xff] %vm1544_vm0, %v1467_v41  ;;  %v3789_v1 = vmax.f32 %v746_v52, %v747_v37  ;;  %v750_v49 = vmax.f32 %v462_v56, %v478_v15  ;;  %v467_v28 = vld [vmem:[%s4377_s0 + $0xe58] sm:$0xff]  ;;  %v3803_v52 = vmax.f32 %v744_v20, %v745_v22  ;;  %v482_v37 = vld [vmem:[%s4377_s0 + $0xed0] sm:$0xff]  ;;  %v465_v22 = vld [vmem:[%s4377_s0 + $0xe48] sm:$0xff] }
  0xe1   :  { %1248 = vrot.lane.b32.xlu0 %v3719_v61, %s1678_s13  ;;  %v1139_v3 = vpop.permute.xlu1 %1138  ;;  %v466_v61 = vld [vmem:[%s4377_s0 + $0xe50] sm:$0xff]  ;;  %v748_v56 = vmax.f32 %v460_v18, %v476_v33  ;;  %v483_v15 = vld [vmem:[%s4377_s0 + $0xed8] sm:$0xff]  ;;  %v480_v18 = vld [vmem:[%s4377_s0 + $0xec0] sm:$0xff] }
  0xe2   :  { %1595 = vst.msk [vmem:[%s4378_s1 + $0x190] sm:$0xff] %vm1544_vm0, %v1466_v50  ;;  %v1469_v2 = vmax.f32 %v4456_v35, %v1139_v3  ;;  %4458 = vst [vmem:[#allocation13_spill] sm:$0xff] %v3789_v1  ;;  %v751_v50 = vmax.f32 %v463_v34, %v479_v39  ;;  %v749_v34 = vmax.f32 %v461_v30, %v477_v53  ;;  %v464_v39 = vld [vmem:[%s4377_s0 + $0xe40] sm:$0xff]  ;;  %v481_v3 = vld [vmem:[%s4377_s0 + $0xec8] sm:$0xff] }
  0xe3   :  { %v1137_v17 = vpop.permute.xlu0 %1136  ;;  %1254 = vrot.lane.b32.xlu1 %v3747_v11, %s1678_s13  ;;  %4459 = vst [vmem:[#allocation14_spill] sm:$0xff] %v3803_v52  ;;  %v4460_v30 = vld [vmem:[#allocation15_spill] sm:$0xff]  ;;  %v4461_v35 = vld [vmem:[#allocation16_spill] sm:$0xff]  ;;  %v471_v11 = vld [vmem:[%s4377_s0 + $0xe78] sm:$0xff] }
  0xe4   :  { %v1468_v41 = vmax.f32 %v4457_v45, %v1137_v17  ;;  %1598 = vst.msk [vmem:[%s4378_s1 + $0x1a8] sm:$0xff] %vm1544_vm0, %v1469_v2  ;;  %v3831_v17 = vmax.f32 %v750_v49, %v751_v50  ;;  %v754_v45 = vmax.f32 %v466_v61, %v482_v37  ;;  %v3845_v49 = vmax.f32 %v748_v56, %v749_v34  ;;  %v486_v50 = vld [vmem:[%s4377_s0 + $0xef0] sm:$0xff]  ;;  %v487_v37 = vld [vmem:[%s4377_s0 + $0xef8] sm:$0xff]  ;;  %v469_v34 = vld [vmem:[%s4377_s0 + $0xe68] sm:$0xff] }
  0xe5   :  { %1252 = vrot.lane.b32.xlu0 %v3761_v57, %s1678_s13  ;;  %v1143_v20 = vpop.permute.xlu1 %1142  ;;  %v470_v57 = vld [vmem:[%s4377_s0 + $0xe70] sm:$0xff]  ;;  %v752_v61 = vmax.f32 %v464_v39, %v480_v18  ;;  %v484_v39 = vld [vmem:[%s4377_s0 + $0xee0] sm:$0xff] }
  0xe6   :  { %1597 = vst.msk [vmem:[%s4378_s1 + $0x1a0] sm:$0xff] %vm1544_vm0, %v1468_v41  ;;  %v1471_v33 = vmax.f32 %v4460_v30, %v1143_v20  ;;  %v755_v41 = vmax.f32 %v467_v28, %v483_v15  ;;  %v753_v28 = vmax.f32 %v465_v22, %v481_v3  ;;  %v468_v15 = vld [vmem:[%s4377_s0 + $0xe60] sm:$0xff]  ;;  %v485_v20 = vld [vmem:[%s4377_s0 + $0xee8] sm:$0xff]  ;;  %v4462_v22 = vld [vmem:[#allocation17_spill] sm:$0xff] }
  0xe7   :  { %v1141_v53 = vpop.permute.xlu0 %1140  ;;  %1258 = vrot.lane.b32.xlu1 %v3789_v1, %s1678_s13  ;;  %v4463_v30 = vld [vmem:[#allocation18_spill] sm:$0xff]  ;;  %v491_v1 = vld [vmem:[%s4377_s0 + $0xf18] sm:$0xff] }
  0xe8   :  { %v1470_v2 = vmax.f32 %v4461_v35, %v1141_v53  ;;  %1600 = vst.msk [vmem:[%s4378_s1 + $0x1b8] sm:$0xff] %vm1544_vm0, %v1471_v33  ;;  %v3873_v53 = vmax.f32 %v754_v45, %v755_v41  ;;  %v758_v35 = vmax.f32 %v470_v57, %v486_v50  ;;  %v3887_v45 = vmax.f32 %v752_v61, %v753_v28  ;;  %v506_v41 = vld [vmem:[%s4377_s0 + $0xf90] sm:$0xff]  ;;  %v507_v50 = vld [vmem:[%s4377_s0 + $0xf98] sm:$0xff]  ;;  %v489_v28 = vld [vmem:[%s4377_s0 + $0xf08] sm:$0xff] }
  0xe9   :  { %1256 = vrot.lane.b32.xlu0 %v3803_v52, %s1678_s13  ;;  %v1147_v56 = vpop.permute.xlu1 %1146  ;;  %v490_v52 = vld [vmem:[%s4377_s0 + $0xf10] sm:$0xff]  ;;  %v756_v57 = vmax.f32 %v468_v15, %v484_v39  ;;  %v504_v15 = vld [vmem:[%s4377_s0 + $0xf80] sm:$0xff] }
  0xea   :  { %1599 = vst.msk [vmem:[%s4378_s1 + $0x1b0] sm:$0xff] %vm1544_vm0, %v1470_v2  ;;  %v1473_v18 = vmax.f32 %v4462_v22, %v1147_v56  ;;  %v759_v2 = vmax.f32 %v471_v11, %v487_v37  ;;  %v757_v11 = vmax.f32 %v469_v34, %v485_v20  ;;  %v488_v37 = vld [vmem:[%s4377_s0 + $0xf00] sm:$0xff]  ;;  %v505_v56 = vld [vmem:[%s4377_s0 + $0xf88] sm:$0xff] }
  0xeb   :  { %v1145_v3 = vpop.permute.xlu0 %1144  ;;  %1262 = vrot.lane.b32.xlu1 %v3831_v17, %s1678_s13 }
  0xec   :  { %v1472_v33 = vmax.f32 %v4463_v30, %v1145_v3  ;;  %1602 = vst.msk [vmem:[%s4378_s1 + $0x1c8] sm:$0xff] %vm1544_vm0, %v1473_v18  ;;  %v3915_v22 = vmax.f32 %v758_v35, %v759_v2  ;;  %v762_v18 = vmax.f32 %v490_v52, %v506_v41  ;;  %v763_v3 = vmax.f32 %v491_v1, %v507_v50  ;;  %v494_v30 = vld [vmem:[%s4377_s0 + $0xf30] sm:$0xff]  ;;  %v511_v35 = vld [vmem:[%s4377_s0 + $0xfb8] sm:$0xff]  ;;  %v492_v2 = vld [vmem:[%s4377_s0 + $0xf20] sm:$0xff] }
  0xed   :  { %1260 = vrot.lane.b32.xlu0 %v3845_v49, %s1678_s13  ;;  %v1151_v61 = vpop.permute.xlu1 %1150  ;;  %v761_v1 = vmax.f32 %v489_v28, %v505_v56  ;;  %v510_v52 = vld [vmem:[%s4377_s0 + $0xfb0] sm:$0xff]  ;;  %v508_v41 = vld [vmem:[%s4377_s0 + $0xfa0] sm:$0xff]  ;;  %v509_v50 = vld [vmem:[%s4377_s0 + $0xfa8] sm:$0xff] }
  0xee   :  { %1601 = vst.msk [vmem:[%s4378_s1 + $0x1c0] sm:$0xff] %vm1544_vm0, %v1472_v33  ;;  %v1475_v34 = vmax.f32 %v2663_v54, %v1151_v61  ;;  %v495_v33 = vld [vmem:[%s4377_s0 + $0xf38] sm:$0xff]  ;;  %v3929_v54 = vmax.f32 %v756_v57, %v757_v11  ;;  %v493_v11 = vld [vmem:[%s4377_s0 + $0xf28] sm:$0xff]  ;;  %v766_v56 = vmax.f32 %v494_v30, %v510_v52  ;;  %v512_v52 = vld [vmem:[%s4377_s0 + $0xfc0] sm:$0xff] }
  0xef   :  { %v1149_v39 = vpop.permute.xlu0 %1148  ;;  %1266 = vrot.lane.b32.xlu1 %v3873_v53, %s1678_s13  ;;  %v515_v30 = vld [vmem:[%s4377_s0 + $0xfd8] sm:$0xff] }
  0xf0   :  { %v1474_v20 = vmax.f32 %v2673_v43, %v1149_v39  ;;  %1604 = vst.msk [vmem:[%s4378_s1 + $0x1d8] sm:$0xff] %vm1544_vm0, %v1475_v34  ;;  %v760_v43 = vmax.f32 %v488_v37, %v504_v15  ;;  %v3957_v15 = vmax.f32 %v762_v18, %v763_v3  ;;  %v767_v34 = vmax.f32 %v495_v33, %v511_v35  ;;  %v498_v39 = vld [vmem:[%s4377_s0 + $0xf50] sm:$0xff]  ;;  %v496_v33 = vld [vmem:[%s4377_s0 + $0xf40] sm:$0xff]  ;;  %v513_v35 = vld [vmem:[%s4377_s0 + $0xfc8] sm:$0xff] }
  0xf1   :  { %1264 = vrot.lane.b32.xlu0 %v3887_v45, %s1678_s13  ;;  %v1155_v57 = vpop.permute.xlu1 %1154  ;;  %v765_v18 = vmax.f32 %v493_v11, %v509_v50  ;;  %v514_v3 = vld [vmem:[%s4377_s0 + $0xfd0] sm:$0xff] }
  0xf2   :  { %1603 = vst.msk [vmem:[%s4378_s1 + $0x1d0] sm:$0xff] %vm1544_vm0, %v1474_v20  ;;  %v1477_v37 = vmax.f32 %v2697_v5, %v1155_v57  ;;  %v499_v20 = vld [vmem:[%s4377_s0 + $0xf58] sm:$0xff]  ;;  %v3971_v5 = vmax.f32 %v760_v43, %v761_v1  ;;  %v497_v1 = vld [vmem:[%s4377_s0 + $0xf48] sm:$0xff]  ;;  %v770_v50 = vmax.f32 %v498_v39, %v514_v3  ;;  %v516_v3 = vld [vmem:[%s4377_s0 + $0xfe0] sm:$0xff] }
  0xf3   :  { %v1153_v61 = vpop.permute.xlu0 %1152  ;;  %1270 = vrot.lane.b32.xlu1 %v3915_v22, %s1678_s13  ;;  %v519_v39 = vld [vmem:[%s4377_s0 + $0xff8] sm:$0xff] }
  0xf4   :  { %v1476_v28 = vmax.f32 %v2711_v16, %v1153_v61  ;;  %1606 = vst.msk [vmem:[%s4378_s1 + $0x1e8] sm:$0xff] %vm1544_vm0, %v1477_v37  ;;  %v764_v16 = vmax.f32 %v492_v2, %v508_v41  ;;  %v3999_v41 = vmax.f32 %v766_v56, %v767_v34  ;;  %v771_v37 = vmax.f32 %v499_v20, %v515_v30  ;;  %v502_v61 = vld [vmem:[%s4377_s0 + $0xf70] sm:$0xff]  ;;  %v500_v20 = vld [vmem:[%s4377_s0 + $0xf60] sm:$0xff]  ;;  %v517_v30 = vld [vmem:[%s4377_s0 + $0xfe8] sm:$0xff] }
  0xf5   :  { %1268 = vrot.lane.b32.xlu0 %v3929_v54, %s1678_s13  ;;  %v1159_v43 = vpop.permute.xlu1 %1158  ;;  %v769_v56 = vmax.f32 %v497_v1, %v513_v35  ;;  %v518_v34 = vld [vmem:[%s4377_s0 + $0xff0] sm:$0xff] }
  0xf6   :  { %1605 = vst.msk [vmem:[%s4378_s1 + $0x1e0] sm:$0xff] %vm1544_vm0, %v1476_v28  ;;  %v1479_v2 = vmax.f32 %v2739_v40, %v1159_v43  ;;  %v503_v28 = vld [vmem:[%s4377_s0 + $0xf78] sm:$0xff]  ;;  %v4013_v40 = vmax.f32 %v764_v16, %v765_v18  ;;  %v501_v18 = vld [vmem:[%s4377_s0 + $0xf68] sm:$0xff]  ;;  %v774_v35 = vmax.f32 %v502_v61, %v518_v34 }
  0xf7   :  { %v1157_v57 = vpop.permute.xlu0 %1156  ;;  %1274 = vrot.lane.b32.xlu1 %v3957_v15, %s1678_s13 }
  0xf8   :  { %v1478_v11 = vmax.f32 %v2753_v27, %v1157_v57  ;;  %1608 = vst.msk [vmem:[%s4378_s1 + $0x1f8] sm:$0xff] %vm1544_vm0, %v1479_v2  ;;  %v768_v27 = vmax.f32 %v496_v33, %v512_v52  ;;  %v4041_v52 = vmax.f32 %v770_v50, %v771_v37  ;;  %v775_v2 = vmax.f32 %v503_v28, %v519_v39 }
  0xf9   :  { %1272 = vrot.lane.b32.xlu0 %v3971_v5, %s1678_s13  ;;  %v1163_v16 = vpop.permute.xlu1 %1162 }
  0xfa   :  { %1607 = vst.msk [vmem:[%s4378_s1 + $0x1f0] sm:$0xff] %vm1544_vm0, %v1478_v11  ;;  %v1481_v33 = vmax.f32 %v2781_v9, %v1163_v16  ;;  %v4049_v57 = vmax.f32 %v768_v27, %v769_v56  ;;  %v772_v9 = vmax.f32 %v500_v20, %v516_v3  ;;  %v773_v11 = vmax.f32 %v501_v18, %v517_v30 }
  0xfb   :  { %v1161_v43 = vpop.permute.xlu0 %1160  ;;  %1278 = vrot.lane.b32.xlu1 %v3999_v41, %s1678_s13  ;;  %v4059_v28 = vmax.f32 %v774_v35, %v775_v2 }
  0xfc   :  { %v1480_v1 = vmax.f32 %v2795_v46, %v1161_v43  ;;  %1610 = vst.msk [vmem:[%s4378_s1 + $0x208] sm:$0xff] %vm1544_vm0, %v1481_v33  ;;  %v4067_v27 = vmax.f32 %v772_v9, %v773_v11 }
  0xfd   :  { %1276 = vrot.lane.b32.xlu0 %v4013_v40, %s1678_s13  ;;  %v1167_v46 = vpop.permute.xlu1 %1166 }
  0xfe   :  { %1609 = vst.msk [vmem:[%s4378_s1 + $0x200] sm:$0xff] %vm1544_vm0, %v1480_v1  ;;  %v1483_v50 = vmax.f32 %v2823_v59, %v1167_v46 }
  0xff   :  { %v1165_v37 = vpop.permute.xlu0 %1164  ;;  %1282 = vrot.lane.b32.xlu1 %v4041_v52, %s1678_s13 }
 0x100   :  { %v1482_v61 = vmax.f32 %v2837_v62, %v1165_v37  ;;  %1612 = vst.msk [vmem:[%s4378_s1 + $0x218] sm:$0xff] %vm1544_vm0, %v1483_v50 }
 0x101   :  { %1280 = vrot.lane.b32.xlu0 %v4049_v57, %s1678_s13  ;;  %v1171_v59 = vpop.permute.xlu1 %1170 }
 0x102   :  { %1611 = vst.msk [vmem:[%s4378_s1 + $0x210] sm:$0xff] %vm1544_vm0, %v1482_v61  ;;  %v1485_v62 = vmax.f32 %v2865_v8, %v1171_v59 }
 0x103   :  { %v1169_v56 = vpop.permute.xlu0 %1168  ;;  %1286 = vrot.lane.b32.xlu1 %v4059_v28, %s1678_s13 }
 0x104   :  { %v1484_v34 = vmax.f32 %v2879_v12, %v1169_v56  ;;  %1614 = vst.msk [vmem:[%s4378_s1 + $0x228] sm:$0xff] %vm1544_vm0, %v1485_v62 }
 0x105   :  { %1284 = vrot.lane.b32.xlu0 %v4067_v27, %s1678_s13  ;;  %v1175_v8 = vpop.permute.xlu1 %1174 }
 0x106   :  { %1613 = vst.msk [vmem:[%s4378_s1 + $0x220] sm:$0xff] %vm1544_vm0, %v1484_v34  ;;  %v1487_v39 = vmax.f32 %v2907_v38, %v1175_v8 }
 0x107   :  { %v1173_v12 = vpop.permute.xlu0 %1172 }
 0x108   :  { %v1486_v20 = vmax.f32 %v2921_v29, %v1173_v12  ;;  %1616 = vst.msk [vmem:[%s4378_s1 + $0x238] sm:$0xff] %vm1544_vm0, %v1487_v39 }
 0x109   :  { %v1179_v16 = vpop.permute.xlu1 %1178 }
 0x10a   :  { %1615 = vst.msk [vmem:[%s4378_s1 + $0x230] sm:$0xff] %vm1544_vm0, %v1486_v20  ;;  %v1489_v18 = vmax.f32 %v2949_v19, %v1179_v16 }
 0x10b   :  { %v1177_v3 = vpop.permute.xlu0 %1176 }
 0x10c   :  { %v1488_v30 = vmax.f32 %v2963_v44, %v1177_v3  ;;  %1618 = vst.msk [vmem:[%s4378_s1 + $0x248] sm:$0xff] %vm1544_vm0, %v1489_v18 }
 0x10d   :  { %v1183_v38 = vpop.permute.xlu1 %1182 }
 0x10e   :  { %1617 = vst.msk [vmem:[%s4378_s1 + $0x240] sm:$0xff] %vm1544_vm0, %v1488_v30  ;;  %v1491_v29 = vmax.f32 %v2991_v25, %v1183_v38  ;;  %v4464_v38 = vld [vmem:[#allocation19_spill] sm:$0xff] }
 0x10f   :  { %v1181_v33 = vpop.permute.xlu0 %1180 }
 0x110   :  { %v1490_v43 = vmax.f32 %v3005_v60, %v1181_v33  ;;  %1620 = vst.msk [vmem:[%s4378_s1 + $0x258] sm:$0xff] %vm1544_vm0, %v1491_v29 }
 0x111   :  { %v1187_v19 = vpop.permute.xlu1 %1186 }
 0x112   :  { %1619 = vst.msk [vmem:[%s4378_s1 + $0x250] sm:$0xff] %vm1544_vm0, %v1490_v43  ;;  %v1493_v44 = vmax.f32 %v3033_v23, %v1187_v19  ;;  %v4466_v19 = vld [vmem:[#allocation21_spill] sm:$0xff] }
 0x113   :  { %v1185_v1 = vpop.permute.xlu0 %1184 }
 0x114   :  { %v1492_v35 = vmax.f32 %v3047_v13, %v1185_v1  ;;  %1622 = vst.msk [vmem:[%s4378_s1 + $0x268] sm:$0xff] %vm1544_vm0, %v1493_v44  ;;  %v4467_v1 = vld [vmem:[#allocation2_spill] sm:$0xff] }
 0x115   :  { %v1191_v25 = vpop.permute.xlu1 %1190 }
 0x116   :  { %1621 = vst.msk [vmem:[%s4378_s1 + $0x260] sm:$0xff] %vm1544_vm0, %v1492_v35  ;;  %v1495_v60 = vmax.f32 %v3075_v4, %v1191_v25 }
 0x117   :  { %v1189_v2 = vpop.permute.xlu0 %1188 }
 0x118   :  { %v1494_v9 = vmax.f32 %v3089_v32, %v1189_v2  ;;  %1624 = vst.msk [vmem:[%s4378_s1 + $0x278] sm:$0xff] %vm1544_vm0, %v1495_v60  ;;  %v4468_v60 = vld [vmem:[#allocation22_spill] sm:$0xff] }
 0x119   :  { %v1195_v23 = vpop.permute.xlu1 %1194 }
 0x11a   :  { %1623 = vst.msk [vmem:[%s4378_s1 + $0x270] sm:$0xff] %vm1544_vm0, %v1494_v9  ;;  %v1497_v13 = vmax.f32 %v3117_v47, %v1195_v23  ;;  %v4469_v23 = vld [vmem:[#allocation3_spill] sm:$0xff] }
 0x11b   :  { %v1193_v11 = vpop.permute.xlu0 %1192 }
 0x11c   :  { %v1496_v46 = vmax.f32 %v3131_v51, %v1193_v11  ;;  %1626 = vst.msk [vmem:[%s4378_s1 + $0x288] sm:$0xff] %vm1544_vm0, %v1497_v13 }
 0x11d   :  { %v1199_v4 = vpop.permute.xlu1 %1198 }
 0x11e   :  { %1625 = vst.msk [vmem:[%s4378_s1 + $0x280] sm:$0xff] %vm1544_vm0, %v1496_v46  ;;  %v1499_v32 = vmax.f32 %v3159_v14, %v1199_v4  ;;  %v4470_v46 = vld [vmem:[#allocation4_spill] sm:$0xff] }
 0x11f   :  { %v1197_v50 = vpop.permute.xlu0 %1196 }
 0x120   :  { %v1498_v37 = vmax.f32 %v3173_v6, %v1197_v50  ;;  %1628 = vst.msk [vmem:[%s4378_s1 + $0x298] sm:$0xff] %vm1544_vm0, %v1499_v32  ;;  %v4471_v50 = vld [vmem:[#allocation5_spill] sm:$0xff] }
 0x121   :  { %v1203_v47 = vpop.permute.xlu1 %1202 }
 0x122   :  { %1627 = vst.msk [vmem:[%s4378_s1 + $0x290] sm:$0xff] %vm1544_vm0, %v1498_v37  ;;  %v1501_v51 = vmax.f32 %v3201_v55, %v1203_v47 }
 0x123   :  { %v1201_v61 = vpop.permute.xlu0 %1200 }
 0x124   :  { %v1500_v59 = vmax.f32 %v3215_v26, %v1201_v61  ;;  %1630 = vst.msk [vmem:[%s4378_s1 + $0x2a8] sm:$0xff] %vm1544_vm0, %v1501_v51  ;;  %v4472_v51 = vld [vmem:[#allocation6_spill] sm:$0xff] }
 0x125   :  { %v1207_v14 = vpop.permute.xlu1 %1206 }
 0x126   :  { %1629 = vst.msk [vmem:[%s4378_s1 + $0x2a0] sm:$0xff] %vm1544_vm0, %v1500_v59  ;;  %v1503_v6 = vmax.f32 %v3243_v0, %v1207_v14  ;;  %v4473_v14 = vld [vmem:[#allocation7_spill] sm:$0xff] }
 0x127   :  { %v1205_v62 = vpop.permute.xlu0 %1204 }
 0x128   :  { %v1502_v56 = vmax.f32 %v3257_v48, %v1205_v62  ;;  %1632 = vst.msk [vmem:[%s4378_s1 + $0x2b8] sm:$0xff] %vm1544_vm0, %v1503_v6 }
 0x129   :  { %v1211_v55 = vpop.permute.xlu1 %1210 }
 0x12a   :  { %1631 = vst.msk [vmem:[%s4378_s1 + $0x2b0] sm:$0xff] %vm1544_vm0, %v1502_v56  ;;  %v1505_v26 = vmax.f32 %v3285_v36, %v1211_v55  ;;  %v4474_v56 = vld [vmem:[#allocation8_spill] sm:$0xff] }
 0x12b   :  { %v1209_v34 = vpop.permute.xlu0 %1208 }
 0x12c   :  { %v1504_v8 = vmax.f32 %v3299_v7, %v1209_v34  ;;  %1634 = vst.msk [vmem:[%s4378_s1 + $0x2c8] sm:$0xff] %vm1544_vm0, %v1505_v26  ;;  %v4475_v34 = vld [vmem:[#allocation9_spill] sm:$0xff] }
 0x12d   :  { %v1215_v0 = vpop.permute.xlu1 %1214 }
 0x12e   :  { %1633 = vst.msk [vmem:[%s4378_s1 + $0x2c0] sm:$0xff] %vm1544_vm0, %v1504_v8  ;;  %v1507_v48 = vmax.f32 %v3327_v10, %v1215_v0 }
 0x12f   :  { %v1213_v39 = vpop.permute.xlu0 %1212 }
 0x130   :  { %v1506_v12 = vmax.f32 %v3341_v31, %v1213_v39  ;;  %1636 = vst.msk [vmem:[%s4378_s1 + $0x2d8] sm:$0xff] %vm1544_vm0, %v1507_v48  ;;  %v4476_v48 = vld [vmem:[#allocation10_spill] sm:$0xff] }
 0x131   :  { %v1219_v36 = vpop.permute.xlu1 %1218 }
 0x132   :  { %1635 = vst.msk [vmem:[%s4378_s1 + $0x2d0] sm:$0xff] %vm1544_vm0, %v1506_v12  ;;  %v1509_v7 = vmax.f32 %v3369_v24, %v1219_v36  ;;  %v4477_v36 = vld [vmem:[#allocation11_spill] sm:$0xff] }
 0x133   :  { %v1217_v20 = vpop.permute.xlu0 %1216 }
 0x134   :  { %v1508_v16 = vmax.f32 %v3383_v58, %v1217_v20  ;;  %1638 = vst.msk [vmem:[%s4378_s1 + $0x2e8] sm:$0xff] %vm1544_vm0, %v1509_v7 }
 0x135   :  { %v1223_v10 = vpop.permute.xlu1 %1222 }
 0x136   :  { %1637 = vst.msk [vmem:[%s4378_s1 + $0x2e0] sm:$0xff] %vm1544_vm0, %v1508_v16  ;;  %v1511_v31 = vmax.f32 %v3411_v63, %v1223_v10  ;;  %v4478_v16 = vld [vmem:[#allocation12_spill] sm:$0xff] }
 0x137   :  { %v1221_v18 = vpop.permute.xlu0 %1220 }
 0x138   :  { %v1510_v3 = vmax.f32 %v3425_v21, %v1221_v18  ;;  %1640 = vst.msk [vmem:[%s4378_s1 + $0x2f8] sm:$0xff] %vm1544_vm0, %v1511_v31  ;;  %v4465_v21 = vld [vmem:[#allocation20_spill] sm:$0xff]  ;;  %v4479_v18 = vld [vmem:[#allocation13_spill] sm:$0xff] }
 0x139   :  { %v1227_v24 = vpop.permute.xlu1 %1226 }
 0x13a   :  { %1639 = vst.msk [vmem:[%s4378_s1 + $0x2f0] sm:$0xff] %vm1544_vm0, %v1510_v3  ;;  %v1513_v58 = vmax.f32 %v3453_v42, %v1227_v24 }
 0x13b   :  { %v1225_v30 = vpop.permute.xlu0 %1224 }
 0x13c   :  { %v1512_v29 = vmax.f32 %v4464_v38, %v1225_v30  ;;  %1642 = vst.msk [vmem:[%s4378_s1 + $0x308] sm:$0xff] %vm1544_vm0, %v1513_v58  ;;  %v4480_v58 = vld [vmem:[#allocation14_spill] sm:$0xff] }
 0x13d   :  { %v1231_v63 = vpop.permute.xlu1 %1230 }
 0x13e   :  { %1641 = vst.msk [vmem:[%s4378_s1 + $0x300] sm:$0xff] %vm1544_vm0, %v1512_v29  ;;  %v1515_v33 = vmax.f32 %v4465_v21, %v1231_v63 }
 0x13f   :  { %v1229_v43 = vpop.permute.xlu0 %1228 }
 0x140   :  { %v1514_v44 = vmax.f32 %v4466_v19, %v1229_v43  ;;  %1644 = vst.msk [vmem:[%s4378_s1 + $0x318] sm:$0xff] %vm1544_vm0, %v1515_v33 }
 0x141   :  { %v1235_v42 = vpop.permute.xlu1 %1234 }
 0x142   :  { %1643 = vst.msk [vmem:[%s4378_s1 + $0x310] sm:$0xff] %vm1544_vm0, %v1514_v44  ;;  %v1517_v35 = vmax.f32 %v4467_v1, %v1235_v42 }
 0x143   :  { %v1233_v25 = vpop.permute.xlu0 %1232 }
 0x144   :  { %v1516_v2 = vmax.f32 %v4468_v60, %v1233_v25  ;;  %1646 = vst.msk [vmem:[%s4378_s1 + $0x328] sm:$0xff] %vm1544_vm0, %v1517_v35 }
 0x145   :  { %v1239_v9 = vpop.permute.xlu1 %1238 }
 0x146   :  { %1645 = vst.msk [vmem:[%s4378_s1 + $0x320] sm:$0xff] %vm1544_vm0, %v1516_v2  ;;  %v1519_v13 = vmax.f32 %v4469_v23, %v1239_v9 }
 0x147   :  { %v1237_v11 = vpop.permute.xlu0 %1236 }
 0x148   :  { %v1518_v4 = vmax.f32 %v4470_v46, %v1237_v11  ;;  %1648 = vst.msk [vmem:[%s4378_s1 + $0x338] sm:$0xff] %vm1544_vm0, %v1519_v13 }
 0x149   :  { %v1243_v32 = vpop.permute.xlu1 %1242 }
 0x14a   :  { %1647 = vst.msk [vmem:[%s4378_s1 + $0x330] sm:$0xff] %vm1544_vm0, %v1518_v4  ;;  %v1521_v37 = vmax.f32 %v4471_v50, %v1243_v32 }
 0x14b   :  { %v1241_v47 = vpop.permute.xlu0 %1240 }
 0x14c   :  { %v1520_v61 = vmax.f32 %v4472_v51, %v1241_v47  ;;  %1650 = vst.msk [vmem:[%s4378_s1 + $0x348] sm:$0xff] %vm1544_vm0, %v1521_v37 }
 0x14d   :  { %v1247_v59 = vpop.permute.xlu1 %1246 }
 0x14e   :  { %1649 = vst.msk [vmem:[%s4378_s1 + $0x340] sm:$0xff] %vm1544_vm0, %v1520_v61  ;;  %v1523_v6 = vmax.f32 %v4473_v14, %v1247_v59 }
 0x14f   :  { %v1245_v62 = vpop.permute.xlu0 %1244 }
 0x150   :  { %v1522_v55 = vmax.f32 %v4474_v56, %v1245_v62  ;;  %1652 = vst.msk [vmem:[%s4378_s1 + $0x358] sm:$0xff] %vm1544_vm0, %v1523_v6 }
 0x151   :  { %v1251_v26 = vpop.permute.xlu1 %1250 }
 0x152   :  { %1651 = vst.msk [vmem:[%s4378_s1 + $0x350] sm:$0xff] %vm1544_vm0, %v1522_v55  ;;  %v1525_v8 = vmax.f32 %v4475_v34, %v1251_v26 }
 0x153   :  { %v1249_v0 = vpop.permute.xlu0 %1248 }
 0x154   :  { %v1524_v39 = vmax.f32 %v4476_v48, %v1249_v0  ;;  %1654 = vst.msk [vmem:[%s4378_s1 + $0x368] sm:$0xff] %vm1544_vm0, %v1525_v8 }
 0x155   :  { %v1255_v12 = vpop.permute.xlu1 %1254 }
 0x156   :  { %1653 = vst.msk [vmem:[%s4378_s1 + $0x360] sm:$0xff] %vm1544_vm0, %v1524_v39  ;;  %v1527_v7 = vmax.f32 %v4477_v36, %v1255_v12 }
 0x157   :  { %v1253_v20 = vpop.permute.xlu0 %1252 }
 0x158   :  { %v1526_v10 = vmax.f32 %v4478_v16, %v1253_v20  ;;  %1656 = vst.msk [vmem:[%s4378_s1 + $0x378] sm:$0xff] %vm1544_vm0, %v1527_v7 }
 0x159   :  { %v1259_v31 = vpop.permute.xlu1 %1258 }
 0x15a   :  { %1655 = vst.msk [vmem:[%s4378_s1 + $0x370] sm:$0xff] %vm1544_vm0, %v1526_v10  ;;  %v1529_v3 = vmax.f32 %v4479_v18, %v1259_v31 }
 0x15b   :  { %v1257_v24 = vpop.permute.xlu0 %1256 }
 0x15c   :  { %v1528_v30 = vmax.f32 %v4480_v58, %v1257_v24  ;;  %1658 = vst.msk [vmem:[%s4378_s1 + $0x388] sm:$0xff] %vm1544_vm0, %v1529_v3 }
 0x15d   :  { %v1263_v38 = vpop.permute.xlu1 %1262 }
 0x15e   :  { %1657 = vst.msk [vmem:[%s4378_s1 + $0x380] sm:$0xff] %vm1544_vm0, %v1528_v30  ;;  %v1531_v29 = vmax.f32 %v3831_v17, %v1263_v38 }
 0x15f   :  { %v1261_v63 = vpop.permute.xlu0 %1260 }
 0x160   :  { %v1530_v21 = vmax.f32 %v3845_v49, %v1261_v63  ;;  %1660 = vst.msk [vmem:[%s4378_s1 + $0x398] sm:$0xff] %vm1544_vm0, %v1531_v29 }
 0x161   :  { %v1267_v33 = vpop.permute.xlu1 %1266 }
 0x162   :  { %1659 = vst.msk [vmem:[%s4378_s1 + $0x390] sm:$0xff] %vm1544_vm0, %v1530_v21  ;;  %v1533_v43 = vmax.f32 %v3873_v53, %v1267_v33 }
 0x163   :  { %v1265_v19 = vpop.permute.xlu0 %1264 }
 0x164   :  { %v1532_v44 = vmax.f32 %v3887_v45, %v1265_v19  ;;  %1662 = vst.msk [vmem:[%s4378_s1 + $0x3a8] sm:$0xff] %vm1544_vm0, %v1533_v43 }
 0x165   :  { %v1271_v17 = vpop.permute.xlu1 %1270 }
 0x166   :  { %1661 = vst.msk [vmem:[%s4378_s1 + $0x3a0] sm:$0xff] %vm1544_vm0, %v1532_v44  ;;  %v1535_v49 = vmax.f32 %v3915_v22, %v1271_v17 }
 0x167   :  { %v1269_v42 = vpop.permute.xlu0 %1268 }
 0x168   :  { %v1534_v1 = vmax.f32 %v3929_v54, %v1269_v42  ;;  %1664 = vst.msk [vmem:[%s4378_s1 + $0x3b8] sm:$0xff] %vm1544_vm0, %v1535_v49 }
 0x169   :  { %v1275_v53 = vpop.permute.xlu1 %1274 }
 0x16a   :  { %1663 = vst.msk [vmem:[%s4378_s1 + $0x3b0] sm:$0xff] %vm1544_vm0, %v1534_v1  ;;  %v1537_v45 = vmax.f32 %v3957_v15, %v1275_v53 }
 0x16b   :  { %v1273_v35 = vpop.permute.xlu0 %1272 }
 0x16c   :  { %v1536_v25 = vmax.f32 %v3971_v5, %v1273_v35  ;;  %1666 = vst.msk [vmem:[%s4378_s1 + $0x3c8] sm:$0xff] %vm1544_vm0, %v1537_v45 }
 0x16d   :  { %v1279_v22 = vpop.permute.xlu1 %1278 }
 0x16e   :  { %1665 = vst.msk [vmem:[%s4378_s1 + $0x3c0] sm:$0xff] %vm1544_vm0, %v1536_v25  ;;  %v1539_v54 = vmax.f32 %v3999_v41, %v1279_v22 }
 0x16f   :  { %v1277_v60 = vpop.permute.xlu0 %1276 }
 0x170   :  { %v1538_v2 = vmax.f32 %v4013_v40, %v1277_v60  ;;  %1668 = vst.msk [vmem:[%s4378_s1 + $0x3d8] sm:$0xff] %vm1544_vm0, %v1539_v54 }
 0x171   :  { %v1283_v15 = vpop.permute.xlu1 %1282 }
 0x172   :  { %1667 = vst.msk [vmem:[%s4378_s1 + $0x3d0] sm:$0xff] %vm1544_vm0, %v1538_v2  ;;  %v1541_v5 = vmax.f32 %v4041_v52, %v1283_v15 }
 0x173   :  { %v1281_v9 = vpop.permute.xlu0 %1280 }
 0x174   :  { %v1540_v23 = vmax.f32 %v4049_v57, %v1281_v9  ;;  %1670 = vst.msk [vmem:[%s4378_s1 + $0x3e8] sm:$0xff] %vm1544_vm0, %v1541_v5 }
 0x175   :  { %v1287_v41 = vpop.permute.xlu1 %1286 }
 0x176   :  { %1669 = vst.msk [vmem:[%s4378_s1 + $0x3e0] sm:$0xff] %vm1544_vm0, %v1540_v23  ;;  %v1543_v40 = vmax.f32 %v4059_v28, %v1287_v41 }
 0x177   :  { %v1285_v13 = vpop.permute.xlu0 %1284 }
 0x178   :  { %v1542_v11 = vmax.f32 %v4067_v27, %v1285_v13  ;;  %1672 = vst.msk [vmem:[%s4378_s1 + $0x3f8] sm:$0xff] %vm1544_vm0, %v1543_v40 }
 0x17a   :  { %1671 = vst.msk [vmem:[%s4378_s1 + $0x3f0] sm:$0xff] %vm1544_vm0, %v1542_v11 }

// kernel: cnn_vanilla_forward.11
= control target key start
LH: loop header
LB: loop body
LE: loop exit
PB: predicated region body
PF: predicated region fallthrough
CT: control target
= control target key end

     0   :  { %s1520_s12 = smov 0   ;;  %s1911_s0 = inlined_call_operand.vmem [shape: bf16[1024,216], index: 0, kind: input, shape index: {}]   ;;  %s1912_s1 = inlined_call_operand.vmem [shape: bf16[216,16], index: 1, kind: input, shape index: {}]   ;;  %s1913_s2 = inlined_call_operand.vmem [shape: f32[1,16], index: 2, kind: input, shape index: {}]   ;;  %s1914_s3 = inlined_call_operand.vmem [shape: f32[1024,16], index: 3, kind: output, shape index: {}]  }
   0x1 LB: > { %s1220_s13 = sadd.s32 4294967295, %s1497_s12   ;;  %p1224_p0 = scmp.ge.s32.totalorder %s1497_s12, 1  ;;  %s1497_s12 = sphi %s1520_s12, %s13_s12  }
   0x2   : > { %p139_p1 = scmp.lt.s32.totalorder %s1497_s12, 3 }
   0x4   : > { %p140_p2 = pnand %p1224_p0, %p139_p1 }
   0x5   : > { %s1225_s18 = sshll.u32 (!%p140_p2), %s1220_s13, 6 }
   0x6   : > { %143 = sbr.rel (%p140_p2) target bundleno = 390 (0x186), region = 32  ;;  %p165_p3 = scmp.lt.s32.totalorder (!%p140_p2), %s1225_s18, 127 }
   0xb   : > { %v1381_v0 = vld [vmem:[%s1912_s1 + $0x38] sm:$0xff]   ;;  %v1499_v1 = vmov 0   ;;  %v1382_v2 = vld [vmem:[%s1912_s1 + $0x30] sm:$0xff]   ;;  %s1916_s18 = smov (!%p165_p3, %s1225_s18), 127  ;;  %v1383_v3 = vld [vmem:[%s1912_s1 + $0x28] sm:$0xff]   ;;  %vm645_vm0 = vcmask 719872  }
   0xc   : > { %746 = vmatprep.subr.bf16.mxu0 %v1499_v1  ;;  %1344 = vmatprep.subr.bf16.mxu1 %v1499_v1  ;;  %s1343_s21 = sshll.u32 %s1916_s18, 3  ;;  %v1384_v4 = vld [vmem:[%s1912_s1 + $0x20] sm:$0xff]   ;;  %v1385_v5 = vld [vmem:[%s1912_s1 + $0x18] sm:$0xff]   ;;  %v1386_v8 = vld [vmem:[%s1912_s1 + $0x10] sm:$0xff]   ;;  %vm742_vm1 = vcmask 1043456   ;;  %vm1099_vm2 = vcmask 130048  }
   0xd   : > { %747 = vmatpush1.bf16.msra.mxu0 %v1381_v0  ;;  %1358 = vmatpush1.bf16.msra.mxu1 %v1381_v0  ;;  %s1556_s26 = scalar_lea.vmem %s1911_s0, %s1343_s21  ;;  %v1387_v9 = vld [vmem:[%s1912_s1 + $0x8] sm:$0xff]   ;;  %v1388_v10 = vld [vmem:[%s1912_s1] sm:$0xff]   ;;  %v1391_v14 = vld [vmem:[%s1912_s1 + $0x58] sm:$0xff]   ;;  %s1716_s28 = scalar_lea.vmem %s1914_s3, %s1343_s21 }
   0xe   : > { %748 = vmatprep.subr.bf16.mxu0 %v1499_v1  ;;  %1345 = vmatprep.subr.bf16.mxu1 %v1499_v1  ;;  %v1397_v6 = vld [vmem:[%s1556_s26 + $0x4] ss:$8 sps:$4 sm:$0xff]   ;;  %v1389_v11 = vld [vmem:[%s1912_s1 + $0x68] ss:$0 sps:$4 sm:$0xff]   ;;  %v1392_v15 = vld [vmem:[%s1912_s1 + $0x50] sm:$0xff]  }
   0xf   : > { %1309 = vmatprep.mubr.msk.bf16.mxu0 %vm645_vm0, %v1397_v6  ;;  %v1400_v7 = vld [vmem:[%s1556_s26 + $0x104] ss:$8 sps:$4 sm:$0xff]   ;;  %v744_v12 = vsel %vm742_vm1, %v1389_v11, 0  ;;  %v1395_v18 = vld [vmem:[%s1556_s26] ss:$8 sps:$4 sm:$0xff]  }
  0x10   : > { %1325 = vmatprep.mubr.msk.bf16.mxu1 %vm645_vm0, %v1400_v7  ;;  %v1390_v13 = vld [vmem:[%s1912_s1 + $0x60] sm:$0xff]   ;;  %v1393_v16 = vld [vmem:[%s1912_s1 + $0x48] sm:$0xff]   ;;  %v1401_v20 = vld [vmem:[%s1556_s26 + $0x14] ss:$8 sps:$4 sm:$0xff]  }
  0x11   : > { %749 = vmatpush1.bf16.msra.mxu0 %v1382_v2  ;;  %1359 = vmatpush1.bf16.msra.mxu1 %v1382_v2  ;;  %v1394_v17 = vld [vmem:[%s1912_s1 + $0x40] sm:$0xff]   ;;  %v1403_v21 = vld [vmem:[%s1556_s26 + $0x114] ss:$8 sps:$4 sm:$0xff]   ;;  %v1405_v22 = vld [vmem:[%s1556_s26 + $0x10] ss:$8 sps:$4 sm:$0xff]  }
  0x12   : > { %750 = vmatprep.subr.bf16.mxu0 %v1499_v1  ;;  %1346 = vmatprep.subr.bf16.mxu1 %v1499_v1  ;;  %v1398_v19 = vld [vmem:[%s1556_s26 + $0x100] ss:$8 sps:$4 sm:$0xff]   ;;  %v1406_v23 = vld [vmem:[%s1556_s26 + $0x110] ss:$8 sps:$4 sm:$0xff]   ;;  %v1407_v24 = vld [vmem:[%s1556_s26 + $0x24] ss:$8 sps:$4 sm:$0xff]  }
  0x13   : > { %v1409_v25 = vld [vmem:[%s1556_s26 + $0x124] ss:$8 sps:$4 sm:$0xff]   ;;  %v1411_v26 = vld [vmem:[%s1556_s26 + $0x20] ss:$8 sps:$4 sm:$0xff]   ;;  %v1413_v28 = vld [vmem:[%s1556_s26 + $0x34] ss:$8 sps:$4 sm:$0xff]  }
  0x14   : > { %v1412_v27 = vld [vmem:[%s1556_s26 + $0x120] ss:$8 sps:$4 sm:$0xff]   ;;  %v1415_v29 = vld [vmem:[%s1556_s26 + $0x134] ss:$8 sps:$4 sm:$0xff]   ;;  %v1417_v30 = vld [vmem:[%s1556_s26 + $0x30] ss:$8 sps:$4 sm:$0xff]  }
  0x15   : > { %751 = vmatpush1.bf16.msra.mxu0 %v1383_v3  ;;  %1360 = vmatpush1.bf16.msra.mxu1 %v1383_v3  ;;  %v1418_v31 = vld [vmem:[%s1556_s26 + $0x130] ss:$8 sps:$4 sm:$0xff]   ;;  %v1419_v32 = vld [vmem:[%s1556_s26 + $0x44] ss:$8 sps:$4 sm:$0xff]   ;;  %v1423_v34 = vld [vmem:[%s1556_s26 + $0x40] ss:$8 sps:$4 sm:$0xff]  }
  0x16   : > { %752 = vmatprep.subr.bf16.mxu0 %v1499_v1  ;;  %1347 = vmatprep.subr.bf16.mxu1 %v1499_v1  ;;  %v1421_v33 = vld [vmem:[%s1556_s26 + $0x144] ss:$8 sps:$4 sm:$0xff]   ;;  %v1424_v35 = vld [vmem:[%s1556_s26 + $0x140] ss:$8 sps:$4 sm:$0xff]   ;;  %v1425_v36 = vld [vmem:[%s1556_s26 + $0x54] ss:$8 sps:$4 sm:$0xff]  }
  0x17   : > { %v1427_v37 = vld [vmem:[%s1556_s26 + $0x154] ss:$8 sps:$4 sm:$0xff]   ;;  %v1429_v38 = vld [vmem:[%s1556_s26 + $0x50] ss:$8 sps:$4 sm:$0xff]   ;;  %v1431_v40 = vld [vmem:[%s1556_s26 + $0x64] ss:$8 sps:$4 sm:$0xff]  }
  0x18   : > { %v1430_v39 = vld [vmem:[%s1556_s26 + $0x150] ss:$8 sps:$4 sm:$0xff]   ;;  %v1433_v41 = vld [vmem:[%s1556_s26 + $0x164] ss:$8 sps:$4 sm:$0xff]   ;;  %v1435_v42 = vld [vmem:[%s1556_s26 + $0x60] ss:$8 sps:$4 sm:$0xff]  }
  0x19   : > { %753 = vmatpush1.bf16.msra.mxu0 %v1384_v4  ;;  %1361 = vmatpush1.bf16.msra.mxu1 %v1384_v4  ;;  %v1436_v43 = vld [vmem:[%s1556_s26 + $0x160] ss:$8 sps:$4 sm:$0xff]   ;;  %v1437_v44 = vld [vmem:[%s1556_s26 + $0x74] ss:$8 sps:$4 sm:$0xff]   ;;  %v1441_v46 = vld [vmem:[%s1556_s26 + $0x70] ss:$8 sps:$4 sm:$0xff]  }
  0x1a   : > { %754 = vmatprep.subr.bf16.mxu0 %v1499_v1  ;;  %1348 = vmatprep.subr.bf16.mxu1 %v1499_v1  ;;  %v1439_v45 = vld [vmem:[%s1556_s26 + $0x174] ss:$8 sps:$4 sm:$0xff]   ;;  %v1442_v47 = vld [vmem:[%s1556_s26 + $0x170] ss:$8 sps:$4 sm:$0xff]   ;;  %v1443_v48 = vld [vmem:[%s1556_s26 + $0x84] ss:$8 sps:$4 sm:$0xff]  }
  0x1b   : > { %v1445_v49 = vld [vmem:[%s1556_s26 + $0x184] ss:$8 sps:$4 sm:$0xff]   ;;  %v1447_v50 = vld [vmem:[%s1556_s26 + $0x80] ss:$8 sps:$4 sm:$0xff]   ;;  %v1449_v52 = vld [vmem:[%s1556_s26 + $0x94] ss:$8 sps:$4 sm:$0xff]  }
  0x1c   : > { %v1448_v51 = vld [vmem:[%s1556_s26 + $0x180] ss:$8 sps:$4 sm:$0xff]   ;;  %v1451_v53 = vld [vmem:[%s1556_s26 + $0x194] ss:$8 sps:$4 sm:$0xff]   ;;  %v1453_v54 = vld [vmem:[%s1556_s26 + $0x90] ss:$8 sps:$4 sm:$0xff]  }
  0x1d   : > { %755 = vmatpush1.bf16.msra.mxu0 %v1385_v5  ;;  %1362 = vmatpush1.bf16.msra.mxu1 %v1385_v5  ;;  %v1454_v55 = vld [vmem:[%s1556_s26 + $0x190] ss:$8 sps:$4 sm:$0xff]   ;;  %v1455_v56 = vld [vmem:[%s1556_s26 + $0xa4] ss:$8 sps:$4 sm:$0xff]   ;;  %v1459_v58 = vld [vmem:[%s1556_s26 + $0xa0] ss:$8 sps:$4 sm:$0xff]  }
  0x1e   : > { %756 = vmatprep.subr.bf16.mxu0 %v1499_v1  ;;  %1349 = vmatprep.subr.bf16.mxu1 %v1499_v1  ;;  %v1457_v57 = vld [vmem:[%s1556_s26 + $0x1a4] ss:$8 sps:$4 sm:$0xff]   ;;  %v1460_v59 = vld [vmem:[%s1556_s26 + $0x1a0] ss:$8 sps:$4 sm:$0xff]   ;;  %v1461_v60 = vld [vmem:[%s1556_s26 + $0xb4] ss:$8 sps:$4 sm:$0xff]  }
  0x1f   : > { %v1463_v61 = vld [vmem:[%s1556_s26 + $0x1b4] ss:$8 sps:$4 sm:$0xff]   ;;  %v1465_v62 = vld [vmem:[%s1556_s26 + $0xb0] ss:$8 sps:$4 sm:$0xff]   ;;  %v1467_v0 = vld [vmem:[%s1556_s26 + $0xc4] ss:$8 sps:$4 sm:$0xff]  }
  0x20   : > { %v1466_v63 = vld [vmem:[%s1556_s26 + $0x1b0] ss:$8 sps:$4 sm:$0xff]   ;;  %v1471_v2 = vld [vmem:[%s1556_s26 + $0xc0] ss:$8 sps:$4 sm:$0xff]   ;;  %v1473_v4 = vld [vmem:[%s1556_s26 + $0xd4] ss:$8 sps:$4 sm:$0xff]  }
  0x21   : > { %757 = vmatpush1.bf16.msra.mxu0 %v1386_v8  ;;  %1363 = vmatpush1.bf16.msra.mxu1 %v1386_v8  ;;  %v1472_v3 = vld [vmem:[%s1556_s26 + $0x1c0] ss:$8 sps:$4 sm:$0xff]   ;;  %v1475_v5 = vld [vmem:[%s1556_s26 + $0x1d4] ss:$8 sps:$4 sm:$0xff]   ;;  %v1477_v6 = vld [vmem:[%s1556_s26 + $0xd0] ss:$8 sps:$4 sm:$0xff]  }
  0x22   : > { %758 = vmatprep.subr.bf16.mxu0 %v1499_v1  ;;  %1350 = vmatprep.subr.bf16.mxu1 %v1499_v1  ;;  %v1478_v7 = vld [vmem:[%s1556_s26 + $0x1d0] ss:$8 sps:$4 sm:$0xff]   ;;  %v1479_v8 = vld [vmem:[%s1556_s26 + $0xe4] ss:$8 sps:$4 sm:$0xff]   ;;  %v1484_v11 = vld [vmem:[%s1556_s26 + $0x1e0] ss:$8 sps:$4 sm:$0xff]  }
  0x25   : > { %759 = vmatpush1.bf16.msra.mxu0 %v1387_v9  ;;  %1364 = vmatpush1.bf16.msra.mxu1 %v1387_v9  ;;  %v1481_v9 = vld [vmem:[%s1556_s26 + $0x1e4] ss:$8 sps:$4 sm:$0xff]  }
  0x26   : > { %760 = vmatprep.subr.bf16.mxu0 %v1499_v1  ;;  %1351 = vmatprep.subr.bf16.mxu1 %v1499_v1 }
  0x29   : > { %761 = vmatpush1.bf16.msra.mxu0 %v1388_v10  ;;  %1365 = vmatpush1.bf16.msra.mxu1 %v1388_v10  ;;  %v1483_v10 = vld [vmem:[%s1556_s26 + $0xe0] ss:$8 sps:$4 sm:$0xff]  }
  0x2a   : > { %766 = vmatprep.subr.bf16.mxu0 %v1499_v1  ;;  %1352 = vmatprep.subr.bf16.mxu1 %v1499_v1 }
  0x2d   : > { %767 = vmatpush2.bf16.msra.mxu0 %v744_v12  ;;  %1366 = vmatpush2.bf16.msra.mxu1 %v744_v12  ;;  %v1485_v12 = vld [vmem:[%s1556_s26 + $0xf4] ss:$8 sps:$4 sm:$0xff]  }
  0x2e   : > { %768 = vmatprep.subr.bf16.mxu0 %v1499_v1  ;;  %1353 = vmatprep.subr.bf16.mxu1 %v1499_v1 }
  0x31   : > { %769 = vmatpush2.bf16.msra.mxu0 %v1390_v13  ;;  %1367 = vmatpush2.bf16.msra.mxu1 %v1390_v13  ;;  %v1487_v13 = vld [vmem:[%s1556_s26 + $0x1f4] ss:$8 sps:$4 sm:$0xff]  }
  0x32   : > { %770 = vmatprep.subr.bf16.mxu0 %v1499_v1  ;;  %1354 = vmatprep.subr.bf16.mxu1 %v1499_v1 }
  0x35   : > { %771 = vmatpush2.bf16.msra.mxu0 %v1391_v14  ;;  %1368 = vmatpush2.bf16.msra.mxu1 %v1391_v14  ;;  %v1489_v14 = vld [vmem:[%s1556_s26 + $0xf0] ss:$8 sps:$4 sm:$0xff]  }
  0x36   : > { %772 = vmatprep.subr.bf16.mxu0 %v1499_v1  ;;  %1355 = vmatprep.subr.bf16.mxu1 %v1499_v1 }
  0x39   : > { %773 = vmatpush2.bf16.msra.mxu0 %v1392_v15  ;;  %1369 = vmatpush2.bf16.msra.mxu1 %v1392_v15  ;;  %v1490_v15 = vld [vmem:[%s1556_s26 + $0x1f0] ss:$8 sps:$4 sm:$0xff]  }
  0x3a   : > { %774 = vmatprep.subr.bf16.mxu0 %v1499_v1  ;;  %1356 = vmatprep.subr.bf16.mxu1 %v1499_v1 }
  0x3d   : > { %775 = vmatpush2.bf16.msra.mxu0 %v1393_v16  ;;  %1370 = vmatpush2.bf16.msra.mxu1 %v1393_v16  ;;  %v1707_v16 = vld [vmem:[%s1913_s2] ss:$0 sm:$0xff] }
  0x3e   : > { %776 = vmatprep.subr.bf16.mxu0 %v1499_v1  ;;  %1357 = vmatprep.subr.bf16.mxu1 %v1499_v1  ;;  %v1469_v1 = vld [vmem:[%s1556_s26 + $0x1c4] ss:$8 sps:$4 sm:$0xff]  }
  0x41   : > { %777 = vmatpush2.bf16.msra.mxu0 %v1394_v17  ;;  %1371 = vmatpush2.bf16.msra.mxu1 %v1394_v17 }
  0x44   : > { %779 = vmatmul.mubr.bf16.vlgmr.msra.gmra.mxu0 %v1395_v18  ;;  %907 = vmatmul.mubr.bf16.vlgmr.msra.gmra.mxu1 %v1398_v19 }
  0x45   : > { %1310 = vmatprep.mubr.msk.bf16.mxu0 %vm645_vm0, %v1401_v20  ;;  %1326 = vmatprep.mubr.msk.bf16.mxu1 %vm645_vm0, %v1403_v21 }
  0x4c   : > { %787 = vmatmul.mubr.bf16.gmra.mxu0 %v1405_v22  ;;  %915 = vmatmul.mubr.bf16.gmra.mxu1 %v1406_v23 }
  0x4d   : > { %1311 = vmatprep.mubr.msk.bf16.mxu0 %vm645_vm0, %v1407_v24  ;;  %1327 = vmatprep.mubr.msk.bf16.mxu1 %vm645_vm0, %v1409_v25 }
  0x54   : > { %795 = vmatmul.mubr.bf16.gmra.mxu0 %v1411_v26  ;;  %923 = vmatmul.mubr.bf16.gmra.mxu1 %v1412_v27 }
  0x55   : > { %1312 = vmatprep.mubr.msk.bf16.mxu0 %vm645_vm0, %v1413_v28  ;;  %1328 = vmatprep.mubr.msk.bf16.mxu1 %vm645_vm0, %v1415_v29 }
  0x5c   : > { %803 = vmatmul.mubr.bf16.gmra.mxu0 %v1417_v30  ;;  %931 = vmatmul.mubr.bf16.gmra.mxu1 %v1418_v31 }
  0x5d   : > { %1313 = vmatprep.mubr.msk.bf16.mxu0 %vm645_vm0, %v1419_v32  ;;  %1329 = vmatprep.mubr.msk.bf16.mxu1 %vm645_vm0, %v1421_v33 }
  0x64   : > { %811 = vmatmul.mubr.bf16.gmra.mxu0 %v1423_v34  ;;  %939 = vmatmul.mubr.bf16.gmra.mxu1 %v1424_v35 }
  0x65   : > { %1314 = vmatprep.mubr.msk.bf16.mxu0 %vm645_vm0, %v1425_v36  ;;  %1330 = vmatprep.mubr.msk.bf16.mxu1 %vm645_vm0, %v1427_v37 }
  0x6c   : > { %819 = vmatmul.mubr.bf16.gmra.mxu0 %v1429_v38  ;;  %947 = vmatmul.mubr.bf16.gmra.mxu1 %v1430_v39 }
  0x6d   : > { %1315 = vmatprep.mubr.msk.bf16.mxu0 %vm645_vm0, %v1431_v40  ;;  %1331 = vmatprep.mubr.msk.bf16.mxu1 %vm645_vm0, %v1433_v41 }
  0x74   : > { %827 = vmatmul.mubr.bf16.gmra.mxu0 %v1435_v42  ;;  %955 = vmatmul.mubr.bf16.gmra.mxu1 %v1436_v43 }
  0x75   : > { %1316 = vmatprep.mubr.msk.bf16.mxu0 %vm645_vm0, %v1437_v44  ;;  %1332 = vmatprep.mubr.msk.bf16.mxu1 %vm645_vm0, %v1439_v45 }
  0x7c   : > { %835 = vmatmul.mubr.bf16.gmra.mxu0 %v1441_v46  ;;  %963 = vmatmul.mubr.bf16.gmra.mxu1 %v1442_v47 }
  0x7d   : > { %1317 = vmatprep.mubr.msk.bf16.mxu0 %vm645_vm0, %v1443_v48  ;;  %1333 = vmatprep.mubr.msk.bf16.mxu1 %vm645_vm0, %v1445_v49 }
  0x84   : > { %843 = vmatmul.mubr.bf16.gmra.mxu0 %v1447_v50  ;;  %971 = vmatmul.mubr.bf16.gmra.mxu1 %v1448_v51 }
  0x85   : > { %1318 = vmatprep.mubr.msk.bf16.mxu0 %vm645_vm0, %v1449_v52  ;;  %1334 = vmatprep.mubr.msk.bf16.mxu1 %vm645_vm0, %v1451_v53 }
  0x8c   : > { %851 = vmatmul.mubr.bf16.gmra.mxu0 %v1453_v54  ;;  %979 = vmatmul.mubr.bf16.gmra.mxu1 %v1454_v55 }
  0x8d   : > { %1319 = vmatprep.mubr.msk.bf16.mxu0 %vm645_vm0, %v1455_v56  ;;  %1335 = vmatprep.mubr.msk.bf16.mxu1 %vm645_vm0, %v1457_v57 }
  0x94   : > { %859 = vmatmul.mubr.bf16.gmra.mxu0 %v1459_v58  ;;  %987 = vmatmul.mubr.bf16.gmra.mxu1 %v1460_v59 }
  0x95   : > { %1320 = vmatprep.mubr.msk.bf16.mxu0 %vm645_vm0, %v1461_v60  ;;  %1336 = vmatprep.mubr.msk.bf16.mxu1 %vm645_vm0, %v1463_v61 }
  0x9c   : > { %867 = vmatmul.mubr.bf16.gmra.mxu0 %v1465_v62  ;;  %995 = vmatmul.mubr.bf16.gmra.mxu1 %v1466_v63 }
  0x9d   : > { %1321 = vmatprep.mubr.msk.bf16.mxu0 %vm645_vm0, %v1467_v0  ;;  %1337 = vmatprep.mubr.msk.bf16.mxu1 %vm645_vm0, %v1469_v1 }
  0xa4   : > { %875 = vmatmul.mubr.bf16.gmra.mxu0 %v1471_v2  ;;  %1003 = vmatmul.mubr.bf16.gmra.mxu1 %v1472_v3 }
  0xa5   : > { %1322 = vmatprep.mubr.msk.bf16.mxu0 %vm645_vm0, %v1473_v4  ;;  %1338 = vmatprep.mubr.msk.bf16.mxu1 %vm645_vm0, %v1475_v5 }
  0xac   : > { %883 = vmatmul.mubr.bf16.gmra.mxu0 %v1477_v6  ;;  %1011 = vmatmul.mubr.bf16.gmra.mxu1 %v1478_v7 }
  0xad   : > { %1323 = vmatprep.mubr.msk.bf16.mxu0 %vm645_vm0, %v1479_v8  ;;  %1339 = vmatprep.mubr.msk.bf16.mxu1 %vm645_vm0, %v1481_v9 }
  0xb4   : > { %891 = vmatmul.mubr.bf16.gmra.mxu0 %v1483_v10  ;;  %1019 = vmatmul.mubr.bf16.gmra.mxu1 %v1484_v11 }
  0xb5   : > { %1324 = vmatprep.mubr.msk.bf16.mxu0 %vm645_vm0, %v1485_v12  ;;  %1340 = vmatprep.mubr.msk.bf16.mxu1 %vm645_vm0, %v1487_v13 }
  0xbc   : > { %899 = vmatmul.mubr.bf16.gmra.mxu0 %v1489_v14  ;;  %1027 = vmatmul.mubr.bf16.gmra.mxu1 %v1490_v15 }
 0x104   : > { %v780_v17 = vpop.f32.mrf.mxu0  ;;  %v908_v18 = vpop.f32.mrf.mxu1 }
 0x105   : > { %v781_v19 = vadd.f32 %v1707_v16, %v780_v17  ;;  %v909_v20 = vadd.f32 %v1707_v16, %v908_v18 }
 0x106   : > { %v782_v21 = vpop.f32.mrf.mxu0  ;;  %v910_v22 = vpop.f32.mrf.mxu1 }
 0x107   : > { %v1035_v23 = vmax.f32 %v781_v19, 0.0  ;;  %v1067_v24 = vmax.f32 %v909_v20, 0.0 }
 0x108   : > { %v783_v25 = vpop.f32.mrf.mxu0  ;;  %v911_v26 = vpop.f32.mrf.mxu1 }
 0x109   : > { %1100 = vst.msk [vmem:[%s1716_s28] sm:$0xff] %vm1099_vm2, %v1035_v23  ;;  %1132 = vst.msk [vmem:[%s1716_s28 + $0x100] sm:$0xff] %vm1099_vm2, %v1067_v24  ;;  %v784_v27 = vadd.f32 %v1707_v16, %v783_v25  ;;  %v912_v28 = vadd.f32 %v1707_v16, %v911_v26 }
 0x10a   : > { %v785_v29 = vpop.f32.mrf.mxu0  ;;  %v913_v30 = vpop.f32.mrf.mxu1 }
 0x10b   : > { %v1036_v31 = vmax.f32 %v784_v27, 0.0  ;;  %v1068_v32 = vmax.f32 %v912_v28, 0.0 }
 0x10c   : > { %v788_v33 = vpop.f32.mrf.mxu0  ;;  %v916_v34 = vpop.f32.mrf.mxu1 }
 0x10d   : > { %1101 = vst.msk [vmem:[%s1716_s28 + $0x8] sm:$0xff] %vm1099_vm2, %v1036_v31  ;;  %1133 = vst.msk [vmem:[%s1716_s28 + $0x108] sm:$0xff] %vm1099_vm2, %v1068_v32  ;;  %v789_v35 = vadd.f32 %v1707_v16, %v788_v33  ;;  %v917_v36 = vadd.f32 %v1707_v16, %v916_v34 }
 0x10e   : > { %v790_v37 = vpop.f32.mrf.mxu0  ;;  %v918_v38 = vpop.f32.mrf.mxu1 }
 0x10f   : > { %v1037_v39 = vmax.f32 %v789_v35, 0.0  ;;  %v1069_v40 = vmax.f32 %v917_v36, 0.0 }
 0x110   : > { %v791_v41 = vpop.f32.mrf.mxu0  ;;  %v919_v42 = vpop.f32.mrf.mxu1 }
 0x111   : > { %1102 = vst.msk [vmem:[%s1716_s28 + $0x10] sm:$0xff] %vm1099_vm2, %v1037_v39  ;;  %1134 = vst.msk [vmem:[%s1716_s28 + $0x110] sm:$0xff] %vm1099_vm2, %v1069_v40  ;;  %v792_v43 = vadd.f32 %v1707_v16, %v791_v41  ;;  %v920_v44 = vadd.f32 %v1707_v16, %v919_v42 }
 0x112   : > { %v793_v45 = vpop.f32.mrf.mxu0  ;;  %v921_v46 = vpop.f32.mrf.mxu1 }
 0x113   : > { %v1038_v47 = vmax.f32 %v792_v43, 0.0  ;;  %v1070_v48 = vmax.f32 %v920_v44, 0.0 }
 0x114   : > { %v796_v49 = vpop.f32.mrf.mxu0  ;;  %v924_v50 = vpop.f32.mrf.mxu1 }
 0x115   : > { %1103 = vst.msk [vmem:[%s1716_s28 + $0x18] sm:$0xff] %vm1099_vm2, %v1038_v47  ;;  %1135 = vst.msk [vmem:[%s1716_s28 + $0x118] sm:$0xff] %vm1099_vm2, %v1070_v48  ;;  %v797_v51 = vadd.f32 %v1707_v16, %v796_v49  ;;  %v925_v52 = vadd.f32 %v1707_v16, %v924_v50 }
 0x116   : > { %v798_v53 = vpop.f32.mrf.mxu0  ;;  %v926_v54 = vpop.f32.mrf.mxu1 }
 0x117   : > { %v1039_v55 = vmax.f32 %v797_v51, 0.0  ;;  %v1071_v56 = vmax.f32 %v925_v52, 0.0 }
 0x118   : > { %v799_v57 = vpop.f32.mrf.mxu0  ;;  %v927_v58 = vpop.f32.mrf.mxu1 }
 0x119   : > { %1104 = vst.msk [vmem:[%s1716_s28 + $0x20] sm:$0xff] %vm1099_vm2, %v1039_v55  ;;  %1136 = vst.msk [vmem:[%s1716_s28 + $0x120] sm:$0xff] %vm1099_vm2, %v1071_v56  ;;  %v800_v59 = vadd.f32 %v1707_v16, %v799_v57  ;;  %v928_v60 = vadd.f32 %v1707_v16, %v927_v58 }
 0x11a   : > { %v801_v61 = vpop.f32.mrf.mxu0  ;;  %v929_v62 = vpop.f32.mrf.mxu1 }
 0x11b   : > { %v1040_v63 = vmax.f32 %v800_v59, 0.0  ;;  %v1072_v0 = vmax.f32 %v928_v60, 0.0 }
 0x11c   : > { %v804_v1 = vpop.f32.mrf.mxu0  ;;  %v932_v2 = vpop.f32.mrf.mxu1 }
 0x11d   : > { %1105 = vst.msk [vmem:[%s1716_s28 + $0x28] sm:$0xff] %vm1099_vm2, %v1040_v63  ;;  %1137 = vst.msk [vmem:[%s1716_s28 + $0x128] sm:$0xff] %vm1099_vm2, %v1072_v0  ;;  %v805_v3 = vadd.f32 %v1707_v16, %v804_v1  ;;  %v933_v4 = vadd.f32 %v1707_v16, %v932_v2 }
 0x11e   : > { %v806_v5 = vpop.f32.mrf.mxu0  ;;  %v934_v6 = vpop.f32.mrf.mxu1 }
 0x11f   : > { %v1041_v7 = vmax.f32 %v805_v3, 0.0  ;;  %v1073_v8 = vmax.f32 %v933_v4, 0.0 }
 0x120   : > { %v807_v9 = vpop.f32.mrf.mxu0  ;;  %v935_v10 = vpop.f32.mrf.mxu1 }
 0x121   : > { %1106 = vst.msk [vmem:[%s1716_s28 + $0x30] sm:$0xff] %vm1099_vm2, %v1041_v7  ;;  %1138 = vst.msk [vmem:[%s1716_s28 + $0x130] sm:$0xff] %vm1099_vm2, %v1073_v8  ;;  %v808_v11 = vadd.f32 %v1707_v16, %v807_v9  ;;  %v936_v12 = vadd.f32 %v1707_v16, %v935_v10 }
 0x122   : > { %v809_v13 = vpop.f32.mrf.mxu0  ;;  %v937_v14 = vpop.f32.mrf.mxu1 }
 0x123   : > { %v1042_v15 = vmax.f32 %v808_v11, 0.0  ;;  %v1074_v17 = vmax.f32 %v936_v12, 0.0 }
 0x124   : > { %v812_v18 = vpop.f32.mrf.mxu0  ;;  %v940_v19 = vpop.f32.mrf.mxu1 }
 0x125   : > { %1107 = vst.msk [vmem:[%s1716_s28 + $0x38] sm:$0xff] %vm1099_vm2, %v1042_v15  ;;  %1139 = vst.msk [vmem:[%s1716_s28 + $0x138] sm:$0xff] %vm1099_vm2, %v1074_v17  ;;  %v813_v20 = vadd.f32 %v1707_v16, %v812_v18  ;;  %v941_v21 = vadd.f32 %v1707_v16, %v940_v19 }
 0x126   : > { %v814_v22 = vpop.f32.mrf.mxu0  ;;  %v942_v23 = vpop.f32.mrf.mxu1 }
 0x127   : > { %v1043_v24 = vmax.f32 %v813_v20, 0.0  ;;  %v1075_v25 = vmax.f32 %v941_v21, 0.0 }
 0x128   : > { %v815_v26 = vpop.f32.mrf.mxu0  ;;  %v943_v27 = vpop.f32.mrf.mxu1 }
 0x129   : > { %1108 = vst.msk [vmem:[%s1716_s28 + $0x40] sm:$0xff] %vm1099_vm2, %v1043_v24  ;;  %1140 = vst.msk [vmem:[%s1716_s28 + $0x140] sm:$0xff] %vm1099_vm2, %v1075_v25  ;;  %v816_v28 = vadd.f32 %v1707_v16, %v815_v26  ;;  %v944_v29 = vadd.f32 %v1707_v16, %v943_v27 }
 0x12a   : > { %v817_v30 = vpop.f32.mrf.mxu0  ;;  %v945_v31 = vpop.f32.mrf.mxu1 }
 0x12b   : > { %v1044_v32 = vmax.f32 %v816_v28, 0.0  ;;  %v1076_v33 = vmax.f32 %v944_v29, 0.0 }
 0x12c   : > { %v820_v34 = vpop.f32.mrf.mxu0  ;;  %v948_v35 = vpop.f32.mrf.mxu1 }
 0x12d   : > { %1109 = vst.msk [vmem:[%s1716_s28 + $0x48] sm:$0xff] %vm1099_vm2, %v1044_v32  ;;  %1141 = vst.msk [vmem:[%s1716_s28 + $0x148] sm:$0xff] %vm1099_vm2, %v1076_v33  ;;  %v821_v36 = vadd.f32 %v1707_v16, %v820_v34  ;;  %v949_v37 = vadd.f32 %v1707_v16, %v948_v35 }
 0x12e   : > { %v822_v38 = vpop.f32.mrf.mxu0  ;;  %v950_v39 = vpop.f32.mrf.mxu1 }
 0x12f   : > { %v1045_v40 = vmax.f32 %v821_v36, 0.0  ;;  %v1077_v41 = vmax.f32 %v949_v37, 0.0 }
 0x130   : > { %v823_v42 = vpop.f32.mrf.mxu0  ;;  %v951_v43 = vpop.f32.mrf.mxu1 }
 0x131   : > { %1110 = vst.msk [vmem:[%s1716_s28 + $0x50] sm:$0xff] %vm1099_vm2, %v1045_v40  ;;  %1142 = vst.msk [vmem:[%s1716_s28 + $0x150] sm:$0xff] %vm1099_vm2, %v1077_v41  ;;  %v824_v44 = vadd.f32 %v1707_v16, %v823_v42  ;;  %v952_v45 = vadd.f32 %v1707_v16, %v951_v43 }
 0x132   : > { %v825_v46 = vpop.f32.mrf.mxu0  ;;  %v953_v47 = vpop.f32.mrf.mxu1 }
 0x133   : > { %v1046_v48 = vmax.f32 %v824_v44, 0.0  ;;  %v1078_v49 = vmax.f32 %v952_v45, 0.0 }
 0x134   : > { %v828_v50 = vpop.f32.mrf.mxu0  ;;  %v956_v51 = vpop.f32.mrf.mxu1 }
 0x135   : > { %1111 = vst.msk [vmem:[%s1716_s28 + $0x58] sm:$0xff] %vm1099_vm2, %v1046_v48  ;;  %1143 = vst.msk [vmem:[%s1716_s28 + $0x158] sm:$0xff] %vm1099_vm2, %v1078_v49  ;;  %v829_v52 = vadd.f32 %v1707_v16, %v828_v50  ;;  %v957_v53 = vadd.f32 %v1707_v16, %v956_v51 }
 0x136   : > { %v830_v54 = vpop.f32.mrf.mxu0  ;;  %v958_v55 = vpop.f32.mrf.mxu1 }
 0x137   : > { %v1047_v56 = vmax.f32 %v829_v52, 0.0  ;;  %v1079_v57 = vmax.f32 %v957_v53, 0.0 }
 0x138   : > { %v831_v58 = vpop.f32.mrf.mxu0  ;;  %v959_v59 = vpop.f32.mrf.mxu1 }
 0x139   : > { %1112 = vst.msk [vmem:[%s1716_s28 + $0x60] sm:$0xff] %vm1099_vm2, %v1047_v56  ;;  %1144 = vst.msk [vmem:[%s1716_s28 + $0x160] sm:$0xff] %vm1099_vm2, %v1079_v57  ;;  %v832_v60 = vadd.f32 %v1707_v16, %v831_v58  ;;  %v960_v61 = vadd.f32 %v1707_v16, %v959_v59 }
 0x13a   : > { %v833_v62 = vpop.f32.mrf.mxu0  ;;  %v961_v63 = vpop.f32.mrf.mxu1 }
 0x13b   : > { %v1048_v0 = vmax.f32 %v832_v60, 0.0  ;;  %v1080_v1 = vmax.f32 %v960_v61, 0.0 }
 0x13c   : > { %v836_v2 = vpop.f32.mrf.mxu0  ;;  %v964_v3 = vpop.f32.mrf.mxu1 }
 0x13d   : > { %1113 = vst.msk [vmem:[%s1716_s28 + $0x68] sm:$0xff] %vm1099_vm2, %v1048_v0  ;;  %1145 = vst.msk [vmem:[%s1716_s28 + $0x168] sm:$0xff] %vm1099_vm2, %v1080_v1  ;;  %v837_v4 = vadd.f32 %v1707_v16, %v836_v2  ;;  %v965_v5 = vadd.f32 %v1707_v16, %v964_v3 }
 0x13e   : > { %v838_v6 = vpop.f32.mrf.mxu0  ;;  %v966_v7 = vpop.f32.mrf.mxu1 }
 0x13f   : > { %v1049_v8 = vmax.f32 %v837_v4, 0.0  ;;  %v1081_v9 = vmax.f32 %v965_v5, 0.0 }
 0x140   : > { %v839_v10 = vpop.f32.mrf.mxu0  ;;  %v967_v11 = vpop.f32.mrf.mxu1 }
 0x141   : > { %1114 = vst.msk [vmem:[%s1716_s28 + $0x70] sm:$0xff] %vm1099_vm2, %v1049_v8  ;;  %1146 = vst.msk [vmem:[%s1716_s28 + $0x170] sm:$0xff] %vm1099_vm2, %v1081_v9  ;;  %v840_v12 = vadd.f32 %v1707_v16, %v839_v10  ;;  %v968_v13 = vadd.f32 %v1707_v16, %v967_v11 }
 0x142   : > { %v841_v14 = vpop.f32.mrf.mxu0  ;;  %v969_v15 = vpop.f32.mrf.mxu1 }
 0x143   : > { %v1050_v17 = vmax.f32 %v840_v12, 0.0  ;;  %v1082_v18 = vmax.f32 %v968_v13, 0.0 }
 0x144   : > { %v844_v19 = vpop.f32.mrf.mxu0  ;;  %v972_v20 = vpop.f32.mrf.mxu1 }
 0x145   : > { %1115 = vst.msk [vmem:[%s1716_s28 + $0x78] sm:$0xff] %vm1099_vm2, %v1050_v17  ;;  %1147 = vst.msk [vmem:[%s1716_s28 + $0x178] sm:$0xff] %vm1099_vm2, %v1082_v18  ;;  %v845_v21 = vadd.f32 %v1707_v16, %v844_v19  ;;  %v973_v22 = vadd.f32 %v1707_v16, %v972_v20 }
 0x146   : > { %v846_v23 = vpop.f32.mrf.mxu0  ;;  %v974_v24 = vpop.f32.mrf.mxu1 }
 0x147   : > { %v1051_v25 = vmax.f32 %v845_v21, 0.0  ;;  %v1083_v26 = vmax.f32 %v973_v22, 0.0 }
 0x148   : > { %v847_v27 = vpop.f32.mrf.mxu0  ;;  %v975_v28 = vpop.f32.mrf.mxu1 }
 0x149   : > { %1116 = vst.msk [vmem:[%s1716_s28 + $0x80] sm:$0xff] %vm1099_vm2, %v1051_v25  ;;  %1148 = vst.msk [vmem:[%s1716_s28 + $0x180] sm:$0xff] %vm1099_vm2, %v1083_v26  ;;  %v848_v29 = vadd.f32 %v1707_v16, %v847_v27  ;;  %v976_v30 = vadd.f32 %v1707_v16, %v975_v28 }
 0x14a   : > { %v849_v31 = vpop.f32.mrf.mxu0  ;;  %v977_v32 = vpop.f32.mrf.mxu1 }
 0x14b   : > { %v1052_v33 = vmax.f32 %v848_v29, 0.0  ;;  %v1084_v34 = vmax.f32 %v976_v30, 0.0 }
 0x14c   : > { %v852_v35 = vpop.f32.mrf.mxu0  ;;  %v980_v36 = vpop.f32.mrf.mxu1 }
 0x14d   : > { %1117 = vst.msk [vmem:[%s1716_s28 + $0x88] sm:$0xff] %vm1099_vm2, %v1052_v33  ;;  %1149 = vst.msk [vmem:[%s1716_s28 + $0x188] sm:$0xff] %vm1099_vm2, %v1084_v34  ;;  %v853_v37 = vadd.f32 %v1707_v16, %v852_v35  ;;  %v981_v38 = vadd.f32 %v1707_v16, %v980_v36 }
 0x14e   : > { %v854_v39 = vpop.f32.mrf.mxu0  ;;  %v982_v40 = vpop.f32.mrf.mxu1 }
 0x14f   : > { %v1053_v41 = vmax.f32 %v853_v37, 0.0  ;;  %v1085_v42 = vmax.f32 %v981_v38, 0.0 }
 0x150   : > { %v855_v43 = vpop.f32.mrf.mxu0  ;;  %v983_v44 = vpop.f32.mrf.mxu1 }
 0x151   : > { %1118 = vst.msk [vmem:[%s1716_s28 + $0x90] sm:$0xff] %vm1099_vm2, %v1053_v41  ;;  %1150 = vst.msk [vmem:[%s1716_s28 + $0x190] sm:$0xff] %vm1099_vm2, %v1085_v42  ;;  %v856_v45 = vadd.f32 %v1707_v16, %v855_v43  ;;  %v984_v46 = vadd.f32 %v1707_v16, %v983_v44 }
 0x152   : > { %v857_v47 = vpop.f32.mrf.mxu0  ;;  %v985_v48 = vpop.f32.mrf.mxu1 }
 0x153   : > { %v1054_v49 = vmax.f32 %v856_v45, 0.0  ;;  %v1086_v50 = vmax.f32 %v984_v46, 0.0 }
 0x154   : > { %v860_v51 = vpop.f32.mrf.mxu0  ;;  %v988_v52 = vpop.f32.mrf.mxu1 }
 0x155   : > { %1119 = vst.msk [vmem:[%s1716_s28 + $0x98] sm:$0xff] %vm1099_vm2, %v1054_v49  ;;  %1151 = vst.msk [vmem:[%s1716_s28 + $0x198] sm:$0xff] %vm1099_vm2, %v1086_v50  ;;  %v861_v53 = vadd.f32 %v1707_v16, %v860_v51  ;;  %v989_v54 = vadd.f32 %v1707_v16, %v988_v52 }
 0x156   : > { %v862_v55 = vpop.f32.mrf.mxu0  ;;  %v990_v56 = vpop.f32.mrf.mxu1 }
 0x157   : > { %v1055_v57 = vmax.f32 %v861_v53, 0.0  ;;  %v1087_v58 = vmax.f32 %v989_v54, 0.0 }
 0x158   : > { %v863_v59 = vpop.f32.mrf.mxu0  ;;  %v991_v60 = vpop.f32.mrf.mxu1 }
 0x159   : > { %1120 = vst.msk [vmem:[%s1716_s28 + $0xa0] sm:$0xff] %vm1099_vm2, %v1055_v57  ;;  %1152 = vst.msk [vmem:[%s1716_s28 + $0x1a0] sm:$0xff] %vm1099_vm2, %v1087_v58  ;;  %v864_v61 = vadd.f32 %v1707_v16, %v863_v59  ;;  %v992_v62 = vadd.f32 %v1707_v16, %v991_v60 }
 0x15a   : > { %v865_v63 = vpop.f32.mrf.mxu0  ;;  %v993_v0 = vpop.f32.mrf.mxu1 }
 0x15b   : > { %v1056_v1 = vmax.f32 %v864_v61, 0.0  ;;  %v1088_v2 = vmax.f32 %v992_v62, 0.0 }
 0x15c   : > { %v868_v3 = vpop.f32.mrf.mxu0  ;;  %v996_v4 = vpop.f32.mrf.mxu1 }
 0x15d   : > { %1121 = vst.msk [vmem:[%s1716_s28 + $0xa8] sm:$0xff] %vm1099_vm2, %v1056_v1  ;;  %1153 = vst.msk [vmem:[%s1716_s28 + $0x1a8] sm:$0xff] %vm1099_vm2, %v1088_v2  ;;  %v869_v5 = vadd.f32 %v1707_v16, %v868_v3  ;;  %v997_v6 = vadd.f32 %v1707_v16, %v996_v4 }
 0x15e   : > { %v870_v7 = vpop.f32.mrf.mxu0  ;;  %v998_v8 = vpop.f32.mrf.mxu1 }
 0x15f   : > { %v1057_v9 = vmax.f32 %v869_v5, 0.0  ;;  %v1089_v10 = vmax.f32 %v997_v6, 0.0 }
 0x160   : > { %v871_v11 = vpop.f32.mrf.mxu0  ;;  %v999_v12 = vpop.f32.mrf.mxu1 }
 0x161   : > { %1122 = vst.msk [vmem:[%s1716_s28 + $0xb0] sm:$0xff] %vm1099_vm2, %v1057_v9  ;;  %1154 = vst.msk [vmem:[%s1716_s28 + $0x1b0] sm:$0xff] %vm1099_vm2, %v1089_v10  ;;  %v872_v13 = vadd.f32 %v1707_v16, %v871_v11  ;;  %v1000_v14 = vadd.f32 %v1707_v16, %v999_v12 }
 0x162   : > { %v873_v15 = vpop.f32.mrf.mxu0  ;;  %v1001_v17 = vpop.f32.mrf.mxu1 }
 0x163   : > { %v1058_v18 = vmax.f32 %v872_v13, 0.0  ;;  %v1090_v19 = vmax.f32 %v1000_v14, 0.0 }
 0x164   : > { %v876_v20 = vpop.f32.mrf.mxu0  ;;  %v1004_v21 = vpop.f32.mrf.mxu1 }
 0x165   : > { %1123 = vst.msk [vmem:[%s1716_s28 + $0xb8] sm:$0xff] %vm1099_vm2, %v1058_v18  ;;  %1155 = vst.msk [vmem:[%s1716_s28 + $0x1b8] sm:$0xff] %vm1099_vm2, %v1090_v19  ;;  %v877_v22 = vadd.f32 %v1707_v16, %v876_v20  ;;  %v1005_v23 = vadd.f32 %v1707_v16, %v1004_v21 }
 0x166   : > { %v878_v24 = vpop.f32.mrf.mxu0  ;;  %v1006_v25 = vpop.f32.mrf.mxu1 }
 0x167   : > { %v1059_v26 = vmax.f32 %v877_v22, 0.0  ;;  %v1091_v27 = vmax.f32 %v1005_v23, 0.0 }
 0x168   : > { %v879_v28 = vpop.f32.mrf.mxu0  ;;  %v1007_v29 = vpop.f32.mrf.mxu1 }
 0x169   : > { %1124 = vst.msk [vmem:[%s1716_s28 + $0xc0] sm:$0xff] %vm1099_vm2, %v1059_v26  ;;  %1156 = vst.msk [vmem:[%s1716_s28 + $0x1c0] sm:$0xff] %vm1099_vm2, %v1091_v27  ;;  %v880_v30 = vadd.f32 %v1707_v16, %v879_v28  ;;  %v1008_v31 = vadd.f32 %v1707_v16, %v1007_v29 }
 0x16a   : > { %v881_v32 = vpop.f32.mrf.mxu0  ;;  %v1009_v33 = vpop.f32.mrf.mxu1 }
 0x16b   : > { %v1060_v34 = vmax.f32 %v880_v30, 0.0  ;;  %v1092_v35 = vmax.f32 %v1008_v31, 0.0 }
 0x16c   : > { %v884_v36 = vpop.f32.mrf.mxu0  ;;  %v1012_v37 = vpop.f32.mrf.mxu1 }
 0x16d   : > { %1125 = vst.msk [vmem:[%s1716_s28 + $0xc8] sm:$0xff] %vm1099_vm2, %v1060_v34  ;;  %1157 = vst.msk [vmem:[%s1716_s28 + $0x1c8] sm:$0xff] %vm1099_vm2, %v1092_v35  ;;  %v885_v38 = vadd.f32 %v1707_v16, %v884_v36  ;;  %v1013_v39 = vadd.f32 %v1707_v16, %v1012_v37 }
 0x16e   : > { %v886_v40 = vpop.f32.mrf.mxu0  ;;  %v1014_v41 = vpop.f32.mrf.mxu1 }
 0x16f   : > { %v1061_v42 = vmax.f32 %v885_v38, 0.0  ;;  %v1093_v43 = vmax.f32 %v1013_v39, 0.0 }
 0x170   : > { %v887_v44 = vpop.f32.mrf.mxu0  ;;  %v1015_v45 = vpop.f32.mrf.mxu1 }
 0x171   : > { %1126 = vst.msk [vmem:[%s1716_s28 + $0xd0] sm:$0xff] %vm1099_vm2, %v1061_v42  ;;  %1158 = vst.msk [vmem:[%s1716_s28 + $0x1d0] sm:$0xff] %vm1099_vm2, %v1093_v43  ;;  %v888_v46 = vadd.f32 %v1707_v16, %v887_v44  ;;  %v1016_v47 = vadd.f32 %v1707_v16, %v1015_v45 }
 0x172   : > { %v889_v48 = vpop.f32.mrf.mxu0  ;;  %v1017_v49 = vpop.f32.mrf.mxu1 }
 0x173   : > { %v1062_v50 = vmax.f32 %v888_v46, 0.0  ;;  %v1094_v51 = vmax.f32 %v1016_v47, 0.0 }
 0x174   : > { %v892_v52 = vpop.f32.mrf.mxu0  ;;  %v1020_v53 = vpop.f32.mrf.mxu1 }
 0x175   : > { %1127 = vst.msk [vmem:[%s1716_s28 + $0xd8] sm:$0xff] %vm1099_vm2, %v1062_v50  ;;  %1159 = vst.msk [vmem:[%s1716_s28 + $0x1d8] sm:$0xff] %vm1099_vm2, %v1094_v51  ;;  %v893_v54 = vadd.f32 %v1707_v16, %v892_v52  ;;  %v1021_v55 = vadd.f32 %v1707_v16, %v1020_v53 }
 0x176   : > { %v894_v56 = vpop.f32.mrf.mxu0  ;;  %v1022_v57 = vpop.f32.mrf.mxu1 }
 0x177   : > { %v1063_v58 = vmax.f32 %v893_v54, 0.0  ;;  %v1095_v59 = vmax.f32 %v1021_v55, 0.0 }
 0x178   : > { %v895_v60 = vpop.f32.mrf.mxu0  ;;  %v1023_v61 = vpop.f32.mrf.mxu1 }
 0x179   : > { %1128 = vst.msk [vmem:[%s1716_s28 + $0xe0] sm:$0xff] %vm1099_vm2, %v1063_v58  ;;  %1160 = vst.msk [vmem:[%s1716_s28 + $0x1e0] sm:$0xff] %vm1099_vm2, %v1095_v59  ;;  %v896_v62 = vadd.f32 %v1707_v16, %v895_v60  ;;  %v1024_v63 = vadd.f32 %v1707_v16, %v1023_v61 }
 0x17a   : > { %v897_v0 = vpop.f32.mrf.mxu0  ;;  %v1025_v1 = vpop.f32.mrf.mxu1 }
 0x17b   : > { %v1064_v2 = vmax.f32 %v896_v62, 0.0  ;;  %v1096_v3 = vmax.f32 %v1024_v63, 0.0 }
 0x17c   : > { %v900_v4 = vpop.f32.mrf.mxu0  ;;  %v1028_v5 = vpop.f32.mrf.mxu1 }
 0x17d   : > { %1129 = vst.msk [vmem:[%s1716_s28 + $0xe8] sm:$0xff] %vm1099_vm2, %v1064_v2  ;;  %1161 = vst.msk [vmem:[%s1716_s28 + $0x1e8] sm:$0xff] %vm1099_vm2, %v1096_v3  ;;  %v901_v6 = vadd.f32 %v1707_v16, %v900_v4  ;;  %v1029_v7 = vadd.f32 %v1707_v16, %v1028_v5 }
 0x17e   : > { %v902_v8 = vpop.f32.mrf.mxu0  ;;  %v1030_v9 = vpop.f32.mrf.mxu1 }
 0x17f   : > { %v1065_v10 = vmax.f32 %v901_v6, 0.0  ;;  %v1097_v11 = vmax.f32 %v1029_v7, 0.0 }
 0x180   : > { %v903_v12 = vpop.f32.mrf.mxu0  ;;  %v1031_v13 = vpop.f32.mrf.mxu1 }
 0x181   : > { %1130 = vst.msk [vmem:[%s1716_s28 + $0xf0] sm:$0xff] %vm1099_vm2, %v1065_v10  ;;  %1162 = vst.msk [vmem:[%s1716_s28 + $0x1f0] sm:$0xff] %vm1099_vm2, %v1097_v11  ;;  %v904_v14 = vadd.f32 %v1707_v16, %v903_v12  ;;  %v1032_v15 = vadd.f32 %v1707_v16, %v1031_v13 }
 0x182   : > { %v905_v17 = vpop.f32.mrf.mxu0  ;;  %v1033_v18 = vpop.f32.mrf.mxu1 }
 0x183   : > { %v1066_v19 = vmax.f32 %v904_v14, 0.0  ;;  %v1098_v20 = vmax.f32 %v1032_v15, 0.0 }
 0x185   : > { %1131 = vst.msk [vmem:[%s1716_s28 + $0xf8] sm:$0xff] %vm1099_vm2, %v1066_v19  ;;  %1163 = vst.msk [vmem:[%s1716_s28 + $0x1f8] sm:$0xff] %vm1099_vm2, %v1098_v20 }
 0x186 PF: > { %s13_s12 = sadd.s32 1, %s1497_s12  }
 0x187   : > { %p10_p4 = scmp.ge.s32.totalorder %s13_s12, 4  }
 0x189   :  { %12 = sbr.rel (!%p10_p4) target bundleno = 1 (0x1), region = 62 }

// kernel: cnn_vanilla_forward.12
= control target key start
LH: loop header
LB: loop body
LE: loop exit
PB: predicated region body
PF: predicated region fallthrough
CT: control target
= control target key end

     0   :  { %s430_s13 = smov 112   ;;  %vm392_vm0 = vcmask 125952   ;;  %s1113_s0 = inlined_call_operand.vmem [shape: f32[8,8,2,4,32], index: 0, kind: input, shape index: {}]   ;;  %s1114_s1 = inlined_call_operand.vmem [shape: f32[8,4,4,16], index: 1, kind: output, shape index: {}]  }
   0x1   :  { %v12_v0 = vld [vmem:[%s1113_s0 + $0x10] sm:$0xf]  ;;  %v13_v1 = vld [vmem:[%s1113_s0 + $0x14] sm:$0xf]  ;;  %v8_v5 = vld [vmem:[%s1113_s0] sm:$0xf] }
   0x2   :  { %v20_v2 = vld [vmem:[%s1113_s0 + $0x30] sm:$0xf]  ;;  %v21_v3 = vld [vmem:[%s1113_s0 + $0x34] sm:$0xf]  ;;  %v9_v6 = vld [vmem:[%s1113_s0 + $0x4] sm:$0xf] }
   0x3   :  { %v140_v4 = vmax.f32 %v12_v0, %v20_v2  ;;  %v141_v7 = vmax.f32 %v13_v1, %v21_v3  ;;  %v16_v8 = vld [vmem:[%s1113_s0 + $0x20] sm:$0xf]  ;;  %v17_v9 = vld [vmem:[%s1113_s0 + $0x24] sm:$0xf]  ;;  %v14_v10 = vld [vmem:[%s1113_s0 + $0x18] sm:$0xf] }
   0x4   :  { %v136_v11 = vmax.f32 %v8_v5, %v16_v8  ;;  %v137_v12 = vmax.f32 %v9_v6, %v17_v9  ;;  %v15_v13 = vld [vmem:[%s1113_s0 + $0x1c] sm:$0xf]  ;;  %v22_v14 = vld [vmem:[%s1113_s0 + $0x38] sm:$0xf]  ;;  %v10_v19 = vld [vmem:[%s1113_s0 + $0x8] sm:$0xf] }
   0x5   :  { %v23_v15 = vld [vmem:[%s1113_s0 + $0x3c] sm:$0xf]  ;;  %v477_v16 = vmax.f32 %v140_v4, %v141_v7  ;;  %v142_v17 = vmax.f32 %v14_v10, %v22_v14  ;;  %v11_v20 = vld [vmem:[%s1113_s0 + $0xc] sm:$0xf]  ;;  %v18_v21 = vld [vmem:[%s1113_s0 + $0x28] sm:$0xf] }
   0x6   :  { %v143_v18 = vmax.f32 %v15_v13, %v23_v15  ;;  %v488_v22 = vmax.f32 %v136_v11, %v137_v12  ;;  %v19_v23 = vld [vmem:[%s1113_s0 + $0x2c] sm:$0xf]  ;;  %v138_v24 = vmax.f32 %v10_v19, %v18_v21  ;;  %v26_v25 = vld [vmem:[%s1113_s0 + $0x48] sm:$0xf]  ;;  %v24_v31 = vld [vmem:[%s1113_s0 + $0x40] sm:$0xf] }
   0x7   :  { %v27_v26 = vld [vmem:[%s1113_s0 + $0x4c] sm:$0xf]  ;;  %268 = vrot.lane.b32.xlu1 %v477_v16, %s430_s13  ;;  %v139_v28 = vmax.f32 %v11_v20, %v19_v23  ;;  %v34_v29 = vld [vmem:[%s1113_s0 + $0x68] sm:$0xf]  ;;  %v25_v34 = vld [vmem:[%s1113_s0 + $0x44] sm:$0xf] }
   0x8   :  { %v501_v27 = vmax.f32 %v142_v17, %v143_v18  ;;  %v35_v30 = vld [vmem:[%s1113_s0 + $0x6c] sm:$0xf]  ;;  %264 = vrot.lane.b32.xlu0 %v488_v22, %s430_s13  ;;  %v146_v32 = vmax.f32 %v26_v25, %v34_v29  ;;  %v32_v35 = vld [vmem:[%s1113_s0 + $0x60] sm:$0xf]  ;;  %v33_v36 = vld [vmem:[%s1113_s0 + $0x64] sm:$0xf] }
   0x9   :  { %v147_v33 = vmax.f32 %v27_v26, %v35_v30  ;;  %v523_v37 = vmax.f32 %v138_v24, %v139_v28  ;;  %v144_v38 = vmax.f32 %v24_v31, %v32_v35  ;;  %v145_v39 = vmax.f32 %v25_v34, %v33_v36  ;;  %v30_v40 = vld [vmem:[%s1113_s0 + $0x58] sm:$0xf]  ;;  %v31_v41 = vld [vmem:[%s1113_s0 + $0x5c] sm:$0xf]  ;;  %v28_v44 = vld [vmem:[%s1113_s0 + $0x50] sm:$0xf] }
   0xa   :  { %v38_v42 = vld [vmem:[%s1113_s0 + $0x78] sm:$0xf]  ;;  %v39_v43 = vld [vmem:[%s1113_s0 + $0x7c] sm:$0xf]  ;;  %v29_v45 = vld [vmem:[%s1113_s0 + $0x54] sm:$0xf] }
   0xb   :  { %270 = vrot.lane.b32.xlu1 %v501_v27, %s430_s13  ;;  %v545_v46 = vmax.f32 %v146_v32, %v147_v33  ;;  %v150_v47 = vmax.f32 %v30_v40, %v38_v42  ;;  %v151_v48 = vmax.f32 %v31_v41, %v39_v43  ;;  %v36_v49 = vld [vmem:[%s1113_s0 + $0x70] sm:$0xf]  ;;  %v37_v50 = vld [vmem:[%s1113_s0 + $0x74] sm:$0xf]  ;;  %v42_v51 = vld [vmem:[%s1113_s0 + $0x88] sm:$0xf]  ;;  %v558_v52 = vmax.f32 %v144_v38, %v145_v39 }
   0xc   :  { %266 = vrot.lane.b32.xlu0 %v523_v37, %s430_s13  ;;  %v148_v53 = vmax.f32 %v28_v44, %v36_v49  ;;  %v149_v54 = vmax.f32 %v29_v45, %v37_v50  ;;  %v43_v55 = vld [vmem:[%s1113_s0 + $0x8c] sm:$0xf]  ;;  %v50_v56 = vld [vmem:[%s1113_s0 + $0xa8] sm:$0xf]  ;;  %v40_v58 = vld [vmem:[%s1113_s0 + $0x80] sm:$0xf] }
   0xd   :  { %v51_v57 = vld [vmem:[%s1113_s0 + $0xac] sm:$0xf]  ;;  %v41_v59 = vld [vmem:[%s1113_s0 + $0x84] sm:$0xf]  ;;  %v48_v60 = vld [vmem:[%s1113_s0 + $0xa0] sm:$0xf]  ;;  %v583_v62 = vmax.f32 %v150_v47, %v151_v48  ;;  %v154_v63 = vmax.f32 %v42_v51, %v50_v56 }
   0xe   :  { %v49_v61 = vld [vmem:[%s1113_s0 + $0xa4] sm:$0xf]  ;;  %v155_v0 = vmax.f32 %v43_v55, %v51_v57  ;;  %v46_v1 = vld [vmem:[%s1113_s0 + $0x98] sm:$0xf]  ;;  %v47_v2 = vld [vmem:[%s1113_s0 + $0x9c] sm:$0xf]  ;;  %v593_v3 = vmax.f32 %v148_v53, %v149_v54  ;;  %v152_v4 = vmax.f32 %v40_v58, %v48_v60 }
   0xf   :  { %274 = vrot.lane.b32.xlu1 %v545_v46, %s430_s13  ;;  %v153_v5 = vmax.f32 %v41_v59, %v49_v61  ;;  %v54_v6 = vld [vmem:[%s1113_s0 + $0xb8] sm:$0xf]  ;;  %v55_v7 = vld [vmem:[%s1113_s0 + $0xbc] sm:$0xf]  ;;  %v44_v8 = vld [vmem:[%s1113_s0 + $0x90] sm:$0xf] }
  0x10   :  { %272 = vrot.lane.b32.xlu0 %v558_v52, %s430_s13  ;;  %v45_v9 = vld [vmem:[%s1113_s0 + $0x94] sm:$0xf]  ;;  %v52_v10 = vld [vmem:[%s1113_s0 + $0xb0] sm:$0xf]  ;;  %v615_v12 = vmax.f32 %v154_v63, %v155_v0  ;;  %v158_v13 = vmax.f32 %v46_v1, %v54_v6  ;;  %v159_v14 = vmax.f32 %v47_v2, %v55_v7  ;;  %v58_v15 = vld [vmem:[%s1113_s0 + $0xc8] sm:$0xf] }
  0x11   :  { %v53_v11 = vld [vmem:[%s1113_s0 + $0xb4] sm:$0xf]  ;;  %v59_v17 = vld [vmem:[%s1113_s0 + $0xcc] sm:$0xf]  ;;  %v625_v18 = vmax.f32 %v152_v4, %v153_v5  ;;  %v156_v19 = vmax.f32 %v44_v8, %v52_v10  ;;  %v66_v21 = vld [vmem:[%s1113_s0 + $0xe8] sm:$0xf] }
  0x12   :  { %v157_v20 = vmax.f32 %v45_v9, %v53_v11  ;;  %v67_v23 = vld [vmem:[%s1113_s0 + $0xec] sm:$0xf]  ;;  %v56_v24 = vld [vmem:[%s1113_s0 + $0xc0] sm:$0xf]  ;;  %v57_v25 = vld [vmem:[%s1113_s0 + $0xc4] sm:$0xf]  ;;  %v647_v29 = vmax.f32 %v158_v13, %v159_v14  ;;  %v162_v30 = vmax.f32 %v58_v15, %v66_v21 }
  0x13   :  { %278 = vrot.lane.b32.xlu1 %v583_v62, %s430_s13  ;;  %v64_v26 = vld [vmem:[%s1113_s0 + $0xe0] sm:$0xf]  ;;  %v65_v28 = vld [vmem:[%s1113_s0 + $0xe4] sm:$0xf]  ;;  %v163_v31 = vmax.f32 %v59_v17, %v67_v23  ;;  %v62_v32 = vld [vmem:[%s1113_s0 + $0xd8] sm:$0xf] }
  0x14   :  { %276 = vrot.lane.b32.xlu0 %v593_v3, %s430_s13  ;;  %v63_v33 = vld [vmem:[%s1113_s0 + $0xdc] sm:$0xf]  ;;  %v657_v34 = vmax.f32 %v156_v19, %v157_v20  ;;  %v160_v35 = vmax.f32 %v56_v24, %v64_v26  ;;  %v161_v36 = vmax.f32 %v57_v25, %v65_v28  ;;  %v70_v38 = vld [vmem:[%s1113_s0 + $0xf8] sm:$0xf]  ;;  %v60_v40 = vld [vmem:[%s1113_s0 + $0xd0] sm:$0xf] }
  0x15   :  { %v71_v39 = vld [vmem:[%s1113_s0 + $0xfc] sm:$0xf]  ;;  %v61_v41 = vld [vmem:[%s1113_s0 + $0xd4] sm:$0xf]  ;;  %v68_v42 = vld [vmem:[%s1113_s0 + $0xf0] sm:$0xf]  ;;  %v679_v44 = vmax.f32 %v162_v30, %v163_v31  ;;  %v166_v45 = vmax.f32 %v62_v32, %v70_v38 }
  0x16   :  { %v69_v43 = vld [vmem:[%s1113_s0 + $0xf4] sm:$0xf]  ;;  %v167_v47 = vmax.f32 %v63_v33, %v71_v39  ;;  %v74_v48 = vld [vmem:[%s1113_s0 + $0x108] sm:$0xf]  ;;  %v75_v49 = vld [vmem:[%s1113_s0 + $0x10c] sm:$0xf]  ;;  %v689_v50 = vmax.f32 %v160_v35, %v161_v36  ;;  %v164_v51 = vmax.f32 %v60_v40, %v68_v42 }
  0x17   :  { %282 = vrot.lane.b32.xlu1 %v615_v12, %s430_s13  ;;  %v165_v53 = vmax.f32 %v61_v41, %v69_v43  ;;  %v82_v54 = vld [vmem:[%s1113_s0 + $0x128] sm:$0xf]  ;;  %v83_v55 = vld [vmem:[%s1113_s0 + $0x12c] sm:$0xf]  ;;  %v72_v56 = vld [vmem:[%s1113_s0 + $0x100] sm:$0xf] }
  0x18   :  { %280 = vrot.lane.b32.xlu0 %v625_v18, %s430_s13  ;;  %v73_v57 = vld [vmem:[%s1113_s0 + $0x104] sm:$0xf]  ;;  %v80_v58 = vld [vmem:[%s1113_s0 + $0x120] sm:$0xf]  ;;  %v711_v60 = vmax.f32 %v166_v45, %v167_v47  ;;  %v170_v61 = vmax.f32 %v74_v48, %v82_v54  ;;  %v171_v63 = vmax.f32 %v75_v49, %v83_v55  ;;  %v78_v0 = vld [vmem:[%s1113_s0 + $0x118] sm:$0xf] }
  0x19   :  { %v81_v59 = vld [vmem:[%s1113_s0 + $0x124] sm:$0xf]  ;;  %v79_v1 = vld [vmem:[%s1113_s0 + $0x11c] sm:$0xf]  ;;  %v721_v2 = vmax.f32 %v164_v51, %v165_v53  ;;  %v168_v4 = vmax.f32 %v72_v56, %v80_v58  ;;  %v86_v6 = vld [vmem:[%s1113_s0 + $0x138] sm:$0xf] }
  0x1a   :  { %v169_v5 = vmax.f32 %v73_v57, %v81_v59  ;;  %v87_v7 = vld [vmem:[%s1113_s0 + $0x13c] sm:$0xf]  ;;  %v76_v8 = vld [vmem:[%s1113_s0 + $0x110] sm:$0xf]  ;;  %v77_v9 = vld [vmem:[%s1113_s0 + $0x114] sm:$0xf]  ;;  %v743_v13 = vmax.f32 %v170_v61, %v171_v63  ;;  %v174_v14 = vmax.f32 %v78_v0, %v86_v6 }
  0x1b   :  { %286 = vrot.lane.b32.xlu1 %v647_v29, %s430_s13  ;;  %v84_v10 = vld [vmem:[%s1113_s0 + $0x130] sm:$0xf]  ;;  %v85_v11 = vld [vmem:[%s1113_s0 + $0x134] sm:$0xf]  ;;  %v175_v15 = vmax.f32 %v79_v1, %v87_v7  ;;  %v90_v17 = vld [vmem:[%s1113_s0 + $0x148] sm:$0xf] }
  0x1c   :  { %284 = vrot.lane.b32.xlu0 %v657_v34, %s430_s13  ;;  %v91_v19 = vld [vmem:[%s1113_s0 + $0x14c] sm:$0xf]  ;;  %v753_v20 = vmax.f32 %v168_v4, %v169_v5  ;;  %v172_v21 = vmax.f32 %v76_v8, %v84_v10  ;;  %v173_v23 = vmax.f32 %v77_v9, %v85_v11  ;;  %v98_v24 = vld [vmem:[%s1113_s0 + $0x168] sm:$0xf]  ;;  %v88_v26 = vld [vmem:[%s1113_s0 + $0x140] sm:$0xf] }
  0x1d   :  { %v99_v25 = vld [vmem:[%s1113_s0 + $0x16c] sm:$0xf]  ;;  %v89_v28 = vld [vmem:[%s1113_s0 + $0x144] sm:$0xf]  ;;  %v96_v30 = vld [vmem:[%s1113_s0 + $0x160] sm:$0xf]  ;;  %v775_v32 = vmax.f32 %v174_v14, %v175_v15  ;;  %v178_v33 = vmax.f32 %v90_v17, %v98_v24 }
  0x1e   :  { %v97_v31 = vld [vmem:[%s1113_s0 + $0x164] sm:$0xf]  ;;  %v179_v35 = vmax.f32 %v91_v19, %v99_v25  ;;  %v94_v36 = vld [vmem:[%s1113_s0 + $0x158] sm:$0xf]  ;;  %v95_v38 = vld [vmem:[%s1113_s0 + $0x15c] sm:$0xf]  ;;  %v785_v39 = vmax.f32 %v172_v21, %v173_v23  ;;  %v176_v40 = vmax.f32 %v88_v26, %v96_v30 }
  0x1f   :  { %290 = vrot.lane.b32.xlu1 %v679_v44, %s430_s13  ;;  %v177_v41 = vmax.f32 %v89_v28, %v97_v31  ;;  %v102_v42 = vld [vmem:[%s1113_s0 + $0x178] sm:$0xf]  ;;  %v103_v43 = vld [vmem:[%s1113_s0 + $0x17c] sm:$0xf]  ;;  %v92_v45 = vld [vmem:[%s1113_s0 + $0x150] sm:$0xf] }
  0x20   :  { %288 = vrot.lane.b32.xlu0 %v689_v50, %s430_s13  ;;  %v93_v47 = vld [vmem:[%s1113_s0 + $0x154] sm:$0xf]  ;;  %v100_v48 = vld [vmem:[%s1113_s0 + $0x170] sm:$0xf]  ;;  %v807_v51 = vmax.f32 %v178_v33, %v179_v35  ;;  %v182_v53 = vmax.f32 %v94_v36, %v102_v42  ;;  %v183_v54 = vmax.f32 %v95_v38, %v103_v43  ;;  %v106_v55 = vld [vmem:[%s1113_s0 + $0x188] sm:$0xf] }
  0x21   :  { %v101_v49 = vld [vmem:[%s1113_s0 + $0x174] sm:$0xf]  ;;  %v107_v56 = vld [vmem:[%s1113_s0 + $0x18c] sm:$0xf]  ;;  %v817_v57 = vmax.f32 %v176_v40, %v177_v41  ;;  %v180_v58 = vmax.f32 %v92_v45, %v100_v48  ;;  %v114_v61 = vld [vmem:[%s1113_s0 + $0x1a8] sm:$0xf] }
  0x22   :  { %v181_v59 = vmax.f32 %v93_v47, %v101_v49  ;;  %v115_v63 = vld [vmem:[%s1113_s0 + $0x1ac] sm:$0xf]  ;;  %v104_v0 = vld [vmem:[%s1113_s0 + $0x180] sm:$0xf]  ;;  %v105_v1 = vld [vmem:[%s1113_s0 + $0x184] sm:$0xf]  ;;  %v839_v6 = vmax.f32 %v182_v53, %v183_v54  ;;  %v186_v7 = vmax.f32 %v106_v55, %v114_v61 }
  0x23   :  { %294 = vrot.lane.b32.xlu1 %v711_v60, %s430_s13  ;;  %v112_v4 = vld [vmem:[%s1113_s0 + $0x1a0] sm:$0xf]  ;;  %v113_v5 = vld [vmem:[%s1113_s0 + $0x1a4] sm:$0xf]  ;;  %v187_v8 = vmax.f32 %v107_v56, %v115_v63  ;;  %v110_v9 = vld [vmem:[%s1113_s0 + $0x198] sm:$0xf] }
  0x24   :  { %292 = vrot.lane.b32.xlu0 %v721_v2, %s430_s13  ;;  %v111_v10 = vld [vmem:[%s1113_s0 + $0x19c] sm:$0xf]  ;;  %v849_v11 = vmax.f32 %v180_v58, %v181_v59  ;;  %v184_v14 = vmax.f32 %v104_v0, %v112_v4  ;;  %v185_v15 = vmax.f32 %v105_v1, %v113_v5  ;;  %v118_v17 = vld [vmem:[%s1113_s0 + $0x1b8] sm:$0xf]  ;;  %v108_v21 = vld [vmem:[%s1113_s0 + $0x190] sm:$0xf] }
  0x25   :  { %v119_v19 = vld [vmem:[%s1113_s0 + $0x1bc] sm:$0xf]  ;;  %v109_v23 = vld [vmem:[%s1113_s0 + $0x194] sm:$0xf]  ;;  %v116_v24 = vld [vmem:[%s1113_s0 + $0x1b0] sm:$0xf]  ;;  %v871_v26 = vmax.f32 %v186_v7, %v187_v8  ;;  %v190_v28 = vmax.f32 %v110_v9, %v118_v17 }
  0x26   :  { %v117_v25 = vld [vmem:[%s1113_s0 + $0x1b4] sm:$0xf]  ;;  %v191_v30 = vmax.f32 %v111_v10, %v119_v19  ;;  %v122_v31 = vld [vmem:[%s1113_s0 + $0x1c8] sm:$0xf]  ;;  %v123_v33 = vld [vmem:[%s1113_s0 + $0x1cc] sm:$0xf]  ;;  %v881_v35 = vmax.f32 %v184_v14, %v185_v15  ;;  %v188_v36 = vmax.f32 %v108_v21, %v116_v24 }
  0x27   :  { %298 = vrot.lane.b32.xlu1 %v743_v13, %s430_s13  ;;  %v189_v38 = vmax.f32 %v109_v23, %v117_v25  ;;  %v130_v40 = vld [vmem:[%s1113_s0 + $0x1e8] sm:$0xf]  ;;  %v131_v41 = vld [vmem:[%s1113_s0 + $0x1ec] sm:$0xf]  ;;  %v120_v42 = vld [vmem:[%s1113_s0 + $0x1c0] sm:$0xf] }
  0x28   :  { %296 = vrot.lane.b32.xlu0 %v753_v20, %s430_s13  ;;  %v121_v43 = vld [vmem:[%s1113_s0 + $0x1c4] sm:$0xf]  ;;  %v128_v45 = vld [vmem:[%s1113_s0 + $0x1e0] sm:$0xf]  ;;  %v903_v48 = vmax.f32 %v190_v28, %v191_v30  ;;  %v194_v49 = vmax.f32 %v122_v31, %v130_v40  ;;  %v195_v53 = vmax.f32 %v123_v33, %v131_v41  ;;  %v126_v54 = vld [vmem:[%s1113_s0 + $0x1d8] sm:$0xf] }
  0x29   :  { %v129_v47 = vld [vmem:[%s1113_s0 + $0x1e4] sm:$0xf]  ;;  %v127_v55 = vld [vmem:[%s1113_s0 + $0x1dc] sm:$0xf]  ;;  %v913_v56 = vmax.f32 %v188_v36, %v189_v38  ;;  %v192_v58 = vmax.f32 %v120_v42, %v128_v45  ;;  %v134_v61 = vld [vmem:[%s1113_s0 + $0x1f8] sm:$0xf] }
  0x2a   :  { %v193_v59 = vmax.f32 %v121_v43, %v129_v47  ;;  %v135_v63 = vld [vmem:[%s1113_s0 + $0x1fc] sm:$0xf]  ;;  %v124_v0 = vld [vmem:[%s1113_s0 + $0x1d0] sm:$0xf]  ;;  %v125_v1 = vld [vmem:[%s1113_s0 + $0x1d4] sm:$0xf]  ;;  %v935_v7 = vmax.f32 %v194_v49, %v195_v53  ;;  %v198_v8 = vmax.f32 %v126_v54, %v134_v61 }
  0x2b   :  { %302 = vrot.lane.b32.xlu1 %v775_v32, %s430_s13  ;;  %v132_v4 = vld [vmem:[%s1113_s0 + $0x1f0] sm:$0xf]  ;;  %v133_v5 = vld [vmem:[%s1113_s0 + $0x1f4] sm:$0xf]  ;;  %v199_v9 = vmax.f32 %v127_v55, %v135_v63 }
  0x2c   :  { %300 = vrot.lane.b32.xlu0 %v785_v39, %s430_s13  ;;  %v939_v10 = vmax.f32 %v192_v58, %v193_v59  ;;  %v196_v14 = vmax.f32 %v124_v0, %v132_v4  ;;  %v197_v15 = vmax.f32 %v125_v1, %v133_v5 }
  0x2d   :  { %v943_v17 = vmax.f32 %v198_v8, %v199_v9 }
  0x2e   :  { %v947_v19 = vmax.f32 %v196_v14, %v197_v15 }
  0x2f   :  { %306 = vrot.lane.b32.xlu1 %v807_v51, %s430_s13 }
  0x30   :  { %304 = vrot.lane.b32.xlu0 %v817_v57, %s430_s13 }
  0x33   :  { %310 = vrot.lane.b32.xlu1 %v839_v6, %s430_s13 }
  0x34   :  { %308 = vrot.lane.b32.xlu0 %v849_v11, %s430_s13 }
  0x37   :  { %314 = vrot.lane.b32.xlu1 %v871_v26, %s430_s13 }
  0x38   :  { %312 = vrot.lane.b32.xlu0 %v881_v35, %s430_s13 }
  0x3b   :  { %318 = vrot.lane.b32.xlu1 %v903_v48, %s430_s13 }
  0x3c   :  { %316 = vrot.lane.b32.xlu0 %v913_v56, %s430_s13 }
  0x3f   :  { %322 = vrot.lane.b32.xlu1 %v935_v7, %s430_s13 }
  0x40   :  { %320 = vrot.lane.b32.xlu0 %v939_v10, %s430_s13 }
  0x43   :  { %326 = vrot.lane.b32.xlu1 %v943_v17, %s430_s13 }
  0x44   :  { %324 = vrot.lane.b32.xlu0 %v947_v19, %s430_s13 }
  0x79   :  { %v269_v21 = vpop.permute.xlu1 %268 }
  0x7a   :  { %v362_v23 = vmax.f32 %v477_v16, %v269_v21  ;;  %v265_v24 = vpop.permute.xlu0 %264 }
  0x7b   :  { %v360_v25 = vmax.f32 %v488_v22, %v265_v24 }
  0x7c   :  { %395 = vst.msk [vmem:[%s1114_s1 + $0x8] sm:$0xf] %vm392_vm0, %v362_v23 }
  0x7d   :  { %393 = vst.msk [vmem:[%s1114_s1] sm:$0xf] %vm392_vm0, %v360_v25  ;;  %v271_v28 = vpop.permute.xlu1 %270 }
  0x7e   :  { %v363_v30 = vmax.f32 %v501_v27, %v271_v28  ;;  %v267_v31 = vpop.permute.xlu0 %266 }
  0x7f   :  { %v361_v33 = vmax.f32 %v523_v37, %v267_v31 }
  0x80   :  { %396 = vst.msk [vmem:[%s1114_s1 + $0xc] sm:$0xf] %vm392_vm0, %v363_v30 }
  0x81   :  { %394 = vst.msk [vmem:[%s1114_s1 + $0x4] sm:$0xf] %vm392_vm0, %v361_v33  ;;  %v275_v16 = vpop.permute.xlu1 %274 }
  0x82   :  { %v365_v22 = vmax.f32 %v545_v46, %v275_v16  ;;  %v273_v36 = vpop.permute.xlu0 %272 }
  0x83   :  { %v364_v38 = vmax.f32 %v558_v52, %v273_v36 }
  0x84   :  { %398 = vst.msk [vmem:[%s1114_s1 + $0x14] sm:$0xf] %vm392_vm0, %v365_v22 }
  0x85   :  { %397 = vst.msk [vmem:[%s1114_s1 + $0x10] sm:$0xf] %vm392_vm0, %v364_v38  ;;  %v279_v27 = vpop.permute.xlu1 %278 }
  0x86   :  { %v367_v37 = vmax.f32 %v583_v62, %v279_v27  ;;  %v277_v40 = vpop.permute.xlu0 %276 }
  0x87   :  { %v366_v41 = vmax.f32 %v593_v3, %v277_v40 }
  0x88   :  { %400 = vst.msk [vmem:[%s1114_s1 + $0x1c] sm:$0xf] %vm392_vm0, %v367_v37 }
  0x89   :  { %399 = vst.msk [vmem:[%s1114_s1 + $0x18] sm:$0xf] %vm392_vm0, %v366_v41  ;;  %v283_v46 = vpop.permute.xlu1 %282 }
  0x8a   :  { %v369_v52 = vmax.f32 %v615_v12, %v283_v46  ;;  %v281_v42 = vpop.permute.xlu0 %280 }
  0x8b   :  { %v368_v43 = vmax.f32 %v625_v18, %v281_v42 }
  0x8c   :  { %402 = vst.msk [vmem:[%s1114_s1 + $0x24] sm:$0xf] %vm392_vm0, %v369_v52 }
  0x8d   :  { %401 = vst.msk [vmem:[%s1114_s1 + $0x20] sm:$0xf] %vm392_vm0, %v368_v43  ;;  %v287_v62 = vpop.permute.xlu1 %286 }
  0x8e   :  { %v371_v3 = vmax.f32 %v647_v29, %v287_v62  ;;  %v285_v45 = vpop.permute.xlu0 %284 }
  0x8f   :  { %v370_v47 = vmax.f32 %v657_v34, %v285_v45 }
  0x90   :  { %404 = vst.msk [vmem:[%s1114_s1 + $0x2c] sm:$0xf] %vm392_vm0, %v371_v3 }
  0x91   :  { %403 = vst.msk [vmem:[%s1114_s1 + $0x28] sm:$0xf] %vm392_vm0, %v370_v47  ;;  %v291_v12 = vpop.permute.xlu1 %290 }
  0x92   :  { %v373_v18 = vmax.f32 %v679_v44, %v291_v12  ;;  %v289_v49 = vpop.permute.xlu0 %288 }
  0x93   :  { %v372_v53 = vmax.f32 %v689_v50, %v289_v49 }
  0x94   :  { %406 = vst.msk [vmem:[%s1114_s1 + $0x34] sm:$0xf] %vm392_vm0, %v373_v18 }
  0x95   :  { %405 = vst.msk [vmem:[%s1114_s1 + $0x30] sm:$0xf] %vm392_vm0, %v372_v53  ;;  %v295_v29 = vpop.permute.xlu1 %294 }
  0x96   :  { %v375_v34 = vmax.f32 %v711_v60, %v295_v29  ;;  %v293_v54 = vpop.permute.xlu0 %292 }
  0x97   :  { %v374_v55 = vmax.f32 %v721_v2, %v293_v54 }
  0x98   :  { %408 = vst.msk [vmem:[%s1114_s1 + $0x3c] sm:$0xf] %vm392_vm0, %v375_v34 }
  0x99   :  { %407 = vst.msk [vmem:[%s1114_s1 + $0x38] sm:$0xf] %vm392_vm0, %v374_v55  ;;  %v299_v44 = vpop.permute.xlu1 %298 }
  0x9a   :  { %v377_v50 = vmax.f32 %v743_v13, %v299_v44  ;;  %v297_v58 = vpop.permute.xlu0 %296 }
  0x9b   :  { %v376_v59 = vmax.f32 %v753_v20, %v297_v58 }
  0x9c   :  { %410 = vst.msk [vmem:[%s1114_s1 + $0x44] sm:$0xf] %vm392_vm0, %v377_v50 }
  0x9d   :  { %409 = vst.msk [vmem:[%s1114_s1 + $0x40] sm:$0xf] %vm392_vm0, %v376_v59  ;;  %v303_v60 = vpop.permute.xlu1 %302 }
  0x9e   :  { %v379_v2 = vmax.f32 %v775_v32, %v303_v60  ;;  %v301_v61 = vpop.permute.xlu0 %300 }
  0x9f   :  { %v378_v63 = vmax.f32 %v785_v39, %v301_v61 }
  0xa0   :  { %412 = vst.msk [vmem:[%s1114_s1 + $0x4c] sm:$0xf] %vm392_vm0, %v379_v2 }
  0xa1   :  { %411 = vst.msk [vmem:[%s1114_s1 + $0x48] sm:$0xf] %vm392_vm0, %v378_v63  ;;  %v307_v13 = vpop.permute.xlu1 %306 }
  0xa2   :  { %v381_v20 = vmax.f32 %v807_v51, %v307_v13  ;;  %v305_v0 = vpop.permute.xlu0 %304 }
  0xa3   :  { %v380_v1 = vmax.f32 %v817_v57, %v305_v0 }
  0xa4   :  { %414 = vst.msk [vmem:[%s1114_s1 + $0x54] sm:$0xf] %vm392_vm0, %v381_v20 }
  0xa5   :  { %413 = vst.msk [vmem:[%s1114_s1 + $0x50] sm:$0xf] %vm392_vm0, %v380_v1  ;;  %v311_v32 = vpop.permute.xlu1 %310 }
  0xa6   :  { %v383_v39 = vmax.f32 %v839_v6, %v311_v32  ;;  %v309_v4 = vpop.permute.xlu0 %308 }
  0xa7   :  { %v382_v5 = vmax.f32 %v849_v11, %v309_v4 }
  0xa8   :  { %416 = vst.msk [vmem:[%s1114_s1 + $0x5c] sm:$0xf] %vm392_vm0, %v383_v39 }
  0xa9   :  { %415 = vst.msk [vmem:[%s1114_s1 + $0x58] sm:$0xf] %vm392_vm0, %v382_v5  ;;  %v315_v51 = vpop.permute.xlu1 %314 }
  0xaa   :  { %v385_v57 = vmax.f32 %v871_v26, %v315_v51  ;;  %v313_v8 = vpop.permute.xlu0 %312 }
  0xab   :  { %v384_v9 = vmax.f32 %v881_v35, %v313_v8 }
  0xac   :  { %418 = vst.msk [vmem:[%s1114_s1 + $0x64] sm:$0xf] %vm392_vm0, %v385_v57 }
  0xad   :  { %417 = vst.msk [vmem:[%s1114_s1 + $0x60] sm:$0xf] %vm392_vm0, %v384_v9  ;;  %v319_v6 = vpop.permute.xlu1 %318 }
  0xae   :  { %v387_v11 = vmax.f32 %v903_v48, %v319_v6  ;;  %v317_v14 = vpop.permute.xlu0 %316 }
  0xaf   :  { %v386_v15 = vmax.f32 %v913_v56, %v317_v14 }
  0xb0   :  { %420 = vst.msk [vmem:[%s1114_s1 + $0x6c] sm:$0xf] %vm392_vm0, %v387_v11 }
  0xb1   :  { %419 = vst.msk [vmem:[%s1114_s1 + $0x68] sm:$0xf] %vm392_vm0, %v386_v15  ;;  %v323_v26 = vpop.permute.xlu1 %322 }
  0xb2   :  { %v389_v35 = vmax.f32 %v935_v7, %v323_v26  ;;  %v321_v21 = vpop.permute.xlu0 %320 }
  0xb3   :  { %v388_v23 = vmax.f32 %v939_v10, %v321_v21 }
  0xb4   :  { %422 = vst.msk [vmem:[%s1114_s1 + $0x74] sm:$0xf] %vm392_vm0, %v389_v35 }
  0xb5   :  { %421 = vst.msk [vmem:[%s1114_s1 + $0x70] sm:$0xf] %vm392_vm0, %v388_v23  ;;  %v327_v48 = vpop.permute.xlu1 %326 }
  0xb6   :  { %v391_v56 = vmax.f32 %v943_v17, %v327_v48  ;;  %v325_v24 = vpop.permute.xlu0 %324 }
  0xb7   :  { %v390_v25 = vmax.f32 %v947_v19, %v325_v24 }
  0xb8   :  { %424 = vst.msk [vmem:[%s1114_s1 + $0x7c] sm:$0xf] %vm392_vm0, %v391_v56 }
  0xb9   :  { %423 = vst.msk [vmem:[%s1114_s1 + $0x78] sm:$0xf] %vm392_vm0, %v390_v25 }

// kernel: cnn_vanilla_forward.14
= control target key start
LH: loop header
LB: loop body
LE: loop exit
PB: predicated region body
PF: predicated region fallthrough
CT: control target
= control target key end

     0   :  { %s118_s13 = smov 112   ;;  %vm104_vm0 = vcmask 123904   ;;  %s265_s0 = inlined_call_operand.vmem [shape: f32[4,4,2,2,32], index: 0, kind: input, shape index: {}]   ;;  %s266_s1 = inlined_call_operand.vmem [shape: f32[4,2,2,16], index: 1, kind: output, shape index: {}]  }
   0x1   :  { %v16_v0 = vld [vmem:[%s265_s0 + $0x10] sm:$0x3]  ;;  %v17_v1 = vld [vmem:[%s265_s0 + $0x12] sm:$0x3]  ;;  %v20_v2 = vld [vmem:[%s265_s0 + $0x18] sm:$0x3] }
   0x2   :  { %v21_v3 = vld [vmem:[%s265_s0 + $0x1a] sm:$0x3]  ;;  %v44_v4 = vmax.f32 %v16_v0, %v20_v2  ;;  %v8_v5 = vld [vmem:[%s265_s0] sm:$0x3]  ;;  %v9_v6 = vld [vmem:[%s265_s0 + $0x2] sm:$0x3] }
   0x3   :  { %v45_v7 = vmax.f32 %v17_v1, %v21_v3  ;;  %v12_v8 = vld [vmem:[%s265_s0 + $0x8] sm:$0x3]  ;;  %v13_v9 = vld [vmem:[%s265_s0 + $0xa] sm:$0x3]  ;;  %v18_v10 = vld [vmem:[%s265_s0 + $0x14] sm:$0x3] }
   0x4   :  { %v40_v11 = vmax.f32 %v8_v5, %v12_v8  ;;  %v41_v12 = vmax.f32 %v9_v6, %v13_v9  ;;  %v19_v13 = vld [vmem:[%s265_s0 + $0x16] sm:$0x3]  ;;  %v22_v14 = vld [vmem:[%s265_s0 + $0x1c] sm:$0x3]  ;;  %v23_v15 = vld [vmem:[%s265_s0 + $0x1e] sm:$0x3] }
   0x5   :  { %v58_v16 = vmax.f32 %v44_v4, %v45_v7  ;;  %v46_v17 = vmax.f32 %v18_v10, %v22_v14  ;;  %v47_v18 = vmax.f32 %v19_v13, %v23_v15  ;;  %v10_v19 = vld [vmem:[%s265_s0 + $0x4] sm:$0x3]  ;;  %v11_v20 = vld [vmem:[%s265_s0 + $0x6] sm:$0x3]  ;;  %v14_v21 = vld [vmem:[%s265_s0 + $0xc] sm:$0x3] }
   0x6   :  { %v56_v22 = vmax.f32 %v40_v11, %v41_v12  ;;  %v15_v23 = vld [vmem:[%s265_s0 + $0xe] sm:$0x3]  ;;  %v42_v24 = vmax.f32 %v10_v19, %v14_v21  ;;  %v26_v25 = vld [vmem:[%s265_s0 + $0x24] sm:$0x3]  ;;  %v27_v26 = vld [vmem:[%s265_s0 + $0x26] sm:$0x3] }
   0x7   :  { %76 = vrot.lane.b32.xlu1 %v58_v16, %s118_s13  ;;  %v59_v27 = vmax.f32 %v46_v17, %v47_v18  ;;  %v43_v28 = vmax.f32 %v11_v20, %v15_v23  ;;  %v30_v29 = vld [vmem:[%s265_s0 + $0x2c] sm:$0x3]  ;;  %v31_v30 = vld [vmem:[%s265_s0 + $0x2e] sm:$0x3]  ;;  %v24_v31 = vld [vmem:[%s265_s0 + $0x20] sm:$0x3] }
   0x8   :  { %72 = vrot.lane.b32.xlu0 %v56_v22, %s118_s13  ;;  %v50_v32 = vmax.f32 %v26_v25, %v30_v29  ;;  %v51_v33 = vmax.f32 %v27_v26, %v31_v30  ;;  %v25_v34 = vld [vmem:[%s265_s0 + $0x22] sm:$0x3]  ;;  %v28_v35 = vld [vmem:[%s265_s0 + $0x28] sm:$0x3]  ;;  %v29_v36 = vld [vmem:[%s265_s0 + $0x2a] sm:$0x3] }
   0x9   :  { %v57_v37 = vmax.f32 %v42_v24, %v43_v28  ;;  %v48_v38 = vmax.f32 %v24_v31, %v28_v35  ;;  %v49_v39 = vmax.f32 %v25_v34, %v29_v36  ;;  %v34_v40 = vld [vmem:[%s265_s0 + $0x34] sm:$0x3]  ;;  %v35_v41 = vld [vmem:[%s265_s0 + $0x36] sm:$0x3]  ;;  %v38_v42 = vld [vmem:[%s265_s0 + $0x3c] sm:$0x3] }
   0xa   :  { %v39_v43 = vld [vmem:[%s265_s0 + $0x3e] sm:$0x3]  ;;  %v32_v44 = vld [vmem:[%s265_s0 + $0x30] sm:$0x3]  ;;  %v33_v45 = vld [vmem:[%s265_s0 + $0x32] sm:$0x3]  ;;  %v61_v46 = vmax.f32 %v50_v32, %v51_v33  ;;  %v54_v47 = vmax.f32 %v34_v40, %v38_v42 }
   0xb   :  { %78 = vrot.lane.b32.xlu1 %v59_v27, %s118_s13  ;;  %v55_v48 = vmax.f32 %v35_v41, %v39_v43  ;;  %v36_v49 = vld [vmem:[%s265_s0 + $0x38] sm:$0x3]  ;;  %v37_v50 = vld [vmem:[%s265_s0 + $0x3a] sm:$0x3]  ;;  %v60_v51 = vmax.f32 %v48_v38, %v49_v39 }
   0xc   :  { %74 = vrot.lane.b32.xlu0 %v57_v37, %s118_s13  ;;  %v52_v52 = vmax.f32 %v32_v44, %v36_v49  ;;  %v53_v53 = vmax.f32 %v33_v45, %v37_v50 }
   0xd   :  { %v63_v54 = vmax.f32 %v54_v47, %v55_v48 }
   0xe   :  { %v62_v55 = vmax.f32 %v52_v52, %v53_v53 }
   0xf   :  { %82 = vrot.lane.b32.xlu1 %v61_v46, %s118_s13 }
  0x10   :  { %80 = vrot.lane.b32.xlu0 %v60_v51, %s118_s13 }
  0x13   :  { %86 = vrot.lane.b32.xlu1 %v63_v54, %s118_s13 }
  0x14   :  { %84 = vrot.lane.b32.xlu0 %v62_v55, %s118_s13 }
  0x79   :  { %v77_v56 = vpop.permute.xlu1 %76 }
  0x7a   :  { %v98_v57 = vmax.f32 %v58_v16, %v77_v56  ;;  %v73_v58 = vpop.permute.xlu0 %72 }
  0x7b   :  { %v96_v59 = vmax.f32 %v56_v22, %v73_v58 }
  0x7c   :  { %107 = vst.msk [vmem:[%s266_s1 + $0x4] sm:$0x3] %vm104_vm0, %v98_v57 }
  0x7d   :  { %105 = vst.msk [vmem:[%s266_s1] sm:$0x3] %vm104_vm0, %v96_v59  ;;  %v79_v60 = vpop.permute.xlu1 %78 }
  0x7e   :  { %v99_v61 = vmax.f32 %v59_v27, %v79_v60  ;;  %v75_v62 = vpop.permute.xlu0 %74 }
  0x7f   :  { %v97_v63 = vmax.f32 %v57_v37, %v75_v62 }
  0x80   :  { %108 = vst.msk [vmem:[%s266_s1 + $0x6] sm:$0x3] %vm104_vm0, %v99_v61 }
  0x81   :  { %106 = vst.msk [vmem:[%s266_s1 + $0x2] sm:$0x3] %vm104_vm0, %v97_v63  ;;  %v83_v0 = vpop.permute.xlu1 %82 }
  0x82   :  { %v101_v1 = vmax.f32 %v61_v46, %v83_v0  ;;  %v81_v2 = vpop.permute.xlu0 %80 }
  0x83   :  { %v100_v3 = vmax.f32 %v60_v51, %v81_v2 }
  0x84   :  { %110 = vst.msk [vmem:[%s266_s1 + $0xa] sm:$0x3] %vm104_vm0, %v101_v1 }
  0x85   :  { %109 = vst.msk [vmem:[%s266_s1 + $0x8] sm:$0x3] %vm104_vm0, %v100_v3  ;;  %v87_v4 = vpop.permute.xlu1 %86 }
  0x86   :  { %v103_v5 = vmax.f32 %v63_v54, %v87_v4  ;;  %v85_v6 = vpop.permute.xlu0 %84 }
  0x87   :  { %v102_v7 = vmax.f32 %v62_v55, %v85_v6 }
  0x88   :  { %112 = vst.msk [vmem:[%s266_s1 + $0xe] sm:$0x3] %vm104_vm0, %v103_v5 }
  0x89   :  { %111 = vst.msk [vmem:[%s266_s1 + $0xc] sm:$0x3] %vm104_vm0, %v102_v7 }

// kernel: cnn_vanilla_forward.13
= control target key start
LH: loop header
LB: loop body
LE: loop exit
PB: predicated region body
PF: predicated region fallthrough
CT: control target
= control target key end

     0   :  { %v886_v0 = vmov 0   ;;  %vm422_vm0 = vcmask 392192   ;;  %vm657_vm1 = vcmask 130048   ;;  %s1188_s1 = inlined_call_operand.vmem [shape: bf16[432,16], index: 1, kind: input, shape index: {}]   ;;  %s1189_s0 = inlined_call_operand.vmem [shape: bf16[128,432], index: 0, kind: input, shape index: {}]   ;;  %s1190_s2 = inlined_call_operand.vmem [shape: f32[1,16], index: 2, kind: input, shape index: {}]   ;;  %s1191_s3 = inlined_call_operand.vmem [shape: f32[128,16], index: 3, kind: output, shape index: {}]  }
   0x1   :  { %544 = vmatprep.subr.bf16.mxu1 %v886_v0  ;;  %v811_v1 = vld [vmem:[%s1188_s1 + $0x78] sm:$0xff]   ;;  %v814_v4 = vld [vmem:[%s1188_s1 + $0x70] sm:$0xff]   ;;  %v817_v7 = vld [vmem:[%s1188_s1 + $0x68] sm:$0xff]  }
   0x2   :  { %v812_v2 = vld [vmem:[%s1188_s1 + $0xb8] sm:$0xff]   ;;  %746 = vmatprep.subr.bf16.mxu0 %v811_v1  ;;  %v815_v5 = vld [vmem:[%s1188_s1 + $0xb0] sm:$0xff]   ;;  %v818_v8 = vld [vmem:[%s1188_s1 + $0xa8] sm:$0xff]  }
   0x3   :  { %v813_v3 = vld [vmem:[%s1188_s1 + $0x38] sm:$0xff]   ;;  %545 = vmatpush1.bf16.msra.mxu1 %v812_v2  ;;  %v816_v6 = vld [vmem:[%s1188_s1 + $0x30] sm:$0xff]   ;;  %v819_v9 = vld [vmem:[%s1188_s1 + $0x28] sm:$0xff]  }
   0x4   :  { %747 = vmatpush3.bf16.msra.mxu0 %v813_v3  ;;  %546 = vmatprep.subr.bf16.mxu1 %v886_v0  ;;  %v820_v10 = vld [vmem:[%s1188_s1 + $0x60] sm:$0xff]   ;;  %v823_v13 = vld [vmem:[%s1188_s1 + $0x58] sm:$0xff]   ;;  %v826_v16 = vld [vmem:[%s1188_s1 + $0x50] sm:$0xff]  }
   0x5   :  { %748 = vmatprep.subr.bf16.mxu0 %v814_v4  ;;  %v821_v11 = vld [vmem:[%s1188_s1 + $0xa0] sm:$0xff]   ;;  %v824_v14 = vld [vmem:[%s1188_s1 + $0x98] sm:$0xff]   ;;  %v827_v17 = vld [vmem:[%s1188_s1 + $0x90] sm:$0xff]  }
   0x6   :  { %v822_v12 = vld [vmem:[%s1188_s1 + $0x20] sm:$0xff]   ;;  %v825_v15 = vld [vmem:[%s1188_s1 + $0x18] sm:$0xff]   ;;  %v828_v18 = vld [vmem:[%s1188_s1 + $0x10] sm:$0xff]  }
   0x7   :  { %547 = vmatpush1.bf16.msra.mxu1 %v815_v5  ;;  %v829_v19 = vld [vmem:[%s1188_s1 + $0x48] sm:$0xff]   ;;  %v832_v22 = vld [vmem:[%s1188_s1 + $0x40] sm:$0xff]   ;;  %v838_v28 = vld [vmem:[%s1188_s1 + $0xd0] sm:$0xff]  }
   0x8   :  { %749 = vmatpush3.bf16.msra.mxu0 %v816_v6  ;;  %548 = vmatprep.subr.bf16.mxu1 %v886_v0  ;;  %v830_v20 = vld [vmem:[%s1188_s1 + $0x88] sm:$0xff]   ;;  %v837_v23 = vld [vmem:[%s1189_s0 + $0x4] ss:$16 sps:$4 sm:$0xff]   ;;  %v835_v26 = vld [vmem:[%s1189_s0] ss:$16 sps:$4 sm:$0xff]  }
   0x9   :  { %750 = vmatprep.subr.bf16.mxu0 %v817_v7  ;;  %v831_v21 = vld [vmem:[%s1188_s1 + $0x8] sm:$0xff]   ;;  %v833_v24 = vld [vmem:[%s1188_s1 + $0x80] sm:$0xff]   ;;  %479 = vmatprep.mubr.bf16.mxu0 %v837_v23 }
   0xa   :  { %v834_v25 = vld [vmem:[%s1188_s1] sm:$0xff]   ;;  %v846_v27 = vld [vmem:[%s1189_s0 + $0xc] ss:$16 sps:$4 sm:$0xff]   ;;  %v844_v34 = vld [vmem:[%s1189_s0 + $0x8] ss:$16 sps:$4 sm:$0xff]  }
   0xb   :  { %549 = vmatpush1.bf16.msra.mxu1 %v818_v8  ;;  %v840_v29 = vld [vmem:[%s1189_s0 + $0x24] ss:$16 sps:$4 sm:$0xff]   ;;  %738 = vmatprep.mubr.msk.bf16.mxu1 %vm422_vm0, %v846_v27  ;;  %v839_v30 = vld [vmem:[%s1188_s1 + $0xc8] sm:$0xff]   ;;  %v842_v31 = vld [vmem:[%s1189_s0 + $0x20] ss:$16 sps:$4 sm:$0xff]  }
   0xc   :  { %751 = vmatpush3.bf16.msra.mxu0 %v819_v9  ;;  %550 = vmatprep.subr.bf16.mxu1 %v886_v0  ;;  %v843_v32 = vld [vmem:[%s1188_s1 + $0xc0] sm:$0xff]   ;;  %v850_v35 = vld [vmem:[%s1189_s0 + $0x2c] ss:$16 sps:$4 sm:$0xff]   ;;  %v852_v38 = vld [vmem:[%s1189_s0 + $0x28] ss:$16 sps:$4 sm:$0xff]  }
   0xd   :  { %752 = vmatprep.subr.bf16.mxu0 %v820_v10  ;;  %v847_v33 = vld [vmem:[%s1189_s0 + $0x44] ss:$16 sps:$4 sm:$0xff]   ;;  %v849_v36 = vld [vmem:[%s1189_s0 + $0x40] ss:$16 sps:$4 sm:$0xff]   ;;  %v856_v39 = vld [vmem:[%s1189_s0 + $0x4c] ss:$16 sps:$4 sm:$0xff]  }
   0xe   :  { %v853_v37 = vld [vmem:[%s1189_s0 + $0x64] ss:$16 sps:$4 sm:$0xff]   ;;  %v855_v40 = vld [vmem:[%s1189_s0 + $0x60] ss:$16 sps:$4 sm:$0xff]   ;;  %v858_v42 = vld [vmem:[%s1189_s0 + $0x48] ss:$16 sps:$4 sm:$0xff]  }
   0xf   :  { %551 = vmatpush1.bf16.msra.mxu1 %v821_v11  ;;  %v859_v41 = vld [vmem:[%s1189_s0 + $0x84] ss:$16 sps:$4 sm:$0xff]   ;;  %v862_v43 = vld [vmem:[%s1189_s0 + $0x6c] ss:$16 sps:$4 sm:$0xff]   ;;  %v861_v44 = vld [vmem:[%s1189_s0 + $0x80] ss:$16 sps:$4 sm:$0xff]  }
  0x10   :  { %753 = vmatpush3.bf16.msra.mxu0 %v822_v12  ;;  %552 = vmatprep.subr.bf16.mxu1 %v886_v0  ;;  %v865_v45 = vld [vmem:[%s1189_s0 + $0xa4] ss:$16 sps:$4 sm:$0xff]   ;;  %v864_v46 = vld [vmem:[%s1189_s0 + $0x68] ss:$16 sps:$4 sm:$0xff]   ;;  %v868_v47 = vld [vmem:[%s1189_s0 + $0x8c] ss:$16 sps:$4 sm:$0xff]  }
  0x11   :  { %754 = vmatprep.subr.bf16.mxu0 %v823_v13  ;;  %v867_v48 = vld [vmem:[%s1189_s0 + $0xa0] ss:$16 sps:$4 sm:$0xff]   ;;  %v871_v49 = vld [vmem:[%s1189_s0 + $0xc4] ss:$16 sps:$4 sm:$0xff]   ;;  %v870_v50 = vld [vmem:[%s1189_s0 + $0x88] ss:$16 sps:$4 sm:$0xff]  }
  0x12   :  { %v874_v51 = vld [vmem:[%s1189_s0 + $0xac] ss:$16 sps:$4 sm:$0xff]   ;;  %v873_v52 = vld [vmem:[%s1189_s0 + $0xc0] ss:$16 sps:$4 sm:$0xff]   ;;  %v877_v53 = vld [vmem:[%s1189_s0 + $0xe4] ss:$16 sps:$4 sm:$0xff]  }
  0x13   :  { %553 = vmatpush1.bf16.msra.mxu1 %v824_v14  ;;  %v876_v54 = vld [vmem:[%s1189_s0 + $0xa8] ss:$16 sps:$4 sm:$0xff]   ;;  %v880_v55 = vld [vmem:[%s1189_s0 + $0xcc] ss:$16 sps:$4 sm:$0xff]   ;;  %v879_v56 = vld [vmem:[%s1189_s0 + $0xe0] ss:$16 sps:$4 sm:$0xff]  }
  0x14   :  { %755 = vmatpush3.bf16.msra.mxu0 %v825_v15  ;;  %554 = vmatprep.subr.bf16.mxu1 %v886_v0  ;;  %v882_v57 = vld [vmem:[%s1189_s0 + $0xc8] ss:$16 sps:$4 sm:$0xff]   ;;  %v883_v58 = vld [vmem:[%s1189_s0 + $0xec] ss:$16 sps:$4 sm:$0xff]   ;;  %v1106_v1 = vld [vmem:[%s1190_s2] ss:$0 sm:$0xff] }
  0x15   :  { %756 = vmatprep.subr.bf16.mxu0 %v826_v16  ;;  %v885_v59 = vld [vmem:[%s1189_s0 + $0xe8] ss:$16 sps:$4 sm:$0xff]  }
  0x17   :  { %555 = vmatpush1.bf16.msra.mxu1 %v827_v17 }
  0x18   :  { %757 = vmatpush3.bf16.msra.mxu0 %v828_v18  ;;  %556 = vmatprep.subr.bf16.mxu1 %v886_v0 }
  0x19   :  { %758 = vmatprep.subr.bf16.mxu0 %v829_v19 }
  0x1b   :  { %557 = vmatpush1.bf16.msra.mxu1 %v830_v20 }
  0x1c   :  { %759 = vmatpush3.bf16.msra.mxu0 %v831_v21  ;;  %558 = vmatprep.subr.bf16.mxu1 %v886_v0 }
  0x1d   :  { %760 = vmatprep.subr.bf16.mxu0 %v832_v22 }
  0x1f   :  { %559 = vmatpush1.bf16.msra.mxu1 %v833_v24 }
  0x20   :  { %761 = vmatpush3.bf16.msra.mxu0 %v834_v25  ;;  %570 = vmatprep.subr.bf16.mxu1 %v886_v0 }
  0x23   :  { %480 = vmatmul.mubr.bf16.vlgmr.msra.gmra.mxu0 %v835_v26  ;;  %571 = vmatpush2.bf16.msra.mxu1 %v838_v28 }
  0x24   :  { %572 = vmatprep.subr.bf16.mxu1 %v886_v0  ;;  %487 = vmatprep.mubr.bf16.mxu0 %v840_v29 }
  0x27   :  { %573 = vmatpush2.bf16.msra.mxu1 %v839_v30 }
  0x28   :  { %574 = vmatprep.subr.bf16.mxu1 %v886_v0 }
  0x2b   :  { %488 = vmatmul.mubr.bf16.gmra.mxu0 %v842_v31  ;;  %575 = vmatpush2.bf16.msra.mxu1 %v843_v32 }
  0x2c   :  { %495 = vmatprep.mubr.bf16.mxu0 %v847_v33 }
  0x2e   :  { %577 = vmatmul.mubr.bf16.vlgmr.msra.gmra.mxu1 %v844_v34 }
  0x2f   :  { %739 = vmatprep.mubr.msk.bf16.mxu1 %vm422_vm0, %v850_v35 }
  0x33   :  { %496 = vmatmul.mubr.bf16.gmra.mxu0 %v849_v36 }
  0x34   :  { %503 = vmatprep.mubr.bf16.mxu0 %v853_v37 }
  0x36   :  { %585 = vmatmul.mubr.bf16.gmra.mxu1 %v852_v38 }
  0x37   :  { %740 = vmatprep.mubr.msk.bf16.mxu1 %vm422_vm0, %v856_v39 }
  0x3b   :  { %504 = vmatmul.mubr.bf16.gmra.mxu0 %v855_v40 }
  0x3c   :  { %511 = vmatprep.mubr.bf16.mxu0 %v859_v41 }
  0x3e   :  { %593 = vmatmul.mubr.bf16.gmra.mxu1 %v858_v42 }
  0x3f   :  { %741 = vmatprep.mubr.msk.bf16.mxu1 %vm422_vm0, %v862_v43 }
  0x43   :  { %512 = vmatmul.mubr.bf16.gmra.mxu0 %v861_v44 }
  0x44   :  { %519 = vmatprep.mubr.bf16.mxu0 %v865_v45 }
  0x46   :  { %601 = vmatmul.mubr.bf16.gmra.mxu1 %v864_v46 }
  0x47   :  { %742 = vmatprep.mubr.msk.bf16.mxu1 %vm422_vm0, %v868_v47 }
  0x4b   :  { %520 = vmatmul.mubr.bf16.gmra.mxu0 %v867_v48 }
  0x4c   :  { %527 = vmatprep.mubr.bf16.mxu0 %v871_v49 }
  0x4e   :  { %609 = vmatmul.mubr.bf16.gmra.mxu1 %v870_v50 }
  0x4f   :  { %743 = vmatprep.mubr.msk.bf16.mxu1 %vm422_vm0, %v874_v51 }
  0x53   :  { %528 = vmatmul.mubr.bf16.gmra.mxu0 %v873_v52 }
  0x54   :  { %535 = vmatprep.mubr.bf16.mxu0 %v877_v53 }
  0x56   :  { %617 = vmatmul.mubr.bf16.gmra.mxu1 %v876_v54 }
  0x57   :  { %744 = vmatprep.mubr.msk.bf16.mxu1 %vm422_vm0, %v880_v55 }
  0x5b   :  { %536 = vmatmul.mubr.bf16.gmra.mxu0 %v879_v56 }
  0x5e   :  { %625 = vmatmul.mubr.bf16.gmra.mxu1 %v882_v57 }
  0x5f   :  { %745 = vmatprep.mubr.msk.bf16.mxu1 %vm422_vm0, %v883_v58 }
  0x66   :  { %633 = vmatmul.mubr.bf16.gmra.mxu1 %v885_v59 }
  0xe3   :  { %v762_v60 = vpop.f32.mrf.mxu0 }
  0xe5   :  { %v763_v61 = vpop.f32.mrf.mxu0 }
  0xe6   :  { %v764_v63 = vadd.f32 %v763_v61, %v762_v60 }
  0xe7   :  { %v765_v62 = vpop.f32.mrf.mxu0 }
  0xe8   :  { %v482_v5 = vadd.f32 %v764_v63, %v1106_v1 }
  0xe9   :  { %v766_v0 = vpop.f32.mrf.mxu0 }
  0xea   :  { %v767_v3 = vadd.f32 %v766_v0, %v765_v62 }
  0xeb   :  { %v768_v2 = vpop.f32.mrf.mxu0 }
  0xec   :  { %v485_v13 = vadd.f32 %v767_v3, %v1106_v1 }
  0xed   :  { %v769_v4 = vpop.f32.mrf.mxu0 }
  0xee   :  { %v578_v6 = vpop.f32.mrf.mxu1  ;;  %v770_v10 = vadd.f32 %v769_v4, %v768_v2 }
  0xef   :  { %v579_v7 = vadd.f32 %v578_v6, %v482_v5  ;;  %v771_v8 = vpop.f32.mrf.mxu0 }
  0xf0   :  { %v580_v9 = vpop.f32.mrf.mxu1  ;;  %v490_v21 = vadd.f32 %v770_v10, %v1106_v1 }
  0xf1   :  { %v641_v11 = vmax.f32 %v579_v7, 0.0  ;;  %v772_v12 = vpop.f32.mrf.mxu0 }
  0xf2   :  { %v581_v14 = vpop.f32.mrf.mxu1  ;;  %v773_v18 = vadd.f32 %v772_v12, %v771_v8 }
  0xf3   :  { %658 = vst.msk [vmem:[%s1191_s3] sm:$0xff] %vm657_vm1, %v641_v11  ;;  %v582_v15 = vadd.f32 %v581_v14, %v485_v13  ;;  %v774_v16 = vpop.f32.mrf.mxu0 }
  0xf4   :  { %v583_v17 = vpop.f32.mrf.mxu1  ;;  %v493_v29 = vadd.f32 %v773_v18, %v1106_v1 }
  0xf5   :  { %v642_v19 = vmax.f32 %v582_v15, 0.0  ;;  %v775_v20 = vpop.f32.mrf.mxu0 }
  0xf6   :  { %v586_v22 = vpop.f32.mrf.mxu1  ;;  %v776_v26 = vadd.f32 %v775_v20, %v774_v16 }
  0xf7   :  { %659 = vst.msk [vmem:[%s1191_s3 + $0x8] sm:$0xff] %vm657_vm1, %v642_v19  ;;  %v587_v23 = vadd.f32 %v586_v22, %v490_v21  ;;  %v777_v24 = vpop.f32.mrf.mxu0 }
  0xf8   :  { %v588_v25 = vpop.f32.mrf.mxu1  ;;  %v498_v37 = vadd.f32 %v776_v26, %v1106_v1 }
  0xf9   :  { %v643_v27 = vmax.f32 %v587_v23, 0.0  ;;  %v778_v28 = vpop.f32.mrf.mxu0 }
  0xfa   :  { %v589_v30 = vpop.f32.mrf.mxu1  ;;  %v779_v34 = vadd.f32 %v778_v28, %v777_v24 }
  0xfb   :  { %660 = vst.msk [vmem:[%s1191_s3 + $0x10] sm:$0xff] %vm657_vm1, %v643_v27  ;;  %v590_v31 = vadd.f32 %v589_v30, %v493_v29  ;;  %v780_v32 = vpop.f32.mrf.mxu0 }
  0xfc   :  { %v591_v33 = vpop.f32.mrf.mxu1  ;;  %v501_v45 = vadd.f32 %v779_v34, %v1106_v1 }
  0xfd   :  { %v644_v35 = vmax.f32 %v590_v31, 0.0  ;;  %v781_v36 = vpop.f32.mrf.mxu0 }
  0xfe   :  { %v594_v38 = vpop.f32.mrf.mxu1  ;;  %v782_v42 = vadd.f32 %v781_v36, %v780_v32 }
  0xff   :  { %661 = vst.msk [vmem:[%s1191_s3 + $0x18] sm:$0xff] %vm657_vm1, %v644_v35  ;;  %v595_v39 = vadd.f32 %v594_v38, %v498_v37  ;;  %v783_v40 = vpop.f32.mrf.mxu0 }
 0x100   :  { %v596_v41 = vpop.f32.mrf.mxu1  ;;  %v506_v53 = vadd.f32 %v782_v42, %v1106_v1 }
 0x101   :  { %v645_v43 = vmax.f32 %v595_v39, 0.0  ;;  %v784_v44 = vpop.f32.mrf.mxu0 }
 0x102   :  { %v597_v46 = vpop.f32.mrf.mxu1  ;;  %v785_v50 = vadd.f32 %v784_v44, %v783_v40 }
 0x103   :  { %662 = vst.msk [vmem:[%s1191_s3 + $0x20] sm:$0xff] %vm657_vm1, %v645_v43  ;;  %v598_v47 = vadd.f32 %v597_v46, %v501_v45  ;;  %v786_v48 = vpop.f32.mrf.mxu0 }
 0x104   :  { %v599_v49 = vpop.f32.mrf.mxu1  ;;  %v509_v61 = vadd.f32 %v785_v50, %v1106_v1 }
 0x105   :  { %v646_v51 = vmax.f32 %v598_v47, 0.0  ;;  %v787_v52 = vpop.f32.mrf.mxu0 }
 0x106   :  { %v602_v54 = vpop.f32.mrf.mxu1  ;;  %v788_v58 = vadd.f32 %v787_v52, %v786_v48 }
 0x107   :  { %663 = vst.msk [vmem:[%s1191_s3 + $0x28] sm:$0xff] %vm657_vm1, %v646_v51  ;;  %v603_v55 = vadd.f32 %v602_v54, %v506_v53  ;;  %v789_v56 = vpop.f32.mrf.mxu0 }
 0x108   :  { %v604_v57 = vpop.f32.mrf.mxu1  ;;  %v514_v6 = vadd.f32 %v788_v58, %v1106_v1 }
 0x109   :  { %v647_v59 = vmax.f32 %v603_v55, 0.0  ;;  %v790_v60 = vpop.f32.mrf.mxu0 }
 0x10a   :  { %v605_v62 = vpop.f32.mrf.mxu1  ;;  %v791_v3 = vadd.f32 %v790_v60, %v789_v56 }
 0x10b   :  { %664 = vst.msk [vmem:[%s1191_s3 + $0x30] sm:$0xff] %vm657_vm1, %v647_v59  ;;  %v606_v63 = vadd.f32 %v605_v62, %v509_v61  ;;  %v792_v0 = vpop.f32.mrf.mxu0 }
 0x10c   :  { %v607_v2 = vpop.f32.mrf.mxu1  ;;  %v517_v14 = vadd.f32 %v791_v3, %v1106_v1 }
 0x10d   :  { %v648_v4 = vmax.f32 %v606_v63, 0.0  ;;  %v793_v5 = vpop.f32.mrf.mxu0 }
 0x10e   :  { %v610_v7 = vpop.f32.mrf.mxu1  ;;  %v794_v11 = vadd.f32 %v793_v5, %v792_v0 }
 0x10f   :  { %665 = vst.msk [vmem:[%s1191_s3 + $0x38] sm:$0xff] %vm657_vm1, %v648_v4  ;;  %v611_v8 = vadd.f32 %v610_v7, %v514_v6  ;;  %v795_v9 = vpop.f32.mrf.mxu0 }
 0x110   :  { %v612_v10 = vpop.f32.mrf.mxu1  ;;  %v522_v22 = vadd.f32 %v794_v11, %v1106_v1 }
 0x111   :  { %v649_v12 = vmax.f32 %v611_v8, 0.0  ;;  %v796_v13 = vpop.f32.mrf.mxu0 }
 0x112   :  { %v613_v15 = vpop.f32.mrf.mxu1  ;;  %v797_v19 = vadd.f32 %v796_v13, %v795_v9 }
 0x113   :  { %666 = vst.msk [vmem:[%s1191_s3 + $0x40] sm:$0xff] %vm657_vm1, %v649_v12  ;;  %v614_v16 = vadd.f32 %v613_v15, %v517_v14  ;;  %v798_v17 = vpop.f32.mrf.mxu0 }
 0x114   :  { %v615_v18 = vpop.f32.mrf.mxu1  ;;  %v525_v30 = vadd.f32 %v797_v19, %v1106_v1 }
 0x115   :  { %v650_v20 = vmax.f32 %v614_v16, 0.0  ;;  %v799_v21 = vpop.f32.mrf.mxu0 }
 0x116   :  { %v618_v23 = vpop.f32.mrf.mxu1  ;;  %v800_v27 = vadd.f32 %v799_v21, %v798_v17 }
 0x117   :  { %667 = vst.msk [vmem:[%s1191_s3 + $0x48] sm:$0xff] %vm657_vm1, %v650_v20  ;;  %v619_v24 = vadd.f32 %v618_v23, %v522_v22  ;;  %v801_v25 = vpop.f32.mrf.mxu0 }
 0x118   :  { %v620_v26 = vpop.f32.mrf.mxu1  ;;  %v530_v38 = vadd.f32 %v800_v27, %v1106_v1 }
 0x119   :  { %v651_v28 = vmax.f32 %v619_v24, 0.0  ;;  %v802_v29 = vpop.f32.mrf.mxu0 }
 0x11a   :  { %v621_v31 = vpop.f32.mrf.mxu1  ;;  %v803_v35 = vadd.f32 %v802_v29, %v801_v25 }
 0x11b   :  { %668 = vst.msk [vmem:[%s1191_s3 + $0x50] sm:$0xff] %vm657_vm1, %v651_v28  ;;  %v622_v32 = vadd.f32 %v621_v31, %v525_v30  ;;  %v804_v33 = vpop.f32.mrf.mxu0 }
 0x11c   :  { %v623_v34 = vpop.f32.mrf.mxu1  ;;  %v533_v45 = vadd.f32 %v803_v35, %v1106_v1 }
 0x11d   :  { %v652_v36 = vmax.f32 %v622_v32, 0.0  ;;  %v805_v37 = vpop.f32.mrf.mxu0 }
 0x11e   :  { %v626_v39 = vpop.f32.mrf.mxu1  ;;  %v806_v43 = vadd.f32 %v805_v37, %v804_v33 }
 0x11f   :  { %669 = vst.msk [vmem:[%s1191_s3 + $0x58] sm:$0xff] %vm657_vm1, %v652_v36  ;;  %v627_v40 = vadd.f32 %v626_v39, %v530_v38  ;;  %v807_v41 = vpop.f32.mrf.mxu0 }
 0x120   :  { %v628_v42 = vpop.f32.mrf.mxu1  ;;  %v538_v52 = vadd.f32 %v806_v43, %v1106_v1 }
 0x121   :  { %v653_v44 = vmax.f32 %v627_v40, 0.0  ;;  %v808_v46 = vpop.f32.mrf.mxu0 }
 0x122   :  { %v629_v47 = vpop.f32.mrf.mxu1  ;;  %v809_v50 = vadd.f32 %v808_v46, %v807_v41 }
 0x123   :  { %670 = vst.msk [vmem:[%s1191_s3 + $0x60] sm:$0xff] %vm657_vm1, %v653_v44  ;;  %v630_v48 = vadd.f32 %v629_v47, %v533_v45 }
 0x124   :  { %v631_v49 = vpop.f32.mrf.mxu1  ;;  %v541_v57 = vadd.f32 %v809_v50, %v1106_v1 }
 0x125   :  { %v654_v51 = vmax.f32 %v630_v48, 0.0 }
 0x126   :  { %v634_v53 = vpop.f32.mrf.mxu1 }
 0x127   :  { %671 = vst.msk [vmem:[%s1191_s3 + $0x68] sm:$0xff] %vm657_vm1, %v654_v51  ;;  %v635_v54 = vadd.f32 %v634_v53, %v538_v52 }
 0x128   :  { %v636_v55 = vpop.f32.mrf.mxu1 }
 0x129   :  { %v655_v56 = vmax.f32 %v635_v54, 0.0 }
 0x12a   :  { %v637_v58 = vpop.f32.mrf.mxu1 }
 0x12b   :  { %672 = vst.msk [vmem:[%s1191_s3 + $0x70] sm:$0xff] %vm657_vm1, %v655_v56  ;;  %v638_v59 = vadd.f32 %v637_v58, %v541_v57 }
 0x12c   :  { %v639_v60 = vpop.f32.mrf.mxu1 }
 0x12d   :  { %v656_v61 = vmax.f32 %v638_v59, 0.0 }
 0x12f   :  { %673 = vst.msk [vmem:[%s1191_s3 + $0x78] sm:$0xff] %vm657_vm1, %v656_v61 }

// kernel: cnn_vanilla_forward.15
= control target key start
LH: loop header
LB: loop body
LE: loop exit
PB: predicated region body
PF: predicated region fallthrough
CT: control target
= control target key end

     0   :  { %v445_v0 = vmov 0   ;;  %vm261_vm0 = vcmask 392192   ;;  %vm349_vm1 = vcmask 130048   ;;  %s579_s1 = inlined_call_operand.vmem [shape: bf16[432,16], index: 1, kind: input, shape index: {}]   ;;  %s580_s0 = inlined_call_operand.vmem [shape: bf16[16,432], index: 0, kind: input, shape index: {}]   ;;  %s581_s2 = inlined_call_operand.vmem [shape: f32[1,16], index: 2, kind: input, shape index: {}]   ;;  %s582_s3 = inlined_call_operand.vmem [shape: f32[16,16], index: 3, kind: output, shape index: {}]  }
   0x1   :  { %306 = vmatprep.subr.bf16.mxu1 %v445_v0  ;;  %v412_v1 = vld [vmem:[%s579_s1 + $0x78] sm:$0xff]   ;;  %v415_v4 = vld [vmem:[%s579_s1 + $0x70] sm:$0xff]   ;;  %v418_v7 = vld [vmem:[%s579_s1 + $0x68] sm:$0xff]  }
   0x2   :  { %v413_v2 = vld [vmem:[%s579_s1 + $0xb8] sm:$0xff]   ;;  %389 = vmatprep.subr.bf16.mxu0 %v412_v1  ;;  %v416_v5 = vld [vmem:[%s579_s1 + $0xb0] sm:$0xff]   ;;  %v419_v8 = vld [vmem:[%s579_s1 + $0xa8] sm:$0xff]  }
   0x3   :  { %v414_v3 = vld [vmem:[%s579_s1 + $0x38] sm:$0xff]   ;;  %307 = vmatpush1.bf16.msra.mxu1 %v413_v2  ;;  %v417_v6 = vld [vmem:[%s579_s1 + $0x30] sm:$0xff]   ;;  %v420_v9 = vld [vmem:[%s579_s1 + $0x28] sm:$0xff]  }
   0x4   :  { %390 = vmatpush3.bf16.msra.mxu0 %v414_v3  ;;  %308 = vmatprep.subr.bf16.mxu1 %v445_v0  ;;  %v421_v10 = vld [vmem:[%s579_s1 + $0x60] sm:$0xff]   ;;  %v424_v13 = vld [vmem:[%s579_s1 + $0x58] sm:$0xff]   ;;  %v427_v16 = vld [vmem:[%s579_s1 + $0x50] sm:$0xff]  }
   0x5   :  { %391 = vmatprep.subr.bf16.mxu0 %v415_v4  ;;  %v422_v11 = vld [vmem:[%s579_s1 + $0xa0] sm:$0xff]   ;;  %v425_v14 = vld [vmem:[%s579_s1 + $0x98] sm:$0xff]   ;;  %v428_v17 = vld [vmem:[%s579_s1 + $0x90] sm:$0xff]  }
   0x6   :  { %v423_v12 = vld [vmem:[%s579_s1 + $0x20] sm:$0xff]   ;;  %v426_v15 = vld [vmem:[%s579_s1 + $0x18] sm:$0xff]   ;;  %v429_v18 = vld [vmem:[%s579_s1 + $0x10] sm:$0xff]  }
   0x7   :  { %309 = vmatpush1.bf16.msra.mxu1 %v416_v5  ;;  %v430_v19 = vld [vmem:[%s579_s1 + $0x48] sm:$0xff]   ;;  %v433_v22 = vld [vmem:[%s579_s1 + $0x40] sm:$0xff]   ;;  %v439_v28 = vld [vmem:[%s579_s1 + $0xd0] sm:$0xff]  }
   0x8   :  { %392 = vmatpush3.bf16.msra.mxu0 %v417_v6  ;;  %310 = vmatprep.subr.bf16.mxu1 %v445_v0  ;;  %v431_v20 = vld [vmem:[%s579_s1 + $0x88] sm:$0xff]   ;;  %v438_v23 = vld [vmem:[%s580_s0 + $0x4] ss:$16 sps:$4 sm:$0xff]   ;;  %v436_v27 = vld [vmem:[%s580_s0] ss:$16 sps:$4 sm:$0xff]  }
   0x9   :  { %393 = vmatprep.subr.bf16.mxu0 %v418_v7  ;;  %v432_v21 = vld [vmem:[%s579_s1 + $0x8] sm:$0xff]   ;;  %v434_v24 = vld [vmem:[%s579_s1 + $0x80] sm:$0xff]   ;;  %297 = vmatprep.mubr.bf16.mxu0 %v438_v23 }
   0xa   :  { %v435_v25 = vld [vmem:[%s579_s1] sm:$0xff]   ;;  %v444_v26 = vld [vmem:[%s580_s0 + $0xc] ss:$16 sps:$4 sm:$0xff]   ;;  %v442_v31 = vld [vmem:[%s580_s0 + $0x8] ss:$16 sps:$4 sm:$0xff]  }
   0xb   :  { %311 = vmatpush1.bf16.msra.mxu1 %v419_v8  ;;  %388 = vmatprep.mubr.msk.bf16.mxu1 %vm261_vm0, %v444_v26  ;;  %v440_v29 = vld [vmem:[%s579_s1 + $0xc8] sm:$0xff]   ;;  %v441_v30 = vld [vmem:[%s579_s1 + $0xc0] sm:$0xff]  }
   0xc   :  { %394 = vmatpush3.bf16.msra.mxu0 %v420_v9  ;;  %312 = vmatprep.subr.bf16.mxu1 %v445_v0  ;;  %v356_v37 = vld [vmem:[%s581_s2] ss:$0 sm:$0xff] }
   0xd   :  { %395 = vmatprep.subr.bf16.mxu0 %v421_v10 }
   0xf   :  { %313 = vmatpush1.bf16.msra.mxu1 %v422_v11 }
  0x10   :  { %396 = vmatpush3.bf16.msra.mxu0 %v423_v12  ;;  %314 = vmatprep.subr.bf16.mxu1 %v445_v0 }
  0x11   :  { %397 = vmatprep.subr.bf16.mxu0 %v424_v13 }
  0x13   :  { %315 = vmatpush1.bf16.msra.mxu1 %v425_v14 }
  0x14   :  { %398 = vmatpush3.bf16.msra.mxu0 %v426_v15  ;;  %316 = vmatprep.subr.bf16.mxu1 %v445_v0 }
  0x15   :  { %399 = vmatprep.subr.bf16.mxu0 %v427_v16 }
  0x17   :  { %317 = vmatpush1.bf16.msra.mxu1 %v428_v17 }
  0x18   :  { %400 = vmatpush3.bf16.msra.mxu0 %v429_v18  ;;  %318 = vmatprep.subr.bf16.mxu1 %v445_v0 }
  0x19   :  { %401 = vmatprep.subr.bf16.mxu0 %v430_v19 }
  0x1b   :  { %319 = vmatpush1.bf16.msra.mxu1 %v431_v20 }
  0x1c   :  { %402 = vmatpush3.bf16.msra.mxu0 %v432_v21  ;;  %320 = vmatprep.subr.bf16.mxu1 %v445_v0 }
  0x1d   :  { %403 = vmatprep.subr.bf16.mxu0 %v433_v22 }
  0x1f   :  { %321 = vmatpush1.bf16.msra.mxu1 %v434_v24 }
  0x20   :  { %404 = vmatpush3.bf16.msra.mxu0 %v435_v25  ;;  %332 = vmatprep.subr.bf16.mxu1 %v445_v0 }
  0x23   :  { %298 = vmatmul.mubr.bf16.vlgmr.msra.gmra.mxu0 %v436_v27  ;;  %333 = vmatpush2.bf16.msra.mxu1 %v439_v28 }
  0x24   :  { %334 = vmatprep.subr.bf16.mxu1 %v445_v0 }
  0x27   :  { %335 = vmatpush2.bf16.msra.mxu1 %v440_v29 }
  0x28   :  { %336 = vmatprep.subr.bf16.mxu1 %v445_v0 }
  0x2b   :  { %337 = vmatpush2.bf16.msra.mxu1 %v441_v30 }
  0x2e   :  { %339 = vmatmul.mubr.bf16.vlgmr.msra.gmra.mxu1 %v442_v31 }
  0xe3   :  { %v405_v32 = vpop.f32.mrf.mxu0 }
  0xe5   :  { %v406_v33 = vpop.f32.mrf.mxu0 }
  0xe6   :  { %v407_v35 = vadd.f32 %v406_v33, %v405_v32 }
  0xe7   :  { %v408_v34 = vpop.f32.mrf.mxu0 }
  0xe8   :  { %v300_v39 = vadd.f32 %v407_v35, %v356_v37 }
  0xe9   :  { %v409_v36 = vpop.f32.mrf.mxu0 }
  0xea   :  { %v410_v38 = vadd.f32 %v409_v36, %v408_v34 }
  0xec   :  { %v303_v44 = vadd.f32 %v410_v38, %v356_v37 }
  0xee   :  { %v340_v40 = vpop.f32.mrf.mxu1 }
  0xef   :  { %v341_v41 = vadd.f32 %v340_v40, %v300_v39 }
  0xf0   :  { %v342_v42 = vpop.f32.mrf.mxu1 }
  0xf1   :  { %v347_v43 = vmax.f32 %v341_v41, 0.0 }
  0xf2   :  { %v343_v45 = vpop.f32.mrf.mxu1 }
  0xf3   :  { %350 = vst.msk [vmem:[%s582_s3] sm:$0xff] %vm349_vm1, %v347_v43  ;;  %v344_v46 = vadd.f32 %v343_v45, %v303_v44 }
  0xf4   :  { %v345_v47 = vpop.f32.mrf.mxu1 }
  0xf5   :  { %v348_v48 = vmax.f32 %v344_v46, 0.0 }
  0xf7   :  { %351 = vst.msk [vmem:[%s582_s3 + $0x8] sm:$0xff] %vm349_vm1, %v348_v48 }

// kernel: cnn_vanilla_forward.16
= control target key start
LH: loop header
LB: loop body
LE: loop exit
PB: predicated region body
PF: predicated region fallthrough
CT: control target
= control target key end

     0   :  { %s40_s22 = smov 112   ;;  %vm32_vm0 = vcmask 122880   ;;  %s81_s0 = inlined_call_operand.vmem [shape: f32[2,2,2,1,32], index: 0, kind: input, shape index: {}]   ;;  %s82_s1 = inlined_call_operand.vmem [shape: f32[2,1,1,16], index: 1, kind: output, shape index: {}]  }
   0x1   :  { %v8_v0 = vld [vmem:[%s81_s0] sm:$0x1]  ;;  %v9_v1 = vld [vmem:[%s81_s0 + $0x1] sm:$0x1]  ;;  %v10_v2 = vld [vmem:[%s81_s0 + $0x2] sm:$0x1] }
   0x2   :  { %v11_v3 = vld [vmem:[%s81_s0 + $0x3] sm:$0x1]  ;;  %v16_v4 = vmax.f32 %v8_v0, %v10_v2  ;;  %v12_v5 = vld [vmem:[%s81_s0 + $0x4] sm:$0x1]  ;;  %v13_v6 = vld [vmem:[%s81_s0 + $0x5] sm:$0x1] }
   0x3   :  { %v17_v7 = vmax.f32 %v9_v1, %v11_v3  ;;  %v14_v8 = vld [vmem:[%s81_s0 + $0x6] sm:$0x1]  ;;  %v15_v9 = vld [vmem:[%s81_s0 + $0x7] sm:$0x1] }
   0x4   :  { %v18_v10 = vmax.f32 %v12_v5, %v14_v8  ;;  %v19_v11 = vmax.f32 %v13_v6, %v15_v9 }
   0x5   :  { %v20_v12 = vmax.f32 %v16_v4, %v17_v7 }
   0x6   :  { %v21_v13 = vmax.f32 %v18_v10, %v19_v11 }
   0x7   :  { %24 = vrot.lane.b32.xlu0 %v20_v12, %s40_s22 }
   0xb   :  { %26 = vrot.lane.b32.xlu0 %v21_v13, %s40_s22 }
  0x79   :  { %v25_v14 = vpop.permute.xlu0 %24 }
  0x7a   :  { %v30_v15 = vmax.f32 %v20_v12, %v25_v14 }
  0x7c   :  { %33 = vst.msk [vmem:[%s82_s1] sm:$0x1] %vm32_vm0, %v30_v15 }
  0x7d   :  { %v27_v16 = vpop.permute.xlu0 %26 }
  0x7e   :  { %v31_v17 = vmax.f32 %v21_v13, %v27_v16 }
  0x80   :  { %34 = vst.msk [vmem:[%s82_s1 + $0x1] sm:$0x1] %vm32_vm0, %v31_v17 }

// kernel: cnn_vanilla_forward.17
= control target key start
LH: loop header
LB: loop body
LE: loop exit
PB: predicated region body
PF: predicated region fallthrough
CT: control target
= control target key end

     0   :  { %12 = vsyncpa [#allocation3], 0  ;;  %v321_v1 = vmov 0.0   ;;  %vm322_vm0 = vmmov 0   ;;  %s396_s0 = inlined_call_operand.vmem [shape: f32[2,16], index: 0, kind: input, shape index: {}]   ;;  %s397_s1 = inlined_call_operand.vmem [shape: f32[16,32], index: 1, kind: input, shape index: {}]   ;;  %s398_s2 = inlined_call_operand.vmem [shape: f32[1,32], index: 2, kind: input, shape index: {}]   ;;  %s399_s3 = inlined_call_operand.vmem [shape: f32[32,4], index: 3, kind: input, shape index: {}]   ;;  %s400_s4 = inlined_call_operand.vmem [shape: f32[1,4], index: 4, kind: input, shape index: {}]   ;;  %s401_s5 = inlined_call_operand.hbm [shape: f32[2,4], index: 5, kind: output, shape index: {0}]   ;;  %s402_s6 = inlined_call_operand.hbm [shape: f32[2,32], index: 6, kind: output, shape index: {1}]  }
   0x1   :  { %v26_v0 = vld [vmem:[%s397_s1 + $0x8] sm:$0xff]  ;;  %251 = vmatprep.subr.mxu0 %v321_v1  ;;  %v25_v2 = vld [vmem:[%s397_s1] sm:$0xff]  ;;  %255 = vmatprep.mubr.msk.f32.mxu0 %vm322_vm0, %v321_v1  ;;  %v114_v3 = vld [vmem:[%s399_s3 + $0x18] sm:$0xff] }
   0x2   :  { %13 = vsyncpa [#allocation5], 0  ;;  %252 = vmatpush3.msra.mxu0 %v26_v0  ;;  %v24_v4 = vld [vmem:[%s396_s0] sm:$0x3]  ;;  %vm34_vm1 = vcmask 130048   ;;  %258 = vmatprep.subr.mxu1 %v321_v1  ;;  %v113_v5 = vld [vmem:[%s399_s3 + $0x10] sm:$0xff] }
   0x3   :  { %253 = vmatprep.subr.mxu0 %v321_v1  ;;  %259 = vmatpush3.msra.mxu1 %v114_v3  ;;  %v112_v6 = vld [vmem:[%s399_s3 + $0x8] sm:$0xff]  ;;  %v111_v7 = vld [vmem:[%s399_s3] sm:$0xff]  ;;  %vm122_vm2 = vcmask 261120   ;;  %vm109_vm3 = vcmask 254976   ;;  %vm196_vm4 = vcmask 25600  }
   0x4   :  { %254 = vmatpush3.msra.mxu0 %v25_v2  ;;  %260 = vmatprep.subr.mxu1 %v321_v1  ;;  %v239_v8 = vld [vmem:[%s398_s2] ss:$0 sm:$0xff]  ;;  %s323_s2 = smov [#allocation4]  }
   0x5   :  { %256 = vmatmul.mubr.msk.f32.vlgmr.msra.gmra.mxu0 %vm34_vm1, %v24_v4  ;;  %266 = vmatprep.mubr.msk.f32.mxu1 %vm322_vm0, %v321_v1  ;;  %v241_v13 = vld [vmem:[%s400_s4] ss:$0 sm:$0xff]  ;;  %s227_s3 = sshll.u32 %s323_s2, 4  ;;  %s228_s3 = int_to_ptr.vmem [resolvable:$true] %s227_s3 }
   0x6   :  { %261 = vmatpush3.msra.mxu1 %v113_v5  ;;  %s277_s13 = scalar_lea.vmem %s228_s3, 32  ;;  %p282_p1 = scmp.lt.s32.totalorder %s228_s3, %s228_s3 }
   0x7   :  { %262 = vmatprep.subr.mxu1 %v321_v1  ;;  %p278_p0 = scmp.ne.s32.totalorder %s228_s3, %s277_s13  ;;  %p283_p2 = scmp.lt.s32.totalorder %s277_s13, %s277_s13 }
   0x8   :  { %263 = vmatpush3.msra.mxu1 %v112_v6 }
   0x9   :  { %264 = vmatprep.subr.mxu1 %v321_v1  ;;  %p284_p3 = por %p283_p2, %p282_p1 }
   0xa   :  { %265 = vmatpush3.msra.mxu1 %v111_v7 }
   0xb   :  { %p285_p4 = pnand %p284_p3, %p278_p0 }
  0xc5   :  { %v104_v9 = vpop.f32.mrf.mxu0 }
  0xc6   :  { %v105_v10 = vadd.f32 %v239_v8, %v104_v9 }
  0xc7   :  { %v257_v11 = vpop.f32.mrf.mxu0 }
  0xc8   :  { %v108_v12 = vmax.f32 %v105_v10, 0.0 }
  0xca   :  { %267 = vmatmul.mubr.msk.f32.vlgmr.msra.gmra.mxu1 %vm122_vm2, %v108_v12  ;;  %110 = vst.msk [vmem:[#allocation4] sm:$0x3] %vm109_vm3, %v108_v12 }
 0x18a   :  { %v192_v14 = vpop.f32.mrf.mxu1 }
 0x18b   :  { %v193_v15 = vadd.f32 %v241_v13, %v192_v14 }
 0x18c   :  { %v268_v16 = vpop.f32.mrf.mxu1 }
 0x18d   :  { %v197_v17 = vsel %vm196_vm4, %v193_v15, -inf }
 0x18e   :  { %198 = vmax.xlane.f32.xlu0 %v197_v17 }
 0x217   :  { %v199_v18 = vpop.xlane.xlu0 %198 }
 0x218   :  { %v200_v19 = vsub.f32 %v193_v15, %v199_v18 }
 0x21a   :  { %v201_v20 = vmul.f32 1.442695, %v200_v19 }
 0x21c   :  { %273 = vpow2.f32 %v201_v20 }
 0x229   :  { %v274_v21 = vpop.eup %273 }
 0x22a   :  { %v203_v22 = vsel %vm196_vm4, %v274_v21, 0.0 }
 0x22b   :  { %204 = vadd.xlane.f32.xlu0 %v203_v22 }
 0x22c   :  { %288 = shalt.err (!%p285_p4)
}
 0x22d   :  { %230 = dma.vmem_to_hbm [thread:$0]  %s228_s3, 32, %s402_s6, [#allocation5]  }
 0x22e   :  { %s324_s15 = smov [#allocation2]  }
 0x22f   :  { %s217_s16 = sshll.u32 %s324_s15, 4  ;;  %s218_s16 = int_to_ptr.vmem [resolvable:$true] %s217_s16 }
 0x230   :  { %s297_s17 = scalar_lea.vmem %s218_s16, 32  ;;  %p302_p6 = scmp.lt.s32.totalorder %s218_s16, %s218_s16 }
 0x231   :  { %p298_p5 = scmp.ne.s32.totalorder %s218_s16, %s297_s17  ;;  %p303_p7 = scmp.lt.s32.totalorder %s297_s17, %s297_s17 }
 0x233   :  { %p304_p8 = por %p303_p7, %p302_p6 }
 0x235   :  { %p305_p9 = pnand %p304_p8, %p298_p5 }
 0x2b4   :  { %v205_v23 = vpop.xlane.xlu0 %204 }
 0x2b5   :  { %275 = vlog2.f32 %v205_v23 }
 0x2c2   :  { %v276_v24 = vpop.eup %275 }
 0x2c3   :  { %v207_v25 = vmul.f32 0.6931472, %v276_v24 }
 0x2c5   :  { %v208_v26 = vadd.f32 %v207_v25, %v199_v18 }
 0x2c7   :  { %v209_v27 = vsub.f32 %v193_v15, %v208_v26 }
 0x2c9   :  { %210 = vst.msk [vmem:[#allocation2] sm:$0x3] %vm196_vm4, %v209_v27 }
 0x2ca   :  { %308 = shalt.err (!%p305_p9)
}
 0x2cb   :  { %220 = dma.vmem_to_hbm [thread:$0]  %s218_s16, 32, %s401_s5, [#allocation3]  }
 0x2cc   :  { %317 = dma.done.wait [#allocation3], 32  }
 0x2cd   :  { %318 = vsyncadd [#allocation3], 4294967264 }
 0x2ce   :  { %319 = dma.done.wait [#allocation5], 32  }
 0x2cf   :  { %320 = vsyncadd [#allocation5], 4294967264 }
 0x2d0   :  { %237 = vsyncpa [#allocation3], 1 }
 0x2d1   :  { %238 = vsyncpa [#allocation5], 1 }

</bundles_post_ra>
